<compile_context>
chip_gen: v5e
topology: v5e:2x2
jax: 0.10.0
libtpu: 0.0.40
codegen_flags: <defaults>
</compile_context>

<pallas_src>
import functools

import jax
import jax.numpy as jnp
from jax.experimental import pallas as pl
from jax.experimental.pallas import tpu as pltpu


def _ceil_div(a, b):
    return -(-a // b)


def _adaptive_max_pool_kernel(x_ref, o_ref, *, out_h, out_w, in_h, in_w):
    """x_ref: (b_tile, H, W, Ct) NHWC VMEM tile; o_ref: (b_tile, out_h, out_w, Ct).

    Channels are on the lane axis: each bin max is a chain of dense elementwise
    jnp.maximum ops (VPU) over (b, ww, Ct) slabs plus one tiny sublane reduce,
    and the result is stored straight into the lane-dense output ref.
    """
    for i in range(out_h):  # static python loops -> fully unrolled at trace time
        hs = (i * in_h) // out_h
        he = _ceil_div((i + 1) * in_h, out_h)
        for j in range(out_w):
            ws = (j * in_w) // out_w
            we = _ceil_div((j + 1) * in_w, out_w)
            window = x_ref[:, hs:he, ws:we, :]          # (b, wh, ww, Ct), static slice
            acc = window[:, 0]                          # (b, ww, Ct)
            for a in range(1, he - hs):
                acc = jnp.maximum(acc, window[:, a])    # dense VPU elementwise max
            bin_max = jnp.max(acc, axis=1)              # (b, Ct): small sublane reduce
            o_ref[:, i, j, :] = bin_max.astype(o_ref.dtype)


def _choose_c_tile(c, h, w, oh, ow, itemsize, budget_bytes):
    """Largest channel tile (multiple of 128 that divides C) whose double-buffered
    input + output blocks fit the VMEM budget. Falls back to full C (needed when
    C is not a multiple of 128 so the (8,128) rule is met via full-dim blocks)."""
    if c % 128 != 0:
        return c
    best = 128
    for t in range(128, c + 1, 128):
        if c % t != 0:
            continue
        need = 2 * (h * w + oh * ow) * t * itemsize  # double-buffered in + out
        if need <= budget_bytes:
            best = t
    return best


def _choose_b_tile(n, h, w, c_tile, oh, ow, itemsize, budget_bytes):
    """Batch elements per grid step: amortize per-step overhead for tiny slabs
    while keeping the block within the VMEM budget and divisibility of N."""
    per_sample = 2 * (h * w + oh * ow) * c_tile * itemsize
    cap = max(1, budget_bytes // max(per_sample, 1))
    cap = min(cap, 8)  # keep enough grid steps for pipelining / megacore
    best = 1
    for d in range(1, min(n, cap) + 1):
        if n % d == 0:
            best = d
    return best


def roi_pool(feature_maps, size):
    """Equivalent of ROI_Pool.forward: AdaptiveMaxPool2d(size) on an NCHW tensor."""
    assert feature_maps.ndim == 4, "Expected 4D input of (N, C, H, W)"
    assert len(size) == 2, "size must be (h, w)"
    n, c, h, w = feature_maps.shape
    oh, ow = size
    itemsize = jnp.dtype(feature_maps.dtype).itemsize

    # Size blocks to ~12 MiB double-buffered so they fit every generation's
    # scoped VMEM (v5e 16 MiB / v6e 32 MiB / v7x 32 MiB defaults, 64 MiB phys on v7x).
    budget = 12 * 1024 * 1024
    c_tile = _choose_c_tile(c, h, w, oh, ow, itemsize, budget)
    b_tile = _choose_b_tile(n, h, w, c_tile, oh, ow, itemsize, budget)
    grid = (n // b_tile, c // c_tile)

    # Layout plumbing in XLA: put channels on the lane axis (NHWC).
    x_nhwc = jnp.transpose(feature_maps, (0, 2, 3, 1))

    kernel = functools.partial(
        _adaptive_max_pool_kernel, out_h=oh, out_w=ow, in_h=h, in_w=w
    )

    out_nhwc = pl.pallas_call(
        kernel,
        out_shape=jax.ShapeDtypeStruct((n, oh, ow, c), feature_maps.dtype),
        grid=grid,
        in_specs=[
            pl.BlockSpec((b_tile, h, w, c_tile), lambda bi, ci: (bi, 0, 0, ci))
        ],
        out_specs=pl.BlockSpec(
            (b_tile, oh, ow, c_tile), lambda bi, ci: (bi, 0, 0, ci)
        ),
        compiler_params=pltpu.CompilerParams(
            dimension_semantics=("parallel", "parallel"),
            vmem_limit_bytes=48 * 1024 * 1024,
        ),
        cost_estimate=pl.CostEstimate(
            flops=n * c * h * w,  # ~one compare per input element
            transcendentals=0,
            bytes_accessed=(n * c * h * w + n * c * oh * ow) * itemsize,
        ),
    )(x_nhwc)

    # Back to PyTorch's NCHW layout.
    return jnp.transpose(out_nhwc, (0, 3, 1, 2))


def _reference_adaptive_max_pool(x, size):
    """Pure-JAX reference implementing PyTorch AdaptiveMaxPool2d semantics."""
    n, c, h, w = x.shape
    oh, ow = size
    out = jnp.zeros((n, c, oh, ow), x.dtype)
    for i in range(oh):
        hs, he = (i * h) // oh, _ceil_div((i + 1) * h, oh)
        for j in range(ow):
            ws, we = (j * w) // ow, _ceil_div((j + 1) * w, ow)
            out = out.at[:, :, i, j].set(
                jnp.max(x[:, :, hs:he, ws:we], axis=(2, 3))
            )
    return out


if __name__ == "__main__":
    # ROI_Pool has no learnable parameters; only the pooling output size.
    pool_size = (7, 7)

    key = jax.random.PRNGKey(0)
    x = jax.random.normal(key, (2, 4, 16, 16), dtype=jnp.float32)

    out = jax.block_until_ready(roi_pool(x, pool_size))

    ref = _reference_adaptive_max_pool(x, pool_size)
    assert out.shape == (2, 4, 7, 7), out.shape
    assert jnp.allclose(out, ref), "Pallas ROI_Pool does not match reference"

    print("KERNEL_OK")
</pallas_src>

<mosaic_0001>
module attributes {stable_mosaic.version = 11 : i64} {
  func.func @_adaptive_max_pool_kernel(%arg0: i32, %arg1: i32, %arg2: memref<2x16x16x4xf32, #tpu.memory_space<vmem>>, %arg3: memref<2x7x7x4xf32, #tpu.memory_space<vmem>>) attributes {dimension_semantics = [#tpu.dimension_semantics<parallel>, #tpu.dimension_semantics<parallel>], iteration_bounds = array<i64: 1, 1>, scalar_prefetch = 0 : i64, scratch_operands = 0 : i64, tpu.core_type = #tpu.core_type<tc>, window_params = [{transform_indices = @transform_0, window_bounds = array<i64: 2, 16, 16, 4>}, {transform_indices = @transform_1, window_bounds = array<i64: 2, 7, 7, 4>}]} {
    %c0 = arith.constant 0 : index
    %c0_0 = arith.constant 0 : index
    %c0_1 = arith.constant 0 : index
    %c0_2 = arith.constant 0 : index
    %0 = vector.load %arg2[%c0, %c0_0, %c0_1, %c0_2] : memref<2x16x16x4xf32, #tpu.memory_space<vmem>>, vector<2x3x3x4xf32>
    %1 = vector.extract_strided_slice %0 {offsets = [0, 0, 0, 0], sizes = [2, 1, 3, 4], strides = [1, 1, 1, 1]} : vector<2x3x3x4xf32> to vector<2x1x3x4xf32>
    %2 = vector.shape_cast %1 : vector<2x1x3x4xf32> to vector<2x3x4xf32>
    %3 = vector.extract_strided_slice %0 {offsets = [0, 1, 0, 0], sizes = [2, 1, 3, 4], strides = [1, 1, 1, 1]} : vector<2x3x3x4xf32> to vector<2x1x3x4xf32>
    %4 = vector.shape_cast %3 : vector<2x1x3x4xf32> to vector<2x3x4xf32>
    %5 = arith.maximumf %2, %4 : vector<2x3x4xf32>
    %6 = vector.extract_strided_slice %0 {offsets = [0, 2, 0, 0], sizes = [2, 1, 3, 4], strides = [1, 1, 1, 1]} : vector<2x3x3x4xf32> to vector<2x1x3x4xf32>
    %7 = vector.shape_cast %6 : vector<2x1x3x4xf32> to vector<2x3x4xf32>
    %8 = arith.maximumf %5, %7 : vector<2x3x4xf32>
    %cst = arith.constant dense<0xFF800000> : vector<2x4xf32>
    %9 = vector.multi_reduction <maximumf>, %8, %cst [1] : vector<2x3x4xf32> to vector<2x4xf32>
    %c0_3 = arith.constant 0 : index
    %c0_4 = arith.constant 0 : index
    %c0_5 = arith.constant 0 : index
    %c0_6 = arith.constant 0 : index
    %10 = vector.load %arg3[%c0_3, %c0_4, %c0_5, %c0_6] : memref<2x7x7x4xf32, #tpu.memory_space<vmem>>, vector<2x1x1x4xf32>
    %11 = vector.shape_cast %10 : vector<2x1x1x4xf32> to vector<2x4xf32>
    %12 = vector.shape_cast %9 : vector<2x4xf32> to vector<2x1x1x4xf32>
    tpu.vector_store %arg3[%c0_3, %c0_4, %c0_5, %c0_6], %12 {strides = array<i32>} : memref<2x7x7x4xf32, #tpu.memory_space<vmem>>, vector<2x1x1x4xf32>,
    %c0_7 = arith.constant 0 : index
    %c0_8 = arith.constant 0 : index
    %c2 = arith.constant 2 : index
    %c0_9 = arith.constant 0 : index
    %13 = vector.load %arg2[%c0_7, %c0_8, %c2, %c0_9] : memref<2x16x16x4xf32, #tpu.memory_space<vmem>>, vector<2x3x3x4xf32>
    %14 = vector.extract_strided_slice %13 {offsets = [0, 0, 0, 0], sizes = [2, 1, 3, 4], strides = [1, 1, 1, 1]} : vector<2x3x3x4xf32> to vector<2x1x3x4xf32>
    %15 = vector.shape_cast %14 : vector<2x1x3x4xf32> to vector<2x3x4xf32>
    %16 = vector.extract_strided_slice %13 {offsets = [0, 1, 0, 0], sizes = [2, 1, 3, 4], strides = [1, 1, 1, 1]} : vector<2x3x3x4xf32> to vector<2x1x3x4xf32>
    %17 = vector.shape_cast %16 : vector<2x1x3x4xf32> to vector<2x3x4xf32>
    %18 = arith.maximumf %15, %17 : vector<2x3x4xf32>
    %19 = vector.extract_strided_slice %13 {offsets = [0, 2, 0, 0], sizes = [2, 1, 3, 4], strides = [1, 1, 1, 1]} : vector<2x3x3x4xf32> to vector<2x1x3x4xf32>
    %20 = vector.shape_cast %19 : vector<2x1x3x4xf32> to vector<2x3x4xf32>
    %21 = arith.maximumf %18, %20 : vector<2x3x4xf32>
    %cst_10 = arith.constant dense<0xFF800000> : vector<2x4xf32>
    %22 = vector.multi_reduction <maximumf>, %21, %cst_10 [1] : vector<2x3x4xf32> to vector<2x4xf32>
    %c0_11 = arith.constant 0 : index
    %c0_12 = arith.constant 0 : index
    %c1 = arith.constant 1 : index
    %c0_13 = arith.constant 0 : index
    %23 = vector.load %arg3[%c0_11, %c0_12, %c1, %c0_13] : memref<2x7x7x4xf32, #tpu.memory_space<vmem>>, vector<2x1x1x4xf32>
    %24 = vector.shape_cast %23 : vector<2x1x1x4xf32> to vector<2x4xf32>
    %25 = vector.shape_cast %22 : vector<2x4xf32> to vector<2x1x1x4xf32>
    tpu.vector_store %arg3[%c0_11, %c0_12, %c1, %c0_13], %25 {strides = array<i32>} : memref<2x7x7x4xf32, #tpu.memory_space<vmem>>, vector<2x1x1x4xf32>,
    %c0_14 = arith.constant 0 : index
    %c0_15 = arith.constant 0 : index
    %c4 = arith.constant 4 : index
    %c0_16 = arith.constant 0 : index
    %26 = vector.load %arg2[%c0_14, %c0_15, %c4, %c0_16] : memref<2x16x16x4xf32, #tpu.memory_space<vmem>>, vector<2x3x3x4xf32>
    %27 = vector.extract_strided_slice %26 {offsets = [0, 0, 0, 0], sizes = [2, 1, 3, 4], strides = [1, 1, 1, 1]} : vector<2x3x3x4xf32> to vector<2x1x3x4xf32>
    %28 = vector.shape_cast %27 : vector<2x1x3x4xf32> to vector<2x3x4xf32>
    %29 = vector.extract_strided_slice %26 {offsets = [0, 1, 0, 0], sizes = [2, 1, 3, 4], strides = [1, 1, 1, 1]} : vector<2x3x3x4xf32> to vector<2x1x3x4xf32>
    %30 = vector.shape_cast %29 : vector<2x1x3x4xf32> to vector<2x3x4xf32>
    %31 = arith.maximumf %28, %30 : vector<2x3x4xf32>
    %32 = vector.extract_strided_slice %26 {offsets = [0, 2, 0, 0], sizes = [2, 1, 3, 4], strides = [1, 1, 1, 1]} : vector<2x3x3x4xf32> to vector<2x1x3x4xf32>
    %33 = vector.shape_cast %32 : vector<2x1x3x4xf32> to vector<2x3x4xf32>
    %34 = arith.maximumf %31, %33 : vector<2x3x4xf32>
    %cst_17 = arith.constant dense<0xFF800000> : vector<2x4xf32>
    %35 = vector.multi_reduction <maximumf>, %34, %cst_17 [1] : vector<2x3x4xf32> to vector<2x4xf32>
    %c0_18 = arith.constant 0 : index
    %c0_19 = arith.constant 0 : index
    %c2_20 = arith.constant 2 : index
    %c0_21 = arith.constant 0 : index
    %36 = vector.load %arg3[%c0_18, %c0_19, %c2_20, %c0_21] : memref<2x7x7x4xf32, #tpu.memory_space<vmem>>, vector<2x1x1x4xf32>
    %37 = vector.shape_cast %36 : vector<2x1x1x4xf32> to vector<2x4xf32>
    %38 = vector.shape_cast %35 : vector<2x4xf32> to vector<2x1x1x4xf32>
    tpu.vector_store %arg3[%c0_18, %c0_19, %c2_20, %c0_21], %38 {strides = array<i32>} : memref<2x7x7x4xf32, #tpu.memory_space<vmem>>, vector<2x1x1x4xf32>,
    %c0_22 = arith.constant 0 : index
    %c0_23 = arith.constant 0 : index
    %c6 = arith.constant 6 : index
    %c0_24 = arith.constant 0 : index
    %39 = vector.load %arg2[%c0_22, %c0_23, %c6, %c0_24] : memref<2x16x16x4xf32, #tpu.memory_space<vmem>>, vector<2x3x4x4xf32>
    %40 = vector.extract_strided_slice %39 {offsets = [0, 0, 0, 0], sizes = [2, 1, 4, 4], strides = [1, 1, 1, 1]} : vector<2x3x4x4xf32> to vector<2x1x4x4xf32>
    %41 = vector.shape_cast %40 : vector<2x1x4x4xf32> to vector<2x4x4xf32>
    %42 = vector.extract_strided_slice %39 {offsets = [0, 1, 0, 0], sizes = [2, 1, 4, 4], strides = [1, 1, 1, 1]} : vector<2x3x4x4xf32> to vector<2x1x4x4xf32>
    %43 = vector.shape_cast %42 : vector<2x1x4x4xf32> to vector<2x4x4xf32>
    %44 = arith.maximumf %41, %43 : vector<2x4x4xf32>
    %45 = vector.extract_strided_slice %39 {offsets = [0, 2, 0, 0], sizes = [2, 1, 4, 4], strides = [1, 1, 1, 1]} : vector<2x3x4x4xf32> to vector<2x1x4x4xf32>
    %46 = vector.shape_cast %45 : vector<2x1x4x4xf32> to vector<2x4x4xf32>
    %47 = arith.maximumf %44, %46 : vector<2x4x4xf32>
    %cst_25 = arith.constant dense<0xFF800000> : vector<2x4xf32>
    %48 = vector.multi_reduction <maximumf>, %47, %cst_25 [1] : vector<2x4x4xf32> to vector<2x4xf32>
    %c0_26 = arith.constant 0 : index
    %c0_27 = arith.constant 0 : index
    %c3 = arith.constant 3 : index
    %c0_28 = arith.constant 0 : index
    %49 = vector.load %arg3[%c0_26, %c0_27, %c3, %c0_28] : memref<2x7x7x4xf32, #tpu.memory_space<vmem>>, vector<2x1x1x4xf32>
    %50 = vector.shape_cast %49 : vector<2x1x1x4xf32> to vector<2x4xf32>
    %51 = vector.shape_cast %48 : vector<2x4xf32> to vector<2x1x1x4xf32>
    tpu.vector_store %arg3[%c0_26, %c0_27, %c3, %c0_28], %51 {strides = array<i32>} : memref<2x7x7x4xf32, #tpu.memory_space<vmem>>, vector<2x1x1x4xf32>,
    %c0_29 = arith.constant 0 : index
    %c0_30 = arith.constant 0 : index
    %c9 = arith.constant 9 : index
    %c0_31 = arith.constant 0 : index
    %52 = vector.load %arg2[%c0_29, %c0_30, %c9, %c0_31] : memref<2x16x16x4xf32, #tpu.memory_space<vmem>>, vector<2x3x3x4xf32>
    %53 = vector.extract_strided_slice %52 {offsets = [0, 0, 0, 0], sizes = [2, 1, 3, 4], strides = [1, 1, 1, 1]} : vector<2x3x3x4xf32> to vector<2x1x3x4xf32>
    %54 = vector.shape_cast %53 : vector<2x1x3x4xf32> to vector<2x3x4xf32>
    %55 = vector.extract_strided_slice %52 {offsets = [0, 1, 0, 0], sizes = [2, 1, 3, 4], strides = [1, 1, 1, 1]} : vector<2x3x3x4xf32> to vector<2x1x3x4xf32>
    %56 = vector.shape_cast %55 : vector<2x1x3x4xf32> to vector<2x3x4xf32>
    %57 = arith.maximumf %54, %56 : vector<2x3x4xf32>
    %58 = vector.extract_strided_slice %52 {offsets = [0, 2, 0, 0], sizes = [2, 1, 3, 4], strides = [1, 1, 1, 1]} : vector<2x3x3x4xf32> to vector<2x1x3x4xf32>
    %59 = vector.shape_cast %58 : vector<2x1x3x4xf32> to vector<2x3x4xf32>
    %60 = arith.maximumf %57, %59 : vector<2x3x4xf32>
    %cst_32 = arith.constant dense<0xFF800000> : vector<2x4xf32>
    %61 = vector.multi_reduction <maximumf>, %60, %cst_32 [1] : vector<2x3x4xf32> to vector<2x4xf32>
    %c0_33 = arith.constant 0 : index
    %c0_34 = arith.constant 0 : index
    %c4_35 = arith.constant 4 : index
    %c0_36 = arith.constant 0 : index
    %62 = vector.load %arg3[%c0_33, %c0_34, %c4_35, %c0_36] : memref<2x7x7x4xf32, #tpu.memory_space<vmem>>, vector<2x1x1x4xf32>
    %63 = vector.shape_cast %62 : vector<2x1x1x4xf32> to vector<2x4xf32>
    %64 = vector.shape_cast %61 : vector<2x4xf32> to vector<2x1x1x4xf32>
    tpu.vector_store %arg3[%c0_33, %c0_34, %c4_35, %c0_36], %64 {strides = array<i32>} : memref<2x7x7x4xf32, #tpu.memory_space<vmem>>, vector<2x1x1x4xf32>,
    %c0_37 = arith.constant 0 : index
    %c0_38 = arith.constant 0 : index
    %c11 = arith.constant 11 : index
    %c0_39 = arith.constant 0 : index
    %65 = vector.load %arg2[%c0_37, %c0_38, %c11, %c0_39] : memref<2x16x16x4xf32, #tpu.memory_space<vmem>>, vector<2x3x3x4xf32>
    %66 = vector.extract_strided_slice %65 {offsets = [0, 0, 0, 0], sizes = [2, 1, 3, 4], strides = [1, 1, 1, 1]} : vector<2x3x3x4xf32> to vector<2x1x3x4xf32>
    %67 = vector.shape_cast %66 : vector<2x1x3x4xf32> to vector<2x3x4xf32>
    %68 = vector.extract_strided_slice %65 {offsets = [0, 1, 0, 0], sizes = [2, 1, 3, 4], strides = [1, 1, 1, 1]} : vector<2x3x3x4xf32> to vector<2x1x3x4xf32>
    %69 = vector.shape_cast %68 : vector<2x1x3x4xf32> to vector<2x3x4xf32>
    %70 = arith.maximumf %67, %69 : vector<2x3x4xf32>
    %71 = vector.extract_strided_slice %65 {offsets = [0, 2, 0, 0], sizes = [2, 1, 3, 4], strides = [1, 1, 1, 1]} : vector<2x3x3x4xf32> to vector<2x1x3x4xf32>
    %72 = vector.shape_cast %71 : vector<2x1x3x4xf32> to vector<2x3x4xf32>
    %73 = arith.maximumf %70, %72 : vector<2x3x4xf32>
    %cst_40 = arith.constant dense<0xFF800000> : vector<2x4xf32>
    %74 = vector.multi_reduction <maximumf>, %73, %cst_40 [1] : vector<2x3x4xf32> to vector<2x4xf32>
    %c0_41 = arith.constant 0 : index
    %c0_42 = arith.constant 0 : index
    %c5 = arith.constant 5 : index
    %c0_43 = arith.constant 0 : index
    %75 = vector.load %arg3[%c0_41, %c0_42, %c5, %c0_43] : memref<2x7x7x4xf32, #tpu.memory_space<vmem>>, vector<2x1x1x4xf32>
    %76 = vector.shape_cast %75 : vector<2x1x1x4xf32> to vector<2x4xf32>
    %77 = vector.shape_cast %74 : vector<2x4xf32> to vector<2x1x1x4xf32>
    tpu.vector_store %arg3[%c0_41, %c0_42, %c5, %c0_43], %77 {strides = array<i32>} : memref<2x7x7x4xf32, #tpu.memory_space<vmem>>, vector<2x1x1x4xf32>,
    %c0_44 = arith.constant 0 : index
    %c0_45 = arith.constant 0 : index
    %c13 = arith.constant 13 : index
    %c0_46 = arith.constant 0 : index
    %78 = vector.load %arg2[%c0_44, %c0_45, %c13, %c0_46] : memref<2x16x16x4xf32, #tpu.memory_space<vmem>>, vector<2x3x3x4xf32>
    %79 = vector.extract_strided_slice %78 {offsets = [0, 0, 0, 0], sizes = [2, 1, 3, 4], strides = [1, 1, 1, 1]} : vector<2x3x3x4xf32> to vector<2x1x3x4xf32>
    %80 = vector.shape_cast %79 : vector<2x1x3x4xf32> to vector<2x3x4xf32>
    %81 = vector.extract_strided_slice %78 {offsets = [0, 1, 0, 0], sizes = [2, 1, 3, 4], strides = [1, 1, 1, 1]} : vector<2x3x3x4xf32> to vector<2x1x3x4xf32>
    %82 = vector.shape_cast %81 : vector<2x1x3x4xf32> to vector<2x3x4xf32>
    %83 = arith.maximumf %80, %82 : vector<2x3x4xf32>
    %84 = vector.extract_strided_slice %78 {offsets = [0, 2, 0, 0], sizes = [2, 1, 3, 4], strides = [1, 1, 1, 1]} : vector<2x3x3x4xf32> to vector<2x1x3x4xf32>
    %85 = vector.shape_cast %84 : vector<2x1x3x4xf32> to vector<2x3x4xf32>
    %86 = arith.maximumf %83, %85 : vector<2x3x4xf32>
    %cst_47 = arith.constant dense<0xFF800000> : vector<2x4xf32>
    %87 = vector.multi_reduction <maximumf>, %86, %cst_47 [1] : vector<2x3x4xf32> to vector<2x4xf32>
    %c0_48 = arith.constant 0 : index
    %c0_49 = arith.constant 0 : index
    %c6_50 = arith.constant 6 : index
    %c0_51 = arith.constant 0 : index
    %88 = vector.load %arg3[%c0_48, %c0_49, %c6_50, %c0_51] : memref<2x7x7x4xf32, #tpu.memory_space<vmem>>, vector<2x1x1x4xf32>
    %89 = vector.shape_cast %88 : vector<2x1x1x4xf32> to vector<2x4xf32>
    %90 = vector.shape_cast %87 : vector<2x4xf32> to vector<2x1x1x4xf32>
    tpu.vector_store %arg3[%c0_48, %c0_49, %c6_50, %c0_51], %90 {strides = array<i32>} : memref<2x7x7x4xf32, #tpu.memory_space<vmem>>, vector<2x1x1x4xf32>,
    %c0_52 = arith.constant 0 : index
    %c2_53 = arith.constant 2 : index
    %c0_54 = arith.constant 0 : index
    %c0_55 = arith.constant 0 : index
    %91 = vector.load %arg2[%c0_52, %c2_53, %c0_54, %c0_55] : memref<2x16x16x4xf32, #tpu.memory_space<vmem>>, vector<2x3x3x4xf32>
    %92 = vector.extract_strided_slice %91 {offsets = [0, 0, 0, 0], sizes = [2, 1, 3, 4], strides = [1, 1, 1, 1]} : vector<2x3x3x4xf32> to vector<2x1x3x4xf32>
    %93 = vector.shape_cast %92 : vector<2x1x3x4xf32> to vector<2x3x4xf32>
    %94 = vector.extract_strided_slice %91 {offsets = [0, 1, 0, 0], sizes = [2, 1, 3, 4], strides = [1, 1, 1, 1]} : vector<2x3x3x4xf32> to vector<2x1x3x4xf32>
    %95 = vector.shape_cast %94 : vector<2x1x3x4xf32> to vector<2x3x4xf32>
    %96 = arith.maximumf %93, %95 : vector<2x3x4xf32>
    %97 = vector.extract_strided_slice %91 {offsets = [0, 2, 0, 0], sizes = [2, 1, 3, 4], strides = [1, 1, 1, 1]} : vector<2x3x3x4xf32> to vector<2x1x3x4xf32>
    %98 = vector.shape_cast %97 : vector<2x1x3x4xf32> to vector<2x3x4xf32>
    %99 = arith.maximumf %96, %98 : vector<2x3x4xf32>
    %cst_56 = arith.constant dense<0xFF800000> : vector<2x4xf32>
    %100 = vector.multi_reduction <maximumf>, %99, %cst_56 [1] : vector<2x3x4xf32> to vector<2x4xf32>
    %c0_57 = arith.constant 0 : index
    %c1_58 = arith.constant 1 : index
    %c0_59 = arith.constant 0 : index
    %c0_60 = arith.constant 0 : index
    %101 = vector.load %arg3[%c0_57, %c1_58, %c0_59, %c0_60] : memref<2x7x7x4xf32, #tpu.memory_space<vmem>>, vector<2x1x1x4xf32>
    %102 = vector.shape_cast %101 : vector<2x1x1x4xf32> to vector<2x4xf32>
    %103 = vector.shape_cast %100 : vector<2x4xf32> to vector<2x1x1x4xf32>
    tpu.vector_store %arg3[%c0_57, %c1_58, %c0_59, %c0_60], %103 {strides = array<i32>} : memref<2x7x7x4xf32, #tpu.memory_space<vmem>>, vector<2x1x1x4xf32>,
    %c0_61 = arith.constant 0 : index
    %c2_62 = arith.constant 2 : index
    %c2_63 = arith.constant 2 : index
    %c0_64 = arith.constant 0 : index
    %104 = vector.load %arg2[%c0_61, %c2_62, %c2_63, %c0_64] : memref<2x16x16x4xf32, #tpu.memory_space<vmem>>, vector<2x3x3x4xf32>
    %105 = vector.extract_strided_slice %104 {offsets = [0, 0, 0, 0], sizes = [2, 1, 3, 4], strides = [1, 1, 1, 1]} : vector<2x3x3x4xf32> to vector<2x1x3x4xf32>
    %106 = vector.shape_cast %105 : vector<2x1x3x4xf32> to vector<2x3x4xf32>
    %107 = vector.extract_strided_slice %104 {offsets = [0, 1, 0, 0], sizes = [2, 1, 3, 4], strides = [1, 1, 1, 1]} : vector<2x3x3x4xf32> to vector<2x1x3x4xf32>
    %108 = vector.shape_cast %107 : vector<2x1x3x4xf32> to vector<2x3x4xf32>
    %109 = arith.maximumf %106, %108 : vector<2x3x4xf32>
    %110 = vector.extract_strided_slice %104 {offsets = [0, 2, 0, 0], sizes = [2, 1, 3, 4], strides = [1, 1, 1, 1]} : vector<2x3x3x4xf32> to vector<2x1x3x4xf32>
    %111 = vector.shape_cast %110 : vector<2x1x3x4xf32> to vector<2x3x4xf32>
    %112 = arith.maximumf %109, %111 : vector<2x3x4xf32>
    %cst_65 = arith.constant dense<0xFF800000> : vector<2x4xf32>
    %113 = vector.multi_reduction <maximumf>, %112, %cst_65 [1] : vector<2x3x4xf32> to vector<2x4xf32>
    %c0_66 = arith.constant 0 : index
    %c1_67 = arith.constant 1 : index
    %c1_68 = arith.constant 1 : index
    %c0_69 = arith.constant 0 : index
    %114 = vector.load %arg3[%c0_66, %c1_67, %c1_68, %c0_69] : memref<2x7x7x4xf32, #tpu.memory_space<vmem>>, vector<2x1x1x4xf32>
    %115 = vector.shape_cast %114 : vector<2x1x1x4xf32> to vector<2x4xf32>
    %116 = vector.shape_cast %113 : vector<2x4xf32> to vector<2x1x1x4xf32>
    tpu.vector_store %arg3[%c0_66, %c1_67, %c1_68, %c0_69], %116 {strides = array<i32>} : memref<2x7x7x4xf32, #tpu.memory_space<vmem>>, vector<2x1x1x4xf32>,
    %c0_70 = arith.constant 0 : index
    %c2_71 = arith.constant 2 : index
    %c4_72 = arith.constant 4 : index
    %c0_73 = arith.constant 0 : index
    %117 = vector.load %arg2[%c0_70, %c2_71, %c4_72, %c0_73] : memref<2x16x16x4xf32, #tpu.memory_space<vmem>>, vector<2x3x3x4xf32>
    %118 = vector.extract_strided_slice %117 {offsets = [0, 0, 0, 0], sizes = [2, 1, 3, 4], strides = [1, 1, 1, 1]} : vector<2x3x3x4xf32> to vector<2x1x3x4xf32>
    %119 = vector.shape_cast %118 : vector<2x1x3x4xf32> to vector<2x3x4xf32>
    %120 = vector.extract_strided_slice %117 {offsets = [0, 1, 0, 0], sizes = [2, 1, 3, 4], strides = [1, 1, 1, 1]} : vector<2x3x3x4xf32> to vector<2x1x3x4xf32>
    %121 = vector.shape_cast %120 : vector<2x1x3x4xf32> to vector<2x3x4xf32>
    %122 = arith.maximumf %119, %121 : vector<2x3x4xf32>
    %123 = vector.extract_strided_slice %117 {offsets = [0, 2, 0, 0], sizes = [2, 1, 3, 4], strides = [1, 1, 1, 1]} : vector<2x3x3x4xf32> to vector<2x1x3x4xf32>
    %124 = vector.shape_cast %123 : vector<2x1x3x4xf32> to vector<2x3x4xf32>
    %125 = arith.maximumf %122, %124 : vector<2x3x4xf32>
    %cst_74 = arith.constant dense<0xFF800000> : vector<2x4xf32>
    %126 = vector.multi_reduction <maximumf>, %125, %cst_74 [1] : vector<2x3x4xf32> to vector<2x4xf32>
    %c0_75 = arith.constant 0 : index
    %c1_76 = arith.constant 1 : index
    %c2_77 = arith.constant 2 : index
    %c0_78 = arith.constant 0 : index
    %127 = vector.load %arg3[%c0_75, %c1_76, %c2_77, %c0_78] : memref<2x7x7x4xf32, #tpu.memory_space<vmem>>, vector<2x1x1x4xf32>
    %128 = vector.shape_cast %127 : vector<2x1x1x4xf32> to vector<2x4xf32>
    %129 = vector.shape_cast %126 : vector<2x4xf32> to vector<2x1x1x4xf32>
    tpu.vector_store %arg3[%c0_75, %c1_76, %c2_77, %c0_78], %129 {strides = array<i32>} : memref<2x7x7x4xf32, #tpu.memory_space<vmem>>, vector<2x1x1x4xf32>,
    %c0_79 = arith.constant 0 : index
    %c2_80 = arith.constant 2 : index
    %c6_81 = arith.constant 6 : index
    %c0_82 = arith.constant 0 : index
    %130 = vector.load %arg2[%c0_79, %c2_80, %c6_81, %c0_82] : memref<2x16x16x4xf32, #tpu.memory_space<vmem>>, vector<2x3x4x4xf32>
    %131 = vector.extract_strided_slice %130 {offsets = [0, 0, 0, 0], sizes = [2, 1, 4, 4], strides = [1, 1, 1, 1]} : vector<2x3x4x4xf32> to vector<2x1x4x4xf32>
    %132 = vector.shape_cast %131 : vector<2x1x4x4xf32> to vector<2x4x4xf32>
    %133 = vector.extract_strided_slice %130 {offsets = [0, 1, 0, 0], sizes = [2, 1, 4, 4], strides = [1, 1, 1, 1]} : vector<2x3x4x4xf32> to vector<2x1x4x4xf32>
    %134 = vector.shape_cast %133 : vector<2x1x4x4xf32> to vector<2x4x4xf32>
    %135 = arith.maximumf %132, %134 : vector<2x4x4xf32>
    %136 = vector.extract_strided_slice %130 {offsets = [0, 2, 0, 0], sizes = [2, 1, 4, 4], strides = [1, 1, 1, 1]} : vector<2x3x4x4xf32> to vector<2x1x4x4xf32>
    %137 = vector.shape_cast %136 : vector<2x1x4x4xf32> to vector<2x4x4xf32>
    %138 = arith.maximumf %135, %137 : vector<2x4x4xf32>
    %cst_83 = arith.constant dense<0xFF800000> : vector<2x4xf32>
    %139 = vector.multi_reduction <maximumf>, %138, %cst_83 [1] : vector<2x4x4xf32> to vector<2x4xf32>
    %c0_84 = arith.constant 0 : index
    %c1_85 = arith.constant 1 : index
    %c3_86 = arith.constant 3 : index
    %c0_87 = arith.constant 0 : index
    %140 = vector.load %arg3[%c0_84, %c1_85, %c3_86, %c0_87] : memref<2x7x7x4xf32, #tpu.memory_space<vmem>>, vector<2x1x1x4xf32>
    %141 = vector.shape_cast %140 : vector<2x1x1x4xf32> to vector<2x4xf32>
    %142 = vector.shape_cast %139 : vector<2x4xf32> to vector<2x1x1x4xf32>
    tpu.vector_store %arg3[%c0_84, %c1_85, %c3_86, %c0_87], %142 {strides = array<i32>} : memref<2x7x7x4xf32, #tpu.memory_space<vmem>>, vector<2x1x1x4xf32>,
    %c0_88 = arith.constant 0 : index
    %c2_89 = arith.constant 2 : index
    %c9_90 = arith.constant 9 : index
    %c0_91 = arith.constant 0 : index
    %143 = vector.load %arg2[%c0_88, %c2_89, %c9_90, %c0_91] : memref<2x16x16x4xf32, #tpu.memory_space<vmem>>, vector<2x3x3x4xf32>
    %144 = vector.extract_strided_slice %143 {offsets = [0, 0, 0, 0], sizes = [2, 1, 3, 4], strides = [1, 1, 1, 1]} : vector<2x3x3x4xf32> to vector<2x1x3x4xf32>
    %145 = vector.shape_cast %144 : vector<2x1x3x4xf32> to vector<2x3x4xf32>
    %146 = vector.extract_strided_slice %143 {offsets = [0, 1, 0, 0], sizes = [2, 1, 3, 4], strides = [1, 1, 1, 1]} : vector<2x3x3x4xf32> to vector<2x1x3x4xf32>
    %147 = vector.shape_cast %146 : vector<2x1x3x4xf32> to vector<2x3x4xf32>
    %148 = arith.maximumf %145, %147 : vector<2x3x4xf32>
    %149 = vector.extract_strided_slice %143 {offsets = [0, 2, 0, 0], sizes = [2, 1, 3, 4], strides = [1, 1, 1, 1]} : vector<2x3x3x4xf32> to vector<2x1x3x4xf32>
    %150 = vector.shape_cast %149 : vector<2x1x3x4xf32> to vector<2x3x4xf32>
    %151 = arith.maximumf %148, %150 : vector<2x3x4xf32>
    %cst_92 = arith.constant dense<0xFF800000> : vector<2x4xf32>
    %152 = vector.multi_reduction <maximumf>, %151, %cst_92 [1] : vector<2x3x4xf32> to vector<2x4xf32>
    %c0_93 = arith.constant 0 : index
    %c1_94 = arith.constant 1 : index
    %c4_95 = arith.constant 4 : index
    %c0_96 = arith.constant 0 : index
    %153 = vector.load %arg3[%c0_93, %c1_94, %c4_95, %c0_96] : memref<2x7x7x4xf32, #tpu.memory_space<vmem>>, vector<2x1x1x4xf32>
    %154 = vector.shape_cast %153 : vector<2x1x1x4xf32> to vector<2x4xf32>
    %155 = vector.shape_cast %152 : vector<2x4xf32> to vector<2x1x1x4xf32>
    tpu.vector_store %arg3[%c0_93, %c1_94, %c4_95, %c0_96], %155 {strides = array<i32>} : memref<2x7x7x4xf32, #tpu.memory_space<vmem>>, vector<2x1x1x4xf32>,
    %c0_97 = arith.constant 0 : index
    %c2_98 = arith.constant 2 : index
    %c11_99 = arith.constant 11 : index
    %c0_100 = arith.constant 0 : index
    %156 = vector.load %arg2[%c0_97, %c2_98, %c11_99, %c0_100] : memref<2x16x16x4xf32, #tpu.memory_space<vmem>>, vector<2x3x3x4xf32>
    %157 = vector.extract_strided_slice %156 {offsets = [0, 0, 0, 0], sizes = [2, 1, 3, 4], strides = [1, 1, 1, 1]} : vector<2x3x3x4xf32> to vector<2x1x3x4xf32>
    %158 = vector.shape_cast %157 : vector<2x1x3x4xf32> to vector<2x3x4xf32>
    %159 = vector.extract_strided_slice %156 {offsets = [0, 1, 0, 0], sizes = [2, 1, 3, 4], strides = [1, 1, 1, 1]} : vector<2x3x3x4xf32> to vector<2x1x3x4xf32>
    %160 = vector.shape_cast %159 : vector<2x1x3x4xf32> to vector<2x3x4xf32>
    %161 = arith.maximumf %158, %160 : vector<2x3x4xf32>
    %162 = vector.extract_strided_slice %156 {offsets = [0, 2, 0, 0], sizes = [2, 1, 3, 4], strides = [1, 1, 1, 1]} : vector<2x3x3x4xf32> to vector<2x1x3x4xf32>
    %163 = vector.shape_cast %162 : vector<2x1x3x4xf32> to vector<2x3x4xf32>
    %164 = arith.maximumf %161, %163 : vector<2x3x4xf32>
    %cst_101 = arith.constant dense<0xFF800000> : vector<2x4xf32>
    %165 = vector.multi_reduction <maximumf>, %164, %cst_101 [1] : vector<2x3x4xf32> to vector<2x4xf32>
    %c0_102 = arith.constant 0 : index
    %c1_103 = arith.constant 1 : index
    %c5_104 = arith.constant 5 : index
    %c0_105 = arith.constant 0 : index
    %166 = vector.load %arg3[%c0_102, %c1_103, %c5_104, %c0_105] : memref<2x7x7x4xf32, #tpu.memory_space<vmem>>, vector<2x1x1x4xf32>
    %167 = vector.shape_cast %166 : vector<2x1x1x4xf32> to vector<2x4xf32>
    %168 = vector.shape_cast %165 : vector<2x4xf32> to vector<2x1x1x4xf32>
    tpu.vector_store %arg3[%c0_102, %c1_103, %c5_104, %c0_105], %168 {strides = array<i32>} : memref<2x7x7x4xf32, #tpu.memory_space<vmem>>, vector<2x1x1x4xf32>,
    %c0_106 = arith.constant 0 : index
    %c2_107 = arith.constant 2 : index
    %c13_108 = arith.constant 13 : index
    %c0_109 = arith.constant 0 : index
    %169 = vector.load %arg2[%c0_106, %c2_107, %c13_108, %c0_109] : memref<2x16x16x4xf32, #tpu.memory_space<vmem>>, vector<2x3x3x4xf32>
    %170 = vector.extract_strided_slice %169 {offsets = [0, 0, 0, 0], sizes = [2, 1, 3, 4], strides = [1, 1, 1, 1]} : vector<2x3x3x4xf32> to vector<2x1x3x4xf32>
    %171 = vector.shape_cast %170 : vector<2x1x3x4xf32> to vector<2x3x4xf32>
    %172 = vector.extract_strided_slice %169 {offsets = [0, 1, 0, 0], sizes = [2, 1, 3, 4], strides = [1, 1, 1, 1]} : vector<2x3x3x4xf32> to vector<2x1x3x4xf32>
    %173 = vector.shape_cast %172 : vector<2x1x3x4xf32> to vector<2x3x4xf32>
    %174 = arith.maximumf %171, %173 : vector<2x3x4xf32>
    %175 = vector.extract_strided_slice %169 {offsets = [0, 2, 0, 0], sizes = [2, 1, 3, 4], strides = [1, 1, 1, 1]} : vector<2x3x3x4xf32> to vector<2x1x3x4xf32>
    %176 = vector.shape_cast %175 : vector<2x1x3x4xf32> to vector<2x3x4xf32>
    %177 = arith.maximumf %174, %176 : vector<2x3x4xf32>
    %cst_110 = arith.constant dense<0xFF800000> : vector<2x4xf32>
    %178 = vector.multi_reduction <maximumf>, %177, %cst_110 [1] : vector<2x3x4xf32> to vector<2x4xf32>
    %c0_111 = arith.constant 0 : index
    %c1_112 = arith.constant 1 : index
    %c6_113 = arith.constant 6 : index
    %c0_114 = arith.constant 0 : index
    %179 = vector.load %arg3[%c0_111, %c1_112, %c6_113, %c0_114] : memref<2x7x7x4xf32, #tpu.memory_space<vmem>>, vector<2x1x1x4xf32>
    %180 = vector.shape_cast %179 : vector<2x1x1x4xf32> to vector<2x4xf32>
    %181 = vector.shape_cast %178 : vector<2x4xf32> to vector<2x1x1x4xf32>
    tpu.vector_store %arg3[%c0_111, %c1_112, %c6_113, %c0_114], %181 {strides = array<i32>} : memref<2x7x7x4xf32, #tpu.memory_space<vmem>>, vector<2x1x1x4xf32>,
    %c0_115 = arith.constant 0 : index
    %c4_116 = arith.constant 4 : index
    %c0_117 = arith.constant 0 : index
    %c0_118 = arith.constant 0 : index
    %182 = vector.load %arg2[%c0_115, %c4_116, %c0_117, %c0_118] : memref<2x16x16x4xf32, #tpu.memory_space<vmem>>, vector<2x3x3x4xf32>
    %183 = vector.extract_strided_slice %182 {offsets = [0, 0, 0, 0], sizes = [2, 1, 3, 4], strides = [1, 1, 1, 1]} : vector<2x3x3x4xf32> to vector<2x1x3x4xf32>
    %184 = vector.shape_cast %183 : vector<2x1x3x4xf32> to vector<2x3x4xf32>
    %185 = vector.extract_strided_slice %182 {offsets = [0, 1, 0, 0], sizes = [2, 1, 3, 4], strides = [1, 1, 1, 1]} : vector<2x3x3x4xf32> to vector<2x1x3x4xf32>
    %186 = vector.shape_cast %185 : vector<2x1x3x4xf32> to vector<2x3x4xf32>
    %187 = arith.maximumf %184, %186 : vector<2x3x4xf32>
    %188 = vector.extract_strided_slice %182 {offsets = [0, 2, 0, 0], sizes = [2, 1, 3, 4], strides = [1, 1, 1, 1]} : vector<2x3x3x4xf32> to vector<2x1x3x4xf32>
    %189 = vector.shape_cast %188 : vector<2x1x3x4xf32> to vector<2x3x4xf32>
    %190 = arith.maximumf %187, %189 : vector<2x3x4xf32>
    %cst_119 = arith.constant dense<0xFF800000> : vector<2x4xf32>
    %191 = vector.multi_reduction <maximumf>, %190, %cst_119 [1] : vector<2x3x4xf32> to vector<2x4xf32>
    %c0_120 = arith.constant 0 : index
    %c2_121 = arith.constant 2 : index
    %c0_122 = arith.constant 0 : index
    %c0_123 = arith.constant 0 : index
    %192 = vector.load %arg3[%c0_120, %c2_121, %c0_122, %c0_123] : memref<2x7x7x4xf32, #tpu.memory_space<vmem>>, vector<2x1x1x4xf32>
    %193 = vector.shape_cast %192 : vector<2x1x1x4xf32> to vector<2x4xf32>
    %194 = vector.shape_cast %191 : vector<2x4xf32> to vector<2x1x1x4xf32>
    tpu.vector_store %arg3[%c0_120, %c2_121, %c0_122, %c0_123], %194 {strides = array<i32>} : memref<2x7x7x4xf32, #tpu.memory_space<vmem>>, vector<2x1x1x4xf32>,
    %c0_124 = arith.constant 0 : index
    %c4_125 = arith.constant 4 : index
    %c2_126 = arith.constant 2 : index
    %c0_127 = arith.constant 0 : index
    %195 = vector.load %arg2[%c0_124, %c4_125, %c2_126, %c0_127] : memref<2x16x16x4xf32, #tpu.memory_space<vmem>>, vector<2x3x3x4xf32>
    %196 = vector.extract_strided_slice %195 {offsets = [0, 0, 0, 0], sizes = [2, 1, 3, 4], strides = [1, 1, 1, 1]} : vector<2x3x3x4xf32> to vector<2x1x3x4xf32>
    %197 = vector.shape_cast %196 : vector<2x1x3x4xf32> to vector<2x3x4xf32>
    %198 = vector.extract_strided_slice %195 {offsets = [0, 1, 0, 0], sizes = [2, 1, 3, 4], strides = [1, 1, 1, 1]} : vector<2x3x3x4xf32> to vector<2x1x3x4xf32>
    %199 = vector.shape_cast %198 : vector<2x1x3x4xf32> to vector<2x3x4xf32>
    %200 = arith.maximumf %197, %199 : vector<2x3x4xf32>
    %201 = vector.extract_strided_slice %195 {offsets = [0, 2, 0, 0], sizes = [2, 1, 3, 4], strides = [1, 1, 1, 1]} : vector<2x3x3x4xf32> to vector<2x1x3x4xf32>
    %202 = vector.shape_cast %201 : vector<2x1x3x4xf32> to vector<2x3x4xf32>
    %203 = arith.maximumf %200, %202 : vector<2x3x4xf32>
    %cst_128 = arith.constant dense<0xFF800000> : vector<2x4xf32>
    %204 = vector.multi_reduction <maximumf>, %203, %cst_128 [1] : vector<2x3x4xf32> to vector<2x4xf32>
    %c0_129 = arith.constant 0 : index
    %c2_130 = arith.constant 2 : index
    %c1_131 = arith.constant 1 : index
    %c0_132 = arith.constant 0 : index
    %205 = vector.load %arg3[%c0_129, %c2_130, %c1_131, %c0_132] : memref<2x7x7x4xf32, #tpu.memory_space<vmem>>, vector<2x1x1x4xf32>
    %206 = vector.shape_cast %205 : vector<2x1x1x4xf32> to vector<2x4xf32>
    %207 = vector.shape_cast %204 : vector<2x4xf32> to vector<2x1x1x4xf32>
    tpu.vector_store %arg3[%c0_129, %c2_130, %c1_131, %c0_132], %207 {strides = array<i32>} : memref<2x7x7x4xf32, #tpu.memory_space<vmem>>, vector<2x1x1x4xf32>,
    %c0_133 = arith.constant 0 : index
    %c4_134 = arith.constant 4 : index
    %c4_135 = arith.constant 4 : index
    %c0_136 = arith.constant 0 : index
    %208 = vector.load %arg2[%c0_133, %c4_134, %c4_135, %c0_136] : memref<2x16x16x4xf32, #tpu.memory_space<vmem>>, vector<2x3x3x4xf32>
    %209 = vector.extract_strided_slice %208 {offsets = [0, 0, 0, 0], sizes = [2, 1, 3, 4], strides = [1, 1, 1, 1]} : vector<2x3x3x4xf32> to vector<2x1x3x4xf32>
    %210 = vector.shape_cast %209 : vector<2x1x3x4xf32> to vector<2x3x4xf32>
    %211 = vector.extract_strided_slice %208 {offsets = [0, 1, 0, 0], sizes = [2, 1, 3, 4], strides = [1, 1, 1, 1]} : vector<2x3x3x4xf32> to vector<2x1x3x4xf32>
    %212 = vector.shape_cast %211 : vector<2x1x3x4xf32> to vector<2x3x4xf32>
    %213 = arith.maximumf %210, %212 : vector<2x3x4xf32>
    %214 = vector.extract_strided_slice %208 {offsets = [0, 2, 0, 0], sizes = [2, 1, 3, 4], strides = [1, 1, 1, 1]} : vector<2x3x3x4xf32> to vector<2x1x3x4xf32>
    %215 = vector.shape_cast %214 : vector<2x1x3x4xf32> to vector<2x3x4xf32>
    %216 = arith.maximumf %213, %215 : vector<2x3x4xf32>
    %cst_137 = arith.constant dense<0xFF800000> : vector<2x4xf32>
    %217 = vector.multi_reduction <maximumf>, %216, %cst_137 [1] : vector<2x3x4xf32> to vector<2x4xf32>
    %c0_138 = arith.constant 0 : index
    %c2_139 = arith.constant 2 : index
    %c2_140 = arith.constant 2 : index
    %c0_141 = arith.constant 0 : index
    %218 = vector.load %arg3[%c0_138, %c2_139, %c2_140, %c0_141] : memref<2x7x7x4xf32, #tpu.memory_space<vmem>>, vector<2x1x1x4xf32>
    %219 = vector.shape_cast %218 : vector<2x1x1x4xf32> to vector<2x4xf32>
    %220 = vector.shape_cast %217 : vector<2x4xf32> to vector<2x1x1x4xf32>
    tpu.vector_store %arg3[%c0_138, %c2_139, %c2_140, %c0_141], %220 {strides = array<i32>} : memref<2x7x7x4xf32, #tpu.memory_space<vmem>>, vector<2x1x1x4xf32>,
    %c0_142 = arith.constant 0 : index
    %c4_143 = arith.constant 4 : index
    %c6_144 = arith.constant 6 : index
    %c0_145 = arith.constant 0 : index
    %221 = vector.load %arg2[%c0_142, %c4_143, %c6_144, %c0_145] : memref<2x16x16x4xf32, #tpu.memory_space<vmem>>, vector<2x3x4x4xf32>
    %222 = vector.extract_strided_slice %221 {offsets = [0, 0, 0, 0], sizes = [2, 1, 4, 4], strides = [1, 1, 1, 1]} : vector<2x3x4x4xf32> to vector<2x1x4x4xf32>
    %223 = vector.shape_cast %222 : vector<2x1x4x4xf32> to vector<2x4x4xf32>
    %224 = vector.extract_strided_slice %221 {offsets = [0, 1, 0, 0], sizes = [2, 1, 4, 4], strides = [1, 1, 1, 1]} : vector<2x3x4x4xf32> to vector<2x1x4x4xf32>
    %225 = vector.shape_cast %224 : vector<2x1x4x4xf32> to vector<2x4x4xf32>
    %226 = arith.maximumf %223, %225 : vector<2x4x4xf32>
    %227 = vector.extract_strided_slice %221 {offsets = [0, 2, 0, 0], sizes = [2, 1, 4, 4], strides = [1, 1, 1, 1]} : vector<2x3x4x4xf32> to vector<2x1x4x4xf32>
    %228 = vector.shape_cast %227 : vector<2x1x4x4xf32> to vector<2x4x4xf32>
    %229 = arith.maximumf %226, %228 : vector<2x4x4xf32>
    %cst_146 = arith.constant dense<0xFF800000> : vector<2x4xf32>
    %230 = vector.multi_reduction <maximumf>, %229, %cst_146 [1] : vector<2x4x4xf32> to vector<2x4xf32>
    %c0_147 = arith.constant 0 : index
    %c2_148 = arith.constant 2 : index
    %c3_149 = arith.constant 3 : index
    %c0_150 = arith.constant 0 : index
    %231 = vector.load %arg3[%c0_147, %c2_148, %c3_149, %c0_150] : memref<2x7x7x4xf32, #tpu.memory_space<vmem>>, vector<2x1x1x4xf32>
    %232 = vector.shape_cast %231 : vector<2x1x1x4xf32> to vector<2x4xf32>
    %233 = vector.shape_cast %230 : vector<2x4xf32> to vector<2x1x1x4xf32>
    tpu.vector_store %arg3[%c0_147, %c2_148, %c3_149, %c0_150], %233 {strides = array<i32>} : memref<2x7x7x4xf32, #tpu.memory_space<vmem>>, vector<2x1x1x4xf32>,
    %c0_151 = arith.constant 0 : index
    %c4_152 = arith.constant 4 : index
    %c9_153 = arith.constant 9 : index
    %c0_154 = arith.constant 0 : index
    %234 = vector.load %arg2[%c0_151, %c4_152, %c9_153, %c0_154] : memref<2x16x16x4xf32, #tpu.memory_space<vmem>>, vector<2x3x3x4xf32>
    %235 = vector.extract_strided_slice %234 {offsets = [0, 0, 0, 0], sizes = [2, 1, 3, 4], strides = [1, 1, 1, 1]} : vector<2x3x3x4xf32> to vector<2x1x3x4xf32>
    %236 = vector.shape_cast %235 : vector<2x1x3x4xf32> to vector<2x3x4xf32>
    %237 = vector.extract_strided_slice %234 {offsets = [0, 1, 0, 0], sizes = [2, 1, 3, 4], strides = [1, 1, 1, 1]} : vector<2x3x3x4xf32> to vector<2x1x3x4xf32>
    %238 = vector.shape_cast %237 : vector<2x1x3x4xf32> to vector<2x3x4xf32>
    %239 = arith.maximumf %236, %238 : vector<2x3x4xf32>
    %240 = vector.extract_strided_slice %234 {offsets = [0, 2, 0, 0], sizes = [2, 1, 3, 4], strides = [1, 1, 1, 1]} : vector<2x3x3x4xf32> to vector<2x1x3x4xf32>
    %241 = vector.shape_cast %240 : vector<2x1x3x4xf32> to vector<2x3x4xf32>
    %242 = arith.maximumf %239, %241 : vector<2x3x4xf32>
    %cst_155 = arith.constant dense<0xFF800000> : vector<2x4xf32>
    %243 = vector.multi_reduction <maximumf>, %242, %cst_155 [1] : vector<2x3x4xf32> to vector<2x4xf32>
    %c0_156 = arith.constant 0 : index
    %c2_157 = arith.constant 2 : index
    %c4_158 = arith.constant 4 : index
    %c0_159 = arith.constant 0 : index
    %244 = vector.load %arg3[%c0_156, %c2_157, %c4_158, %c0_159] : memref<2x7x7x4xf32, #tpu.memory_space<vmem>>, vector<2x1x1x4xf32>
    %245 = vector.shape_cast %244 : vector<2x1x1x4xf32> to vector<2x4xf32>
    %246 = vector.shape_cast %243 : vector<2x4xf32> to vector<2x1x1x4xf32>
    tpu.vector_store %arg3[%c0_156, %c2_157, %c4_158, %c0_159], %246 {strides = array<i32>} : memref<2x7x7x4xf32, #tpu.memory_space<vmem>>, vector<2x1x1x4xf32>,
    %c0_160 = arith.constant 0 : index
    %c4_161 = arith.constant 4 : index
    %c11_162 = arith.constant 11 : index
    %c0_163 = arith.constant 0 : index
    %247 = vector.load %arg2[%c0_160, %c4_161, %c11_162, %c0_163] : memref<2x16x16x4xf32, #tpu.memory_space<vmem>>, vector<2x3x3x4xf32>
    %248 = vector.extract_strided_slice %247 {offsets = [0, 0, 0, 0], sizes = [2, 1, 3, 4], strides = [1, 1, 1, 1]} : vector<2x3x3x4xf32> to vector<2x1x3x4xf32>
    %249 = vector.shape_cast %248 : vector<2x1x3x4xf32> to vector<2x3x4xf32>
    %250 = vector.extract_strided_slice %247 {offsets = [0, 1, 0, 0], sizes = [2, 1, 3, 4], strides = [1, 1, 1, 1]} : vector<2x3x3x4xf32> to vector<2x1x3x4xf32>
    %251 = vector.shape_cast %250 : vector<2x1x3x4xf32> to vector<2x3x4xf32>
    %252 = arith.maximumf %249, %251 : vector<2x3x4xf32>
    %253 = vector.extract_strided_slice %247 {offsets = [0, 2, 0, 0], sizes = [2, 1, 3, 4], strides = [1, 1, 1, 1]} : vector<2x3x3x4xf32> to vector<2x1x3x4xf32>
    %254 = vector.shape_cast %253 : vector<2x1x3x4xf32> to vector<2x3x4xf32>
    %255 = arith.maximumf %252, %254 : vector<2x3x4xf32>
    %cst_164 = arith.constant dense<0xFF800000> : vector<2x4xf32>
    %256 = vector.multi_reduction <maximumf>, %255, %cst_164 [1] : vector<2x3x4xf32> to vector<2x4xf32>
    %c0_165 = arith.constant 0 : index
    %c2_166 = arith.constant 2 : index
    %c5_167 = arith.constant 5 : index
    %c0_168 = arith.constant 0 : index
    %257 = vector.load %arg3[%c0_165, %c2_166, %c5_167, %c0_168] : memref<2x7x7x4xf32, #tpu.memory_space<vmem>>, vector<2x1x1x4xf32>
    %258 = vector.shape_cast %257 : vector<2x1x1x4xf32> to vector<2x4xf32>
    %259 = vector.shape_cast %256 : vector<2x4xf32> to vector<2x1x1x4xf32>
    tpu.vector_store %arg3[%c0_165, %c2_166, %c5_167, %c0_168], %259 {strides = array<i32>} : memref<2x7x7x4xf32, #tpu.memory_space<vmem>>, vector<2x1x1x4xf32>,
    %c0_169 = arith.constant 0 : index
    %c4_170 = arith.constant 4 : index
    %c13_171 = arith.constant 13 : index
    %c0_172 = arith.constant 0 : index
    %260 = vector.load %arg2[%c0_169, %c4_170, %c13_171, %c0_172] : memref<2x16x16x4xf32, #tpu.memory_space<vmem>>, vector<2x3x3x4xf32>
    %261 = vector.extract_strided_slice %260 {offsets = [0, 0, 0, 0], sizes = [2, 1, 3, 4], strides = [1, 1, 1, 1]} : vector<2x3x3x4xf32> to vector<2x1x3x4xf32>
    %262 = vector.shape_cast %261 : vector<2x1x3x4xf32> to vector<2x3x4xf32>
    %263 = vector.extract_strided_slice %260 {offsets = [0, 1, 0, 0], sizes = [2, 1, 3, 4], strides = [1, 1, 1, 1]} : vector<2x3x3x4xf32> to vector<2x1x3x4xf32>
    %264 = vector.shape_cast %263 : vector<2x1x3x4xf32> to vector<2x3x4xf32>
    %265 = arith.maximumf %262, %264 : vector<2x3x4xf32>
    %266 = vector.extract_strided_slice %260 {offsets = [0, 2, 0, 0], sizes = [2, 1, 3, 4], strides = [1, 1, 1, 1]} : vector<2x3x3x4xf32> to vector<2x1x3x4xf32>
    %267 = vector.shape_cast %266 : vector<2x1x3x4xf32> to vector<2x3x4xf32>
    %268 = arith.maximumf %265, %267 : vector<2x3x4xf32>
    %cst_173 = arith.constant dense<0xFF800000> : vector<2x4xf32>
    %269 = vector.multi_reduction <maximumf>, %268, %cst_173 [1] : vector<2x3x4xf32> to vector<2x4xf32>
    %c0_174 = arith.constant 0 : index
    %c2_175 = arith.constant 2 : index
    %c6_176 = arith.constant 6 : index
    %c0_177 = arith.constant 0 : index
    %270 = vector.load %arg3[%c0_174, %c2_175, %c6_176, %c0_177] : memref<2x7x7x4xf32, #tpu.memory_space<vmem>>, vector<2x1x1x4xf32>
    %271 = vector.shape_cast %270 : vector<2x1x1x4xf32> to vector<2x4xf32>
    %272 = vector.shape_cast %269 : vector<2x4xf32> to vector<2x1x1x4xf32>
    tpu.vector_store %arg3[%c0_174, %c2_175, %c6_176, %c0_177], %272 {strides = array<i32>} : memref<2x7x7x4xf32, #tpu.memory_space<vmem>>, vector<2x1x1x4xf32>,
    %c0_178 = arith.constant 0 : index
    %c6_179 = arith.constant 6 : index
    %c0_180 = arith.constant 0 : index
    %c0_181 = arith.constant 0 : index
    %273 = vector.load %arg2[%c0_178, %c6_179, %c0_180, %c0_181] : memref<2x16x16x4xf32, #tpu.memory_space<vmem>>, vector<2x4x3x4xf32>
    %274 = vector.extract_strided_slice %273 {offsets = [0, 0, 0, 0], sizes = [2, 1, 3, 4], strides = [1, 1, 1, 1]} : vector<2x4x3x4xf32> to vector<2x1x3x4xf32>
    %275 = vector.shape_cast %274 : vector<2x1x3x4xf32> to vector<2x3x4xf32>
    %276 = vector.extract_strided_slice %273 {offsets = [0, 1, 0, 0], sizes = [2, 1, 3, 4], strides = [1, 1, 1, 1]} : vector<2x4x3x4xf32> to vector<2x1x3x4xf32>
    %277 = vector.shape_cast %276 : vector<2x1x3x4xf32> to vector<2x3x4xf32>
    %278 = arith.maximumf %275, %277 : vector<2x3x4xf32>
    %279 = vector.extract_strided_slice %273 {offsets = [0, 2, 0, 0], sizes = [2, 1, 3, 4], strides = [1, 1, 1, 1]} : vector<2x4x3x4xf32> to vector<2x1x3x4xf32>
    %280 = vector.shape_cast %279 : vector<2x1x3x4xf32> to vector<2x3x4xf32>
    %281 = arith.maximumf %278, %280 : vector<2x3x4xf32>
    %282 = vector.extract_strided_slice %273 {offsets = [0, 3, 0, 0], sizes = [2, 1, 3, 4], strides = [1, 1, 1, 1]} : vector<2x4x3x4xf32> to vector<2x1x3x4xf32>
    %283 = vector.shape_cast %282 : vector<2x1x3x4xf32> to vector<2x3x4xf32>
    %284 = arith.maximumf %281, %283 : vector<2x3x4xf32>
    %cst_182 = arith.constant dense<0xFF800000> : vector<2x4xf32>
    %285 = vector.multi_reduction <maximumf>, %284, %cst_182 [1] : vector<2x3x4xf32> to vector<2x4xf32>
    %c0_183 = arith.constant 0 : index
    %c3_184 = arith.constant 3 : index
    %c0_185 = arith.constant 0 : index
    %c0_186 = arith.constant 0 : index
    %286 = vector.load %arg3[%c0_183, %c3_184, %c0_185, %c0_186] : memref<2x7x7x4xf32, #tpu.memory_space<vmem>>, vector<2x1x1x4xf32>
    %287 = vector.shape_cast %286 : vector<2x1x1x4xf32> to vector<2x4xf32>
    %288 = vector.shape_cast %285 : vector<2x4xf32> to vector<2x1x1x4xf32>
    tpu.vector_store %arg3[%c0_183, %c3_184, %c0_185, %c0_186], %288 {strides = array<i32>} : memref<2x7x7x4xf32, #tpu.memory_space<vmem>>, vector<2x1x1x4xf32>,
    %c0_187 = arith.constant 0 : index
    %c6_188 = arith.constant 6 : index
    %c2_189 = arith.constant 2 : index
    %c0_190 = arith.constant 0 : index
    %289 = vector.load %arg2[%c0_187, %c6_188, %c2_189, %c0_190] : memref<2x16x16x4xf32, #tpu.memory_space<vmem>>, vector<2x4x3x4xf32>
    %290 = vector.extract_strided_slice %289 {offsets = [0, 0, 0, 0], sizes = [2, 1, 3, 4], strides = [1, 1, 1, 1]} : vector<2x4x3x4xf32> to vector<2x1x3x4xf32>
    %291 = vector.shape_cast %290 : vector<2x1x3x4xf32> to vector<2x3x4xf32>
    %292 = vector.extract_strided_slice %289 {offsets = [0, 1, 0, 0], sizes = [2, 1, 3, 4], strides = [1, 1, 1, 1]} : vector<2x4x3x4xf32> to vector<2x1x3x4xf32>
    %293 = vector.shape_cast %292 : vector<2x1x3x4xf32> to vector<2x3x4xf32>
    %294 = arith.maximumf %291, %293 : vector<2x3x4xf32>
    %295 = vector.extract_strided_slice %289 {offsets = [0, 2, 0, 0], sizes = [2, 1, 3, 4], strides = [1, 1, 1, 1]} : vector<2x4x3x4xf32> to vector<2x1x3x4xf32>
    %296 = vector.shape_cast %295 : vector<2x1x3x4xf32> to vector<2x3x4xf32>
    %297 = arith.maximumf %294, %296 : vector<2x3x4xf32>
    %298 = vector.extract_strided_slice %289 {offsets = [0, 3, 0, 0], sizes = [2, 1, 3, 4], strides = [1, 1, 1, 1]} : vector<2x4x3x4xf32> to vector<2x1x3x4xf32>
    %299 = vector.shape_cast %298 : vector<2x1x3x4xf32> to vector<2x3x4xf32>
    %300 = arith.maximumf %297, %299 : vector<2x3x4xf32>
    %cst_191 = arith.constant dense<0xFF800000> : vector<2x4xf32>
    %301 = vector.multi_reduction <maximumf>, %300, %cst_191 [1] : vector<2x3x4xf32> to vector<2x4xf32>
    %c0_192 = arith.constant 0 : index
    %c3_193 = arith.constant 3 : index
    %c1_194 = arith.constant 1 : index
    %c0_195 = arith.constant 0 : index
    %302 = vector.load %arg3[%c0_192, %c3_193, %c1_194, %c0_195] : memref<2x7x7x4xf32, #tpu.memory_space<vmem>>, vector<2x1x1x4xf32>
    %303 = vector.shape_cast %302 : vector<2x1x1x4xf32> to vector<2x4xf32>
    %304 = vector.shape_cast %301 : vector<2x4xf32> to vector<2x1x1x4xf32>
    tpu.vector_store %arg3[%c0_192, %c3_193, %c1_194, %c0_195], %304 {strides = array<i32>} : memref<2x7x7x4xf32, #tpu.memory_space<vmem>>, vector<2x1x1x4xf32>,
    %c0_196 = arith.constant 0 : index
    %c6_197 = arith.constant 6 : index
    %c4_198 = arith.constant 4 : index
    %c0_199 = arith.constant 0 : index
    %305 = vector.load %arg2[%c0_196, %c6_197, %c4_198, %c0_199] : memref<2x16x16x4xf32, #tpu.memory_space<vmem>>, vector<2x4x3x4xf32>
    %306 = vector.extract_strided_slice %305 {offsets = [0, 0, 0, 0], sizes = [2, 1, 3, 4], strides = [1, 1, 1, 1]} : vector<2x4x3x4xf32> to vector<2x1x3x4xf32>
    %307 = vector.shape_cast %306 : vector<2x1x3x4xf32> to vector<2x3x4xf32>
    %308 = vector.extract_strided_slice %305 {offsets = [0, 1, 0, 0], sizes = [2, 1, 3, 4], strides = [1, 1, 1, 1]} : vector<2x4x3x4xf32> to vector<2x1x3x4xf32>
    %309 = vector.shape_cast %308 : vector<2x1x3x4xf32> to vector<2x3x4xf32>
    %310 = arith.maximumf %307, %309 : vector<2x3x4xf32>
    %311 = vector.extract_strided_slice %305 {offsets = [0, 2, 0, 0], sizes = [2, 1, 3, 4], strides = [1, 1, 1, 1]} : vector<2x4x3x4xf32> to vector<2x1x3x4xf32>
    %312 = vector.shape_cast %311 : vector<2x1x3x4xf32> to vector<2x3x4xf32>
    %313 = arith.maximumf %310, %312 : vector<2x3x4xf32>
    %314 = vector.extract_strided_slice %305 {offsets = [0, 3, 0, 0], sizes = [2, 1, 3, 4], strides = [1, 1, 1, 1]} : vector<2x4x3x4xf32> to vector<2x1x3x4xf32>
    %315 = vector.shape_cast %314 : vector<2x1x3x4xf32> to vector<2x3x4xf32>
    %316 = arith.maximumf %313, %315 : vector<2x3x4xf32>
    %cst_200 = arith.constant dense<0xFF800000> : vector<2x4xf32>
    %317 = vector.multi_reduction <maximumf>, %316, %cst_200 [1] : vector<2x3x4xf32> to vector<2x4xf32>
    %c0_201 = arith.constant 0 : index
    %c3_202 = arith.constant 3 : index
    %c2_203 = arith.constant 2 : index
    %c0_204 = arith.constant 0 : index
    %318 = vector.load %arg3[%c0_201, %c3_202, %c2_203, %c0_204] : memref<2x7x7x4xf32, #tpu.memory_space<vmem>>, vector<2x1x1x4xf32>
    %319 = vector.shape_cast %318 : vector<2x1x1x4xf32> to vector<2x4xf32>
    %320 = vector.shape_cast %317 : vector<2x4xf32> to vector<2x1x1x4xf32>
    tpu.vector_store %arg3[%c0_201, %c3_202, %c2_203, %c0_204], %320 {strides = array<i32>} : memref<2x7x7x4xf32, #tpu.memory_space<vmem>>, vector<2x1x1x4xf32>,
    %c0_205 = arith.constant 0 : index
    %c6_206 = arith.constant 6 : index
    %c6_207 = arith.constant 6 : index
    %c0_208 = arith.constant 0 : index
    %321 = vector.load %arg2[%c0_205, %c6_206, %c6_207, %c0_208] : memref<2x16x16x4xf32, #tpu.memory_space<vmem>>, vector<2x4x4x4xf32>
    %322 = vector.extract_strided_slice %321 {offsets = [0, 0, 0, 0], sizes = [2, 1, 4, 4], strides = [1, 1, 1, 1]} : vector<2x4x4x4xf32> to vector<2x1x4x4xf32>
    %323 = vector.shape_cast %322 : vector<2x1x4x4xf32> to vector<2x4x4xf32>
    %324 = vector.extract_strided_slice %321 {offsets = [0, 1, 0, 0], sizes = [2, 1, 4, 4], strides = [1, 1, 1, 1]} : vector<2x4x4x4xf32> to vector<2x1x4x4xf32>
    %325 = vector.shape_cast %324 : vector<2x1x4x4xf32> to vector<2x4x4xf32>
    %326 = arith.maximumf %323, %325 : vector<2x4x4xf32>
    %327 = vector.extract_strided_slice %321 {offsets = [0, 2, 0, 0], sizes = [2, 1, 4, 4], strides = [1, 1, 1, 1]} : vector<2x4x4x4xf32> to vector<2x1x4x4xf32>
    %328 = vector.shape_cast %327 : vector<2x1x4x4xf32> to vector<2x4x4xf32>
    %329 = arith.maximumf %326, %328 : vector<2x4x4xf32>
    %330 = vector.extract_strided_slice %321 {offsets = [0, 3, 0, 0], sizes = [2, 1, 4, 4], strides = [1, 1, 1, 1]} : vector<2x4x4x4xf32> to vector<2x1x4x4xf32>
    %331 = vector.shape_cast %330 : vector<2x1x4x4xf32> to vector<2x4x4xf32>
    %332 = arith.maximumf %329, %331 : vector<2x4x4xf32>
    %cst_209 = arith.constant dense<0xFF800000> : vector<2x4xf32>
    %333 = vector.multi_reduction <maximumf>, %332, %cst_209 [1] : vector<2x4x4xf32> to vector<2x4xf32>
    %c0_210 = arith.constant 0 : index
    %c3_211 = arith.constant 3 : index
    %c3_212 = arith.constant 3 : index
    %c0_213 = arith.constant 0 : index
    %334 = vector.load %arg3[%c0_210, %c3_211, %c3_212, %c0_213] : memref<2x7x7x4xf32, #tpu.memory_space<vmem>>, vector<2x1x1x4xf32>
    %335 = vector.shape_cast %334 : vector<2x1x1x4xf32> to vector<2x4xf32>
    %336 = vector.shape_cast %333 : vector<2x4xf32> to vector<2x1x1x4xf32>
    tpu.vector_store %arg3[%c0_210, %c3_211, %c3_212, %c0_213], %336 {strides = array<i32>} : memref<2x7x7x4xf32, #tpu.memory_space<vmem>>, vector<2x1x1x4xf32>,
    %c0_214 = arith.constant 0 : index
    %c6_215 = arith.constant 6 : index
    %c9_216 = arith.constant 9 : index
    %c0_217 = arith.constant 0 : index
    %337 = vector.load %arg2[%c0_214, %c6_215, %c9_216, %c0_217] : memref<2x16x16x4xf32, #tpu.memory_space<vmem>>, vector<2x4x3x4xf32>
    %338 = vector.extract_strided_slice %337 {offsets = [0, 0, 0, 0], sizes = [2, 1, 3, 4], strides = [1, 1, 1, 1]} : vector<2x4x3x4xf32> to vector<2x1x3x4xf32>
    %339 = vector.shape_cast %338 : vector<2x1x3x4xf32> to vector<2x3x4xf32>
    %340 = vector.extract_strided_slice %337 {offsets = [0, 1, 0, 0], sizes = [2, 1, 3, 4], strides = [1, 1, 1, 1]} : vector<2x4x3x4xf32> to vector<2x1x3x4xf32>
    %341 = vector.shape_cast %340 : vector<2x1x3x4xf32> to vector<2x3x4xf32>
    %342 = arith.maximumf %339, %341 : vector<2x3x4xf32>
    %343 = vector.extract_strided_slice %337 {offsets = [0, 2, 0, 0], sizes = [2, 1, 3, 4], strides = [1, 1, 1, 1]} : vector<2x4x3x4xf32> to vector<2x1x3x4xf32>
    %344 = vector.shape_cast %343 : vector<2x1x3x4xf32> to vector<2x3x4xf32>
    %345 = arith.maximumf %342, %344 : vector<2x3x4xf32>
    %346 = vector.extract_strided_slice %337 {offsets = [0, 3, 0, 0], sizes = [2, 1, 3, 4], strides = [1, 1, 1, 1]} : vector<2x4x3x4xf32> to vector<2x1x3x4xf32>
    %347 = vector.shape_cast %346 : vector<2x1x3x4xf32> to vector<2x3x4xf32>
    %348 = arith.maximumf %345, %347 : vector<2x3x4xf32>
    %cst_218 = arith.constant dense<0xFF800000> : vector<2x4xf32>
    %349 = vector.multi_reduction <maximumf>, %348, %cst_218 [1] : vector<2x3x4xf32> to vector<2x4xf32>
    %c0_219 = arith.constant 0 : index
    %c3_220 = arith.constant 3 : index
    %c4_221 = arith.constant 4 : index
    %c0_222 = arith.constant 0 : index
    %350 = vector.load %arg3[%c0_219, %c3_220, %c4_221, %c0_222] : memref<2x7x7x4xf32, #tpu.memory_space<vmem>>, vector<2x1x1x4xf32>
    %351 = vector.shape_cast %350 : vector<2x1x1x4xf32> to vector<2x4xf32>
    %352 = vector.shape_cast %349 : vector<2x4xf32> to vector<2x1x1x4xf32>
    tpu.vector_store %arg3[%c0_219, %c3_220, %c4_221, %c0_222], %352 {strides = array<i32>} : memref<2x7x7x4xf32, #tpu.memory_space<vmem>>, vector<2x1x1x4xf32>,
    %c0_223 = arith.constant 0 : index
    %c6_224 = arith.constant 6 : index
    %c11_225 = arith.constant 11 : index
    %c0_226 = arith.constant 0 : index
    %353 = vector.load %arg2[%c0_223, %c6_224, %c11_225, %c0_226] : memref<2x16x16x4xf32, #tpu.memory_space<vmem>>, vector<2x4x3x4xf32>
    %354 = vector.extract_strided_slice %353 {offsets = [0, 0, 0, 0], sizes = [2, 1, 3, 4], strides = [1, 1, 1, 1]} : vector<2x4x3x4xf32> to vector<2x1x3x4xf32>
    %355 = vector.shape_cast %354 : vector<2x1x3x4xf32> to vector<2x3x4xf32>
    %356 = vector.extract_strided_slice %353 {offsets = [0, 1, 0, 0], sizes = [2, 1, 3, 4], strides = [1, 1, 1, 1]} : vector<2x4x3x4xf32> to vector<2x1x3x4xf32>
    %357 = vector.shape_cast %356 : vector<2x1x3x4xf32> to vector<2x3x4xf32>
    %358 = arith.maximumf %355, %357 : vector<2x3x4xf32>
    %359 = vector.extract_strided_slice %353 {offsets = [0, 2, 0, 0], sizes = [2, 1, 3, 4], strides = [1, 1, 1, 1]} : vector<2x4x3x4xf32> to vector<2x1x3x4xf32>
    %360 = vector.shape_cast %359 : vector<2x1x3x4xf32> to vector<2x3x4xf32>
    %361 = arith.maximumf %358, %360 : vector<2x3x4xf32>
    %362 = vector.extract_strided_slice %353 {offsets = [0, 3, 0, 0], sizes = [2, 1, 3, 4], strides = [1, 1, 1, 1]} : vector<2x4x3x4xf32> to vector<2x1x3x4xf32>
    %363 = vector.shape_cast %362 : vector<2x1x3x4xf32> to vector<2x3x4xf32>
    %364 = arith.maximumf %361, %363 : vector<2x3x4xf32>
    %cst_227 = arith.constant dense<0xFF800000> : vector<2x4xf32>
    %365 = vector.multi_reduction <maximumf>, %364, %cst_227 [1] : vector<2x3x4xf32> to vector<2x4xf32>
    %c0_228 = arith.constant 0 : index
    %c3_229 = arith.constant 3 : index
    %c5_230 = arith.constant 5 : index
    %c0_231 = arith.constant 0 : index
    %366 = vector.load %arg3[%c0_228, %c3_229, %c5_230, %c0_231] : memref<2x7x7x4xf32, #tpu.memory_space<vmem>>, vector<2x1x1x4xf32>
    %367 = vector.shape_cast %366 : vector<2x1x1x4xf32> to vector<2x4xf32>
    %368 = vector.shape_cast %365 : vector<2x4xf32> to vector<2x1x1x4xf32>
    tpu.vector_store %arg3[%c0_228, %c3_229, %c5_230, %c0_231], %368 {strides = array<i32>} : memref<2x7x7x4xf32, #tpu.memory_space<vmem>>, vector<2x1x1x4xf32>,
    %c0_232 = arith.constant 0 : index
    %c6_233 = arith.constant 6 : index
    %c13_234 = arith.constant 13 : index
    %c0_235 = arith.constant 0 : index
    %369 = vector.load %arg2[%c0_232, %c6_233, %c13_234, %c0_235] : memref<2x16x16x4xf32, #tpu.memory_space<vmem>>, vector<2x4x3x4xf32>
    %370 = vector.extract_strided_slice %369 {offsets = [0, 0, 0, 0], sizes = [2, 1, 3, 4], strides = [1, 1, 1, 1]} : vector<2x4x3x4xf32> to vector<2x1x3x4xf32>
    %371 = vector.shape_cast %370 : vector<2x1x3x4xf32> to vector<2x3x4xf32>
    %372 = vector.extract_strided_slice %369 {offsets = [0, 1, 0, 0], sizes = [2, 1, 3, 4], strides = [1, 1, 1, 1]} : vector<2x4x3x4xf32> to vector<2x1x3x4xf32>
    %373 = vector.shape_cast %372 : vector<2x1x3x4xf32> to vector<2x3x4xf32>
    %374 = arith.maximumf %371, %373 : vector<2x3x4xf32>
    %375 = vector.extract_strided_slice %369 {offsets = [0, 2, 0, 0], sizes = [2, 1, 3, 4], strides = [1, 1, 1, 1]} : vector<2x4x3x4xf32> to vector<2x1x3x4xf32>
    %376 = vector.shape_cast %375 : vector<2x1x3x4xf32> to vector<2x3x4xf32>
    %377 = arith.maximumf %374, %376 : vector<2x3x4xf32>
    %378 = vector.extract_strided_slice %369 {offsets = [0, 3, 0, 0], sizes = [2, 1, 3, 4], strides = [1, 1, 1, 1]} : vector<2x4x3x4xf32> to vector<2x1x3x4xf32>
    %379 = vector.shape_cast %378 : vector<2x1x3x4xf32> to vector<2x3x4xf32>
    %380 = arith.maximumf %377, %379 : vector<2x3x4xf32>
    %cst_236 = arith.constant dense<0xFF800000> : vector<2x4xf32>
    %381 = vector.multi_reduction <maximumf>, %380, %cst_236 [1] : vector<2x3x4xf32> to vector<2x4xf32>
    %c0_237 = arith.constant 0 : index
    %c3_238 = arith.constant 3 : index
    %c6_239 = arith.constant 6 : index
    %c0_240 = arith.constant 0 : index
    %382 = vector.load %arg3[%c0_237, %c3_238, %c6_239, %c0_240] : memref<2x7x7x4xf32, #tpu.memory_space<vmem>>, vector<2x1x1x4xf32>
    %383 = vector.shape_cast %382 : vector<2x1x1x4xf32> to vector<2x4xf32>
    %384 = vector.shape_cast %381 : vector<2x4xf32> to vector<2x1x1x4xf32>
    tpu.vector_store %arg3[%c0_237, %c3_238, %c6_239, %c0_240], %384 {strides = array<i32>} : memref<2x7x7x4xf32, #tpu.memory_space<vmem>>, vector<2x1x1x4xf32>,
    %c0_241 = arith.constant 0 : index
    %c9_242 = arith.constant 9 : index
    %c0_243 = arith.constant 0 : index
    %c0_244 = arith.constant 0 : index
    %385 = vector.load %arg2[%c0_241, %c9_242, %c0_243, %c0_244] : memref<2x16x16x4xf32, #tpu.memory_space<vmem>>, vector<2x3x3x4xf32>
    %386 = vector.extract_strided_slice %385 {offsets = [0, 0, 0, 0], sizes = [2, 1, 3, 4], strides = [1, 1, 1, 1]} : vector<2x3x3x4xf32> to vector<2x1x3x4xf32>
    %387 = vector.shape_cast %386 : vector<2x1x3x4xf32> to vector<2x3x4xf32>
    %388 = vector.extract_strided_slice %385 {offsets = [0, 1, 0, 0], sizes = [2, 1, 3, 4], strides = [1, 1, 1, 1]} : vector<2x3x3x4xf32> to vector<2x1x3x4xf32>
    %389 = vector.shape_cast %388 : vector<2x1x3x4xf32> to vector<2x3x4xf32>
    %390 = arith.maximumf %387, %389 : vector<2x3x4xf32>
    %391 = vector.extract_strided_slice %385 {offsets = [0, 2, 0, 0], sizes = [2, 1, 3, 4], strides = [1, 1, 1, 1]} : vector<2x3x3x4xf32> to vector<2x1x3x4xf32>
    %392 = vector.shape_cast %391 : vector<2x1x3x4xf32> to vector<2x3x4xf32>
    %393 = arith.maximumf %390, %392 : vector<2x3x4xf32>
    %cst_245 = arith.constant dense<0xFF800000> : vector<2x4xf32>
    %394 = vector.multi_reduction <maximumf>, %393, %cst_245 [1] : vector<2x3x4xf32> to vector<2x4xf32>
    %c0_246 = arith.constant 0 : index
    %c4_247 = arith.constant 4 : index
    %c0_248 = arith.constant 0 : index
    %c0_249 = arith.constant 0 : index
    %395 = vector.load %arg3[%c0_246, %c4_247, %c0_248, %c0_249] : memref<2x7x7x4xf32, #tpu.memory_space<vmem>>, vector<2x1x1x4xf32>
    %396 = vector.shape_cast %395 : vector<2x1x1x4xf32> to vector<2x4xf32>
    %397 = vector.shape_cast %394 : vector<2x4xf32> to vector<2x1x1x4xf32>
    tpu.vector_store %arg3[%c0_246, %c4_247, %c0_248, %c0_249], %397 {strides = array<i32>} : memref<2x7x7x4xf32, #tpu.memory_space<vmem>>, vector<2x1x1x4xf32>,
    %c0_250 = arith.constant 0 : index
    %c9_251 = arith.constant 9 : index
    %c2_252 = arith.constant 2 : index
    %c0_253 = arith.constant 0 : index
    %398 = vector.load %arg2[%c0_250, %c9_251, %c2_252, %c0_253] : memref<2x16x16x4xf32, #tpu.memory_space<vmem>>, vector<2x3x3x4xf32>
    %399 = vector.extract_strided_slice %398 {offsets = [0, 0, 0, 0], sizes = [2, 1, 3, 4], strides = [1, 1, 1, 1]} : vector<2x3x3x4xf32> to vector<2x1x3x4xf32>
    %400 = vector.shape_cast %399 : vector<2x1x3x4xf32> to vector<2x3x4xf32>
    %401 = vector.extract_strided_slice %398 {offsets = [0, 1, 0, 0], sizes = [2, 1, 3, 4], strides = [1, 1, 1, 1]} : vector<2x3x3x4xf32> to vector<2x1x3x4xf32>
    %402 = vector.shape_cast %401 : vector<2x1x3x4xf32> to vector<2x3x4xf32>
    %403 = arith.maximumf %400, %402 : vector<2x3x4xf32>
    %404 = vector.extract_strided_slice %398 {offsets = [0, 2, 0, 0], sizes = [2, 1, 3, 4], strides = [1, 1, 1, 1]} : vector<2x3x3x4xf32> to vector<2x1x3x4xf32>
    %405 = vector.shape_cast %404 : vector<2x1x3x4xf32> to vector<2x3x4xf32>
    %406 = arith.maximumf %403, %405 : vector<2x3x4xf32>
    %cst_254 = arith.constant dense<0xFF800000> : vector<2x4xf32>
    %407 = vector.multi_reduction <maximumf>, %406, %cst_254 [1] : vector<2x3x4xf32> to vector<2x4xf32>
    %c0_255 = arith.constant 0 : index
    %c4_256 = arith.constant 4 : index
    %c1_257 = arith.constant 1 : index
    %c0_258 = arith.constant 0 : index
    %408 = vector.load %arg3[%c0_255, %c4_256, %c1_257, %c0_258] : memref<2x7x7x4xf32, #tpu.memory_space<vmem>>, vector<2x1x1x4xf32>
    %409 = vector.shape_cast %408 : vector<2x1x1x4xf32> to vector<2x4xf32>
    %410 = vector.shape_cast %407 : vector<2x4xf32> to vector<2x1x1x4xf32>
    tpu.vector_store %arg3[%c0_255, %c4_256, %c1_257, %c0_258], %410 {strides = array<i32>} : memref<2x7x7x4xf32, #tpu.memory_space<vmem>>, vector<2x1x1x4xf32>,
    %c0_259 = arith.constant 0 : index
    %c9_260 = arith.constant 9 : index
    %c4_261 = arith.constant 4 : index
    %c0_262 = arith.constant 0 : index
    %411 = vector.load %arg2[%c0_259, %c9_260, %c4_261, %c0_262] : memref<2x16x16x4xf32, #tpu.memory_space<vmem>>, vector<2x3x3x4xf32>
    %412 = vector.extract_strided_slice %411 {offsets = [0, 0, 0, 0], sizes = [2, 1, 3, 4], strides = [1, 1, 1, 1]} : vector<2x3x3x4xf32> to vector<2x1x3x4xf32>
    %413 = vector.shape_cast %412 : vector<2x1x3x4xf32> to vector<2x3x4xf32>
    %414 = vector.extract_strided_slice %411 {offsets = [0, 1, 0, 0], sizes = [2, 1, 3, 4], strides = [1, 1, 1, 1]} : vector<2x3x3x4xf32> to vector<2x1x3x4xf32>
    %415 = vector.shape_cast %414 : vector<2x1x3x4xf32> to vector<2x3x4xf32>
    %416 = arith.maximumf %413, %415 : vector<2x3x4xf32>
    %417 = vector.extract_strided_slice %411 {offsets = [0, 2, 0, 0], sizes = [2, 1, 3, 4], strides = [1, 1, 1, 1]} : vector<2x3x3x4xf32> to vector<2x1x3x4xf32>
    %418 = vector.shape_cast %417 : vector<2x1x3x4xf32> to vector<2x3x4xf32>
    %419 = arith.maximumf %416, %418 : vector<2x3x4xf32>
    %cst_263 = arith.constant dense<0xFF800000> : vector<2x4xf32>
    %420 = vector.multi_reduction <maximumf>, %419, %cst_263 [1] : vector<2x3x4xf32> to vector<2x4xf32>
    %c0_264 = arith.constant 0 : index
    %c4_265 = arith.constant 4 : index
    %c2_266 = arith.constant 2 : index
    %c0_267 = arith.constant 0 : index
    %421 = vector.load %arg3[%c0_264, %c4_265, %c2_266, %c0_267] : memref<2x7x7x4xf32, #tpu.memory_space<vmem>>, vector<2x1x1x4xf32>
    %422 = vector.shape_cast %421 : vector<2x1x1x4xf32> to vector<2x4xf32>
    %423 = vector.shape_cast %420 : vector<2x4xf32> to vector<2x1x1x4xf32>
    tpu.vector_store %arg3[%c0_264, %c4_265, %c2_266, %c0_267], %423 {strides = array<i32>} : memref<2x7x7x4xf32, #tpu.memory_space<vmem>>, vector<2x1x1x4xf32>,
    %c0_268 = arith.constant 0 : index
    %c9_269 = arith.constant 9 : index
    %c6_270 = arith.constant 6 : index
    %c0_271 = arith.constant 0 : index
    %424 = vector.load %arg2[%c0_268, %c9_269, %c6_270, %c0_271] : memref<2x16x16x4xf32, #tpu.memory_space<vmem>>, vector<2x3x4x4xf32>
    %425 = vector.extract_strided_slice %424 {offsets = [0, 0, 0, 0], sizes = [2, 1, 4, 4], strides = [1, 1, 1, 1]} : vector<2x3x4x4xf32> to vector<2x1x4x4xf32>
    %426 = vector.shape_cast %425 : vector<2x1x4x4xf32> to vector<2x4x4xf32>
    %427 = vector.extract_strided_slice %424 {offsets = [0, 1, 0, 0], sizes = [2, 1, 4, 4], strides = [1, 1, 1, 1]} : vector<2x3x4x4xf32> to vector<2x1x4x4xf32>
    %428 = vector.shape_cast %427 : vector<2x1x4x4xf32> to vector<2x4x4xf32>
    %429 = arith.maximumf %426, %428 : vector<2x4x4xf32>
    %430 = vector.extract_strided_slice %424 {offsets = [0, 2, 0, 0], sizes = [2, 1, 4, 4], strides = [1, 1, 1, 1]} : vector<2x3x4x4xf32> to vector<2x1x4x4xf32>
    %431 = vector.shape_cast %430 : vector<2x1x4x4xf32> to vector<2x4x4xf32>
    %432 = arith.maximumf %429, %431 : vector<2x4x4xf32>
    %cst_272 = arith.constant dense<0xFF800000> : vector<2x4xf32>
    %433 = vector.multi_reduction <maximumf>, %432, %cst_272 [1] : vector<2x4x4xf32> to vector<2x4xf32>
    %c0_273 = arith.constant 0 : index
    %c4_274 = arith.constant 4 : index
    %c3_275 = arith.constant 3 : index
    %c0_276 = arith.constant 0 : index
    %434 = vector.load %arg3[%c0_273, %c4_274, %c3_275, %c0_276] : memref<2x7x7x4xf32, #tpu.memory_space<vmem>>, vector<2x1x1x4xf32>
    %435 = vector.shape_cast %434 : vector<2x1x1x4xf32> to vector<2x4xf32>
    %436 = vector.shape_cast %433 : vector<2x4xf32> to vector<2x1x1x4xf32>
    tpu.vector_store %arg3[%c0_273, %c4_274, %c3_275, %c0_276], %436 {strides = array<i32>} : memref<2x7x7x4xf32, #tpu.memory_space<vmem>>, vector<2x1x1x4xf32>,
    %c0_277 = arith.constant 0 : index
    %c9_278 = arith.constant 9 : index
    %c9_279 = arith.constant 9 : index
    %c0_280 = arith.constant 0 : index
    %437 = vector.load %arg2[%c0_277, %c9_278, %c9_279, %c0_280] : memref<2x16x16x4xf32, #tpu.memory_space<vmem>>, vector<2x3x3x4xf32>
    %438 = vector.extract_strided_slice %437 {offsets = [0, 0, 0, 0], sizes = [2, 1, 3, 4], strides = [1, 1, 1, 1]} : vector<2x3x3x4xf32> to vector<2x1x3x4xf32>
    %439 = vector.shape_cast %438 : vector<2x1x3x4xf32> to vector<2x3x4xf32>
    %440 = vector.extract_strided_slice %437 {offsets = [0, 1, 0, 0], sizes = [2, 1, 3, 4], strides = [1, 1, 1, 1]} : vector<2x3x3x4xf32> to vector<2x1x3x4xf32>
    %441 = vector.shape_cast %440 : vector<2x1x3x4xf32> to vector<2x3x4xf32>
    %442 = arith.maximumf %439, %441 : vector<2x3x4xf32>
    %443 = vector.extract_strided_slice %437 {offsets = [0, 2, 0, 0], sizes = [2, 1, 3, 4], strides = [1, 1, 1, 1]} : vector<2x3x3x4xf32> to vector<2x1x3x4xf32>
    %444 = vector.shape_cast %443 : vector<2x1x3x4xf32> to vector<2x3x4xf32>
    %445 = arith.maximumf %442, %444 : vector<2x3x4xf32>
    %cst_281 = arith.constant dense<0xFF800000> : vector<2x4xf32>
    %446 = vector.multi_reduction <maximumf>, %445, %cst_281 [1] : vector<2x3x4xf32> to vector<2x4xf32>
    %c0_282 = arith.constant 0 : index
    %c4_283 = arith.constant 4 : index
    %c4_284 = arith.constant 4 : index
    %c0_285 = arith.constant 0 : index
    %447 = vector.load %arg3[%c0_282, %c4_283, %c4_284, %c0_285] : memref<2x7x7x4xf32, #tpu.memory_space<vmem>>, vector<2x1x1x4xf32>
    %448 = vector.shape_cast %447 : vector<2x1x1x4xf32> to vector<2x4xf32>
    %449 = vector.shape_cast %446 : vector<2x4xf32> to vector<2x1x1x4xf32>
    tpu.vector_store %arg3[%c0_282, %c4_283, %c4_284, %c0_285], %449 {strides = array<i32>} : memref<2x7x7x4xf32, #tpu.memory_space<vmem>>, vector<2x1x1x4xf32>,
    %c0_286 = arith.constant 0 : index
    %c9_287 = arith.constant 9 : index
    %c11_288 = arith.constant 11 : index
    %c0_289 = arith.constant 0 : index
    %450 = vector.load %arg2[%c0_286, %c9_287, %c11_288, %c0_289] : memref<2x16x16x4xf32, #tpu.memory_space<vmem>>, vector<2x3x3x4xf32>
    %451 = vector.extract_strided_slice %450 {offsets = [0, 0, 0, 0], sizes = [2, 1, 3, 4], strides = [1, 1, 1, 1]} : vector<2x3x3x4xf32> to vector<2x1x3x4xf32>
    %452 = vector.shape_cast %451 : vector<2x1x3x4xf32> to vector<2x3x4xf32>
    %453 = vector.extract_strided_slice %450 {offsets = [0, 1, 0, 0], sizes = [2, 1, 3, 4], strides = [1, 1, 1, 1]} : vector<2x3x3x4xf32> to vector<2x1x3x4xf32>
    %454 = vector.shape_cast %453 : vector<2x1x3x4xf32> to vector<2x3x4xf32>
    %455 = arith.maximumf %452, %454 : vector<2x3x4xf32>
    %456 = vector.extract_strided_slice %450 {offsets = [0, 2, 0, 0], sizes = [2, 1, 3, 4], strides = [1, 1, 1, 1]} : vector<2x3x3x4xf32> to vector<2x1x3x4xf32>
    %457 = vector.shape_cast %456 : vector<2x1x3x4xf32> to vector<2x3x4xf32>
    %458 = arith.maximumf %455, %457 : vector<2x3x4xf32>
    %cst_290 = arith.constant dense<0xFF800000> : vector<2x4xf32>
    %459 = vector.multi_reduction <maximumf>, %458, %cst_290 [1] : vector<2x3x4xf32> to vector<2x4xf32>
    %c0_291 = arith.constant 0 : index
    %c4_292 = arith.constant 4 : index
    %c5_293 = arith.constant 5 : index
    %c0_294 = arith.constant 0 : index
    %460 = vector.load %arg3[%c0_291, %c4_292, %c5_293, %c0_294] : memref<2x7x7x4xf32, #tpu.memory_space<vmem>>, vector<2x1x1x4xf32>
    %461 = vector.shape_cast %460 : vector<2x1x1x4xf32> to vector<2x4xf32>
    %462 = vector.shape_cast %459 : vector<2x4xf32> to vector<2x1x1x4xf32>
    tpu.vector_store %arg3[%c0_291, %c4_292, %c5_293, %c0_294], %462 {strides = array<i32>} : memref<2x7x7x4xf32, #tpu.memory_space<vmem>>, vector<2x1x1x4xf32>,
    %c0_295 = arith.constant 0 : index
    %c9_296 = arith.constant 9 : index
    %c13_297 = arith.constant 13 : index
    %c0_298 = arith.constant 0 : index
    %463 = vector.load %arg2[%c0_295, %c9_296, %c13_297, %c0_298] : memref<2x16x16x4xf32, #tpu.memory_space<vmem>>, vector<2x3x3x4xf32>
    %464 = vector.extract_strided_slice %463 {offsets = [0, 0, 0, 0], sizes = [2, 1, 3, 4], strides = [1, 1, 1, 1]} : vector<2x3x3x4xf32> to vector<2x1x3x4xf32>
    %465 = vector.shape_cast %464 : vector<2x1x3x4xf32> to vector<2x3x4xf32>
    %466 = vector.extract_strided_slice %463 {offsets = [0, 1, 0, 0], sizes = [2, 1, 3, 4], strides = [1, 1, 1, 1]} : vector<2x3x3x4xf32> to vector<2x1x3x4xf32>
    %467 = vector.shape_cast %466 : vector<2x1x3x4xf32> to vector<2x3x4xf32>
    %468 = arith.maximumf %465, %467 : vector<2x3x4xf32>
    %469 = vector.extract_strided_slice %463 {offsets = [0, 2, 0, 0], sizes = [2, 1, 3, 4], strides = [1, 1, 1, 1]} : vector<2x3x3x4xf32> to vector<2x1x3x4xf32>
    %470 = vector.shape_cast %469 : vector<2x1x3x4xf32> to vector<2x3x4xf32>
    %471 = arith.maximumf %468, %470 : vector<2x3x4xf32>
    %cst_299 = arith.constant dense<0xFF800000> : vector<2x4xf32>
    %472 = vector.multi_reduction <maximumf>, %471, %cst_299 [1] : vector<2x3x4xf32> to vector<2x4xf32>
    %c0_300 = arith.constant 0 : index
    %c4_301 = arith.constant 4 : index
    %c6_302 = arith.constant 6 : index
    %c0_303 = arith.constant 0 : index
    %473 = vector.load %arg3[%c0_300, %c4_301, %c6_302, %c0_303] : memref<2x7x7x4xf32, #tpu.memory_space<vmem>>, vector<2x1x1x4xf32>
    %474 = vector.shape_cast %473 : vector<2x1x1x4xf32> to vector<2x4xf32>
    %475 = vector.shape_cast %472 : vector<2x4xf32> to vector<2x1x1x4xf32>
    tpu.vector_store %arg3[%c0_300, %c4_301, %c6_302, %c0_303], %475 {strides = array<i32>} : memref<2x7x7x4xf32, #tpu.memory_space<vmem>>, vector<2x1x1x4xf32>,
    %c0_304 = arith.constant 0 : index
    %c11_305 = arith.constant 11 : index
    %c0_306 = arith.constant 0 : index
    %c0_307 = arith.constant 0 : index
    %476 = vector.load %arg2[%c0_304, %c11_305, %c0_306, %c0_307] : memref<2x16x16x4xf32, #tpu.memory_space<vmem>>, vector<2x3x3x4xf32>
    %477 = vector.extract_strided_slice %476 {offsets = [0, 0, 0, 0], sizes = [2, 1, 3, 4], strides = [1, 1, 1, 1]} : vector<2x3x3x4xf32> to vector<2x1x3x4xf32>
    %478 = vector.shape_cast %477 : vector<2x1x3x4xf32> to vector<2x3x4xf32>
    %479 = vector.extract_strided_slice %476 {offsets = [0, 1, 0, 0], sizes = [2, 1, 3, 4], strides = [1, 1, 1, 1]} : vector<2x3x3x4xf32> to vector<2x1x3x4xf32>
    %480 = vector.shape_cast %479 : vector<2x1x3x4xf32> to vector<2x3x4xf32>
    %481 = arith.maximumf %478, %480 : vector<2x3x4xf32>
    %482 = vector.extract_strided_slice %476 {offsets = [0, 2, 0, 0], sizes = [2, 1, 3, 4], strides = [1, 1, 1, 1]} : vector<2x3x3x4xf32> to vector<2x1x3x4xf32>
    %483 = vector.shape_cast %482 : vector<2x1x3x4xf32> to vector<2x3x4xf32>
    %484 = arith.maximumf %481, %483 : vector<2x3x4xf32>
    %cst_308 = arith.constant dense<0xFF800000> : vector<2x4xf32>
    %485 = vector.multi_reduction <maximumf>, %484, %cst_308 [1] : vector<2x3x4xf32> to vector<2x4xf32>
    %c0_309 = arith.constant 0 : index
    %c5_310 = arith.constant 5 : index
    %c0_311 = arith.constant 0 : index
    %c0_312 = arith.constant 0 : index
    %486 = vector.load %arg3[%c0_309, %c5_310, %c0_311, %c0_312] : memref<2x7x7x4xf32, #tpu.memory_space<vmem>>, vector<2x1x1x4xf32>
    %487 = vector.shape_cast %486 : vector<2x1x1x4xf32> to vector<2x4xf32>
    %488 = vector.shape_cast %485 : vector<2x4xf32> to vector<2x1x1x4xf32>
    tpu.vector_store %arg3[%c0_309, %c5_310, %c0_311, %c0_312], %488 {strides = array<i32>} : memref<2x7x7x4xf32, #tpu.memory_space<vmem>>, vector<2x1x1x4xf32>,
    %c0_313 = arith.constant 0 : index
    %c11_314 = arith.constant 11 : index
    %c2_315 = arith.constant 2 : index
    %c0_316 = arith.constant 0 : index
    %489 = vector.load %arg2[%c0_313, %c11_314, %c2_315, %c0_316] : memref<2x16x16x4xf32, #tpu.memory_space<vmem>>, vector<2x3x3x4xf32>
    %490 = vector.extract_strided_slice %489 {offsets = [0, 0, 0, 0], sizes = [2, 1, 3, 4], strides = [1, 1, 1, 1]} : vector<2x3x3x4xf32> to vector<2x1x3x4xf32>
    %491 = vector.shape_cast %490 : vector<2x1x3x4xf32> to vector<2x3x4xf32>
    %492 = vector.extract_strided_slice %489 {offsets = [0, 1, 0, 0], sizes = [2, 1, 3, 4], strides = [1, 1, 1, 1]} : vector<2x3x3x4xf32> to vector<2x1x3x4xf32>
    %493 = vector.shape_cast %492 : vector<2x1x3x4xf32> to vector<2x3x4xf32>
    %494 = arith.maximumf %491, %493 : vector<2x3x4xf32>
    %495 = vector.extract_strided_slice %489 {offsets = [0, 2, 0, 0], sizes = [2, 1, 3, 4], strides = [1, 1, 1, 1]} : vector<2x3x3x4xf32> to vector<2x1x3x4xf32>
    %496 = vector.shape_cast %495 : vector<2x1x3x4xf32> to vector<2x3x4xf32>
    %497 = arith.maximumf %494, %496 : vector<2x3x4xf32>
    %cst_317 = arith.constant dense<0xFF800000> : vector<2x4xf32>
    %498 = vector.multi_reduction <maximumf>, %497, %cst_317 [1] : vector<2x3x4xf32> to vector<2x4xf32>
    %c0_318 = arith.constant 0 : index
    %c5_319 = arith.constant 5 : index
    %c1_320 = arith.constant 1 : index
    %c0_321 = arith.constant 0 : index
    %499 = vector.load %arg3[%c0_318, %c5_319, %c1_320, %c0_321] : memref<2x7x7x4xf32, #tpu.memory_space<vmem>>, vector<2x1x1x4xf32>
    %500 = vector.shape_cast %499 : vector<2x1x1x4xf32> to vector<2x4xf32>
    %501 = vector.shape_cast %498 : vector<2x4xf32> to vector<2x1x1x4xf32>
    tpu.vector_store %arg3[%c0_318, %c5_319, %c1_320, %c0_321], %501 {strides = array<i32>} : memref<2x7x7x4xf32, #tpu.memory_space<vmem>>, vector<2x1x1x4xf32>,
    %c0_322 = arith.constant 0 : index
    %c11_323 = arith.constant 11 : index
    %c4_324 = arith.constant 4 : index
    %c0_325 = arith.constant 0 : index
    %502 = vector.load %arg2[%c0_322, %c11_323, %c4_324, %c0_325] : memref<2x16x16x4xf32, #tpu.memory_space<vmem>>, vector<2x3x3x4xf32>
    %503 = vector.extract_strided_slice %502 {offsets = [0, 0, 0, 0], sizes = [2, 1, 3, 4], strides = [1, 1, 1, 1]} : vector<2x3x3x4xf32> to vector<2x1x3x4xf32>
    %504 = vector.shape_cast %503 : vector<2x1x3x4xf32> to vector<2x3x4xf32>
    %505 = vector.extract_strided_slice %502 {offsets = [0, 1, 0, 0], sizes = [2, 1, 3, 4], strides = [1, 1, 1, 1]} : vector<2x3x3x4xf32> to vector<2x1x3x4xf32>
    %506 = vector.shape_cast %505 : vector<2x1x3x4xf32> to vector<2x3x4xf32>
    %507 = arith.maximumf %504, %506 : vector<2x3x4xf32>
    %508 = vector.extract_strided_slice %502 {offsets = [0, 2, 0, 0], sizes = [2, 1, 3, 4], strides = [1, 1, 1, 1]} : vector<2x3x3x4xf32> to vector<2x1x3x4xf32>
    %509 = vector.shape_cast %508 : vector<2x1x3x4xf32> to vector<2x3x4xf32>
    %510 = arith.maximumf %507, %509 : vector<2x3x4xf32>
    %cst_326 = arith.constant dense<0xFF800000> : vector<2x4xf32>
    %511 = vector.multi_reduction <maximumf>, %510, %cst_326 [1] : vector<2x3x4xf32> to vector<2x4xf32>
    %c0_327 = arith.constant 0 : index
    %c5_328 = arith.constant 5 : index
    %c2_329 = arith.constant 2 : index
    %c0_330 = arith.constant 0 : index
    %512 = vector.load %arg3[%c0_327, %c5_328, %c2_329, %c0_330] : memref<2x7x7x4xf32, #tpu.memory_space<vmem>>, vector<2x1x1x4xf32>
    %513 = vector.shape_cast %512 : vector<2x1x1x4xf32> to vector<2x4xf32>
    %514 = vector.shape_cast %511 : vector<2x4xf32> to vector<2x1x1x4xf32>
    tpu.vector_store %arg3[%c0_327, %c5_328, %c2_329, %c0_330], %514 {strides = array<i32>} : memref<2x7x7x4xf32, #tpu.memory_space<vmem>>, vector<2x1x1x4xf32>,
    %c0_331 = arith.constant 0 : index
    %c11_332 = arith.constant 11 : index
    %c6_333 = arith.constant 6 : index
    %c0_334 = arith.constant 0 : index
    %515 = vector.load %arg2[%c0_331, %c11_332, %c6_333, %c0_334] : memref<2x16x16x4xf32, #tpu.memory_space<vmem>>, vector<2x3x4x4xf32>
    %516 = vector.extract_strided_slice %515 {offsets = [0, 0, 0, 0], sizes = [2, 1, 4, 4], strides = [1, 1, 1, 1]} : vector<2x3x4x4xf32> to vector<2x1x4x4xf32>
    %517 = vector.shape_cast %516 : vector<2x1x4x4xf32> to vector<2x4x4xf32>
    %518 = vector.extract_strided_slice %515 {offsets = [0, 1, 0, 0], sizes = [2, 1, 4, 4], strides = [1, 1, 1, 1]} : vector<2x3x4x4xf32> to vector<2x1x4x4xf32>
    %519 = vector.shape_cast %518 : vector<2x1x4x4xf32> to vector<2x4x4xf32>
    %520 = arith.maximumf %517, %519 : vector<2x4x4xf32>
    %521 = vector.extract_strided_slice %515 {offsets = [0, 2, 0, 0], sizes = [2, 1, 4, 4], strides = [1, 1, 1, 1]} : vector<2x3x4x4xf32> to vector<2x1x4x4xf32>
    %522 = vector.shape_cast %521 : vector<2x1x4x4xf32> to vector<2x4x4xf32>
    %523 = arith.maximumf %520, %522 : vector<2x4x4xf32>
    %cst_335 = arith.constant dense<0xFF800000> : vector<2x4xf32>
    %524 = vector.multi_reduction <maximumf>, %523, %cst_335 [1] : vector<2x4x4xf32> to vector<2x4xf32>
    %c0_336 = arith.constant 0 : index
    %c5_337 = arith.constant 5 : index
    %c3_338 = arith.constant 3 : index
    %c0_339 = arith.constant 0 : index
    %525 = vector.load %arg3[%c0_336, %c5_337, %c3_338, %c0_339] : memref<2x7x7x4xf32, #tpu.memory_space<vmem>>, vector<2x1x1x4xf32>
    %526 = vector.shape_cast %525 : vector<2x1x1x4xf32> to vector<2x4xf32>
    %527 = vector.shape_cast %524 : vector<2x4xf32> to vector<2x1x1x4xf32>
    tpu.vector_store %arg3[%c0_336, %c5_337, %c3_338, %c0_339], %527 {strides = array<i32>} : memref<2x7x7x4xf32, #tpu.memory_space<vmem>>, vector<2x1x1x4xf32>,
    %c0_340 = arith.constant 0 : index
    %c11_341 = arith.constant 11 : index
    %c9_342 = arith.constant 9 : index
    %c0_343 = arith.constant 0 : index
    %528 = vector.load %arg2[%c0_340, %c11_341, %c9_342, %c0_343] : memref<2x16x16x4xf32, #tpu.memory_space<vmem>>, vector<2x3x3x4xf32>
    %529 = vector.extract_strided_slice %528 {offsets = [0, 0, 0, 0], sizes = [2, 1, 3, 4], strides = [1, 1, 1, 1]} : vector<2x3x3x4xf32> to vector<2x1x3x4xf32>
    %530 = vector.shape_cast %529 : vector<2x1x3x4xf32> to vector<2x3x4xf32>
    %531 = vector.extract_strided_slice %528 {offsets = [0, 1, 0, 0], sizes = [2, 1, 3, 4], strides = [1, 1, 1, 1]} : vector<2x3x3x4xf32> to vector<2x1x3x4xf32>
    %532 = vector.shape_cast %531 : vector<2x1x3x4xf32> to vector<2x3x4xf32>
    %533 = arith.maximumf %530, %532 : vector<2x3x4xf32>
    %534 = vector.extract_strided_slice %528 {offsets = [0, 2, 0, 0], sizes = [2, 1, 3, 4], strides = [1, 1, 1, 1]} : vector<2x3x3x4xf32> to vector<2x1x3x4xf32>
    %535 = vector.shape_cast %534 : vector<2x1x3x4xf32> to vector<2x3x4xf32>
    %536 = arith.maximumf %533, %535 : vector<2x3x4xf32>
    %cst_344 = arith.constant dense<0xFF800000> : vector<2x4xf32>
    %537 = vector.multi_reduction <maximumf>, %536, %cst_344 [1] : vector<2x3x4xf32> to vector<2x4xf32>
    %c0_345 = arith.constant 0 : index
    %c5_346 = arith.constant 5 : index
    %c4_347 = arith.constant 4 : index
    %c0_348 = arith.constant 0 : index
    %538 = vector.load %arg3[%c0_345, %c5_346, %c4_347, %c0_348] : memref<2x7x7x4xf32, #tpu.memory_space<vmem>>, vector<2x1x1x4xf32>
    %539 = vector.shape_cast %538 : vector<2x1x1x4xf32> to vector<2x4xf32>
    %540 = vector.shape_cast %537 : vector<2x4xf32> to vector<2x1x1x4xf32>
    tpu.vector_store %arg3[%c0_345, %c5_346, %c4_347, %c0_348], %540 {strides = array<i32>} : memref<2x7x7x4xf32, #tpu.memory_space<vmem>>, vector<2x1x1x4xf32>,
    %c0_349 = arith.constant 0 : index
    %c11_350 = arith.constant 11 : index
    %c11_351 = arith.constant 11 : index
    %c0_352 = arith.constant 0 : index
    %541 = vector.load %arg2[%c0_349, %c11_350, %c11_351, %c0_352] : memref<2x16x16x4xf32, #tpu.memory_space<vmem>>, vector<2x3x3x4xf32>
    %542 = vector.extract_strided_slice %541 {offsets = [0, 0, 0, 0], sizes = [2, 1, 3, 4], strides = [1, 1, 1, 1]} : vector<2x3x3x4xf32> to vector<2x1x3x4xf32>
    %543 = vector.shape_cast %542 : vector<2x1x3x4xf32> to vector<2x3x4xf32>
    %544 = vector.extract_strided_slice %541 {offsets = [0, 1, 0, 0], sizes = [2, 1, 3, 4], strides = [1, 1, 1, 1]} : vector<2x3x3x4xf32> to vector<2x1x3x4xf32>
    %545 = vector.shape_cast %544 : vector<2x1x3x4xf32> to vector<2x3x4xf32>
    %546 = arith.maximumf %543, %545 : vector<2x3x4xf32>
    %547 = vector.extract_strided_slice %541 {offsets = [0, 2, 0, 0], sizes = [2, 1, 3, 4], strides = [1, 1, 1, 1]} : vector<2x3x3x4xf32> to vector<2x1x3x4xf32>
    %548 = vector.shape_cast %547 : vector<2x1x3x4xf32> to vector<2x3x4xf32>
    %549 = arith.maximumf %546, %548 : vector<2x3x4xf32>
    %cst_353 = arith.constant dense<0xFF800000> : vector<2x4xf32>
    %550 = vector.multi_reduction <maximumf>, %549, %cst_353 [1] : vector<2x3x4xf32> to vector<2x4xf32>
    %c0_354 = arith.constant 0 : index
    %c5_355 = arith.constant 5 : index
    %c5_356 = arith.constant 5 : index
    %c0_357 = arith.constant 0 : index
    %551 = vector.load %arg3[%c0_354, %c5_355, %c5_356, %c0_357] : memref<2x7x7x4xf32, #tpu.memory_space<vmem>>, vector<2x1x1x4xf32>
    %552 = vector.shape_cast %551 : vector<2x1x1x4xf32> to vector<2x4xf32>
    %553 = vector.shape_cast %550 : vector<2x4xf32> to vector<2x1x1x4xf32>
    tpu.vector_store %arg3[%c0_354, %c5_355, %c5_356, %c0_357], %553 {strides = array<i32>} : memref<2x7x7x4xf32, #tpu.memory_space<vmem>>, vector<2x1x1x4xf32>,
    %c0_358 = arith.constant 0 : index
    %c11_359 = arith.constant 11 : index
    %c13_360 = arith.constant 13 : index
    %c0_361 = arith.constant 0 : index
    %554 = vector.load %arg2[%c0_358, %c11_359, %c13_360, %c0_361] : memref<2x16x16x4xf32, #tpu.memory_space<vmem>>, vector<2x3x3x4xf32>
    %555 = vector.extract_strided_slice %554 {offsets = [0, 0, 0, 0], sizes = [2, 1, 3, 4], strides = [1, 1, 1, 1]} : vector<2x3x3x4xf32> to vector<2x1x3x4xf32>
    %556 = vector.shape_cast %555 : vector<2x1x3x4xf32> to vector<2x3x4xf32>
    %557 = vector.extract_strided_slice %554 {offsets = [0, 1, 0, 0], sizes = [2, 1, 3, 4], strides = [1, 1, 1, 1]} : vector<2x3x3x4xf32> to vector<2x1x3x4xf32>
    %558 = vector.shape_cast %557 : vector<2x1x3x4xf32> to vector<2x3x4xf32>
    %559 = arith.maximumf %556, %558 : vector<2x3x4xf32>
    %560 = vector.extract_strided_slice %554 {offsets = [0, 2, 0, 0], sizes = [2, 1, 3, 4], strides = [1, 1, 1, 1]} : vector<2x3x3x4xf32> to vector<2x1x3x4xf32>
    %561 = vector.shape_cast %560 : vector<2x1x3x4xf32> to vector<2x3x4xf32>
    %562 = arith.maximumf %559, %561 : vector<2x3x4xf32>
    %cst_362 = arith.constant dense<0xFF800000> : vector<2x4xf32>
    %563 = vector.multi_reduction <maximumf>, %562, %cst_362 [1] : vector<2x3x4xf32> to vector<2x4xf32>
    %c0_363 = arith.constant 0 : index
    %c5_364 = arith.constant 5 : index
    %c6_365 = arith.constant 6 : index
    %c0_366 = arith.constant 0 : index
    %564 = vector.load %arg3[%c0_363, %c5_364, %c6_365, %c0_366] : memref<2x7x7x4xf32, #tpu.memory_space<vmem>>, vector<2x1x1x4xf32>
    %565 = vector.shape_cast %564 : vector<2x1x1x4xf32> to vector<2x4xf32>
    %566 = vector.shape_cast %563 : vector<2x4xf32> to vector<2x1x1x4xf32>
    tpu.vector_store %arg3[%c0_363, %c5_364, %c6_365, %c0_366], %566 {strides = array<i32>} : memref<2x7x7x4xf32, #tpu.memory_space<vmem>>, vector<2x1x1x4xf32>,
    %c0_367 = arith.constant 0 : index
    %c13_368 = arith.constant 13 : index
    %c0_369 = arith.constant 0 : index
    %c0_370 = arith.constant 0 : index
    %567 = vector.load %arg2[%c0_367, %c13_368, %c0_369, %c0_370] : memref<2x16x16x4xf32, #tpu.memory_space<vmem>>, vector<2x3x3x4xf32>
    %568 = vector.extract_strided_slice %567 {offsets = [0, 0, 0, 0], sizes = [2, 1, 3, 4], strides = [1, 1, 1, 1]} : vector<2x3x3x4xf32> to vector<2x1x3x4xf32>
    %569 = vector.shape_cast %568 : vector<2x1x3x4xf32> to vector<2x3x4xf32>
    %570 = vector.extract_strided_slice %567 {offsets = [0, 1, 0, 0], sizes = [2, 1, 3, 4], strides = [1, 1, 1, 1]} : vector<2x3x3x4xf32> to vector<2x1x3x4xf32>
    %571 = vector.shape_cast %570 : vector<2x1x3x4xf32> to vector<2x3x4xf32>
    %572 = arith.maximumf %569, %571 : vector<2x3x4xf32>
    %573 = vector.extract_strided_slice %567 {offsets = [0, 2, 0, 0], sizes = [2, 1, 3, 4], strides = [1, 1, 1, 1]} : vector<2x3x3x4xf32> to vector<2x1x3x4xf32>
    %574 = vector.shape_cast %573 : vector<2x1x3x4xf32> to vector<2x3x4xf32>
    %575 = arith.maximumf %572, %574 : vector<2x3x4xf32>
    %cst_371 = arith.constant dense<0xFF800000> : vector<2x4xf32>
    %576 = vector.multi_reduction <maximumf>, %575, %cst_371 [1] : vector<2x3x4xf32> to vector<2x4xf32>
    %c0_372 = arith.constant 0 : index
    %c6_373 = arith.constant 6 : index
    %c0_374 = arith.constant 0 : index
    %c0_375 = arith.constant 0 : index
    %577 = vector.load %arg3[%c0_372, %c6_373, %c0_374, %c0_375] : memref<2x7x7x4xf32, #tpu.memory_space<vmem>>, vector<2x1x1x4xf32>
    %578 = vector.shape_cast %577 : vector<2x1x1x4xf32> to vector<2x4xf32>
    %579 = vector.shape_cast %576 : vector<2x4xf32> to vector<2x1x1x4xf32>
    tpu.vector_store %arg3[%c0_372, %c6_373, %c0_374, %c0_375], %579 {strides = array<i32>} : memref<2x7x7x4xf32, #tpu.memory_space<vmem>>, vector<2x1x1x4xf32>,
    %c0_376 = arith.constant 0 : index
    %c13_377 = arith.constant 13 : index
    %c2_378 = arith.constant 2 : index
    %c0_379 = arith.constant 0 : index
    %580 = vector.load %arg2[%c0_376, %c13_377, %c2_378, %c0_379] : memref<2x16x16x4xf32, #tpu.memory_space<vmem>>, vector<2x3x3x4xf32>
    %581 = vector.extract_strided_slice %580 {offsets = [0, 0, 0, 0], sizes = [2, 1, 3, 4], strides = [1, 1, 1, 1]} : vector<2x3x3x4xf32> to vector<2x1x3x4xf32>
    %582 = vector.shape_cast %581 : vector<2x1x3x4xf32> to vector<2x3x4xf32>
    %583 = vector.extract_strided_slice %580 {offsets = [0, 1, 0, 0], sizes = [2, 1, 3, 4], strides = [1, 1, 1, 1]} : vector<2x3x3x4xf32> to vector<2x1x3x4xf32>
    %584 = vector.shape_cast %583 : vector<2x1x3x4xf32> to vector<2x3x4xf32>
    %585 = arith.maximumf %582, %584 : vector<2x3x4xf32>
    %586 = vector.extract_strided_slice %580 {offsets = [0, 2, 0, 0], sizes = [2, 1, 3, 4], strides = [1, 1, 1, 1]} : vector<2x3x3x4xf32> to vector<2x1x3x4xf32>
    %587 = vector.shape_cast %586 : vector<2x1x3x4xf32> to vector<2x3x4xf32>
    %588 = arith.maximumf %585, %587 : vector<2x3x4xf32>
    %cst_380 = arith.constant dense<0xFF800000> : vector<2x4xf32>
    %589 = vector.multi_reduction <maximumf>, %588, %cst_380 [1] : vector<2x3x4xf32> to vector<2x4xf32>
    %c0_381 = arith.constant 0 : index
    %c6_382 = arith.constant 6 : index
    %c1_383 = arith.constant 1 : index
    %c0_384 = arith.constant 0 : index
    %590 = vector.load %arg3[%c0_381, %c6_382, %c1_383, %c0_384] : memref<2x7x7x4xf32, #tpu.memory_space<vmem>>, vector<2x1x1x4xf32>
    %591 = vector.shape_cast %590 : vector<2x1x1x4xf32> to vector<2x4xf32>
    %592 = vector.shape_cast %589 : vector<2x4xf32> to vector<2x1x1x4xf32>
    tpu.vector_store %arg3[%c0_381, %c6_382, %c1_383, %c0_384], %592 {strides = array<i32>} : memref<2x7x7x4xf32, #tpu.memory_space<vmem>>, vector<2x1x1x4xf32>,
    %c0_385 = arith.constant 0 : index
    %c13_386 = arith.constant 13 : index
    %c4_387 = arith.constant 4 : index
    %c0_388 = arith.constant 0 : index
    %593 = vector.load %arg2[%c0_385, %c13_386, %c4_387, %c0_388] : memref<2x16x16x4xf32, #tpu.memory_space<vmem>>, vector<2x3x3x4xf32>
    %594 = vector.extract_strided_slice %593 {offsets = [0, 0, 0, 0], sizes = [2, 1, 3, 4], strides = [1, 1, 1, 1]} : vector<2x3x3x4xf32> to vector<2x1x3x4xf32>
    %595 = vector.shape_cast %594 : vector<2x1x3x4xf32> to vector<2x3x4xf32>
    %596 = vector.extract_strided_slice %593 {offsets = [0, 1, 0, 0], sizes = [2, 1, 3, 4], strides = [1, 1, 1, 1]} : vector<2x3x3x4xf32> to vector<2x1x3x4xf32>
    %597 = vector.shape_cast %596 : vector<2x1x3x4xf32> to vector<2x3x4xf32>
    %598 = arith.maximumf %595, %597 : vector<2x3x4xf32>
    %599 = vector.extract_strided_slice %593 {offsets = [0, 2, 0, 0], sizes = [2, 1, 3, 4], strides = [1, 1, 1, 1]} : vector<2x3x3x4xf32> to vector<2x1x3x4xf32>
    %600 = vector.shape_cast %599 : vector<2x1x3x4xf32> to vector<2x3x4xf32>
    %601 = arith.maximumf %598, %600 : vector<2x3x4xf32>
    %cst_389 = arith.constant dense<0xFF800000> : vector<2x4xf32>
    %602 = vector.multi_reduction <maximumf>, %601, %cst_389 [1] : vector<2x3x4xf32> to vector<2x4xf32>
    %c0_390 = arith.constant 0 : index
    %c6_391 = arith.constant 6 : index
    %c2_392 = arith.constant 2 : index
    %c0_393 = arith.constant 0 : index
    %603 = vector.load %arg3[%c0_390, %c6_391, %c2_392, %c0_393] : memref<2x7x7x4xf32, #tpu.memory_space<vmem>>, vector<2x1x1x4xf32>
    %604 = vector.shape_cast %603 : vector<2x1x1x4xf32> to vector<2x4xf32>
    %605 = vector.shape_cast %602 : vector<2x4xf32> to vector<2x1x1x4xf32>
    tpu.vector_store %arg3[%c0_390, %c6_391, %c2_392, %c0_393], %605 {strides = array<i32>} : memref<2x7x7x4xf32, #tpu.memory_space<vmem>>, vector<2x1x1x4xf32>,
    %c0_394 = arith.constant 0 : index
    %c13_395 = arith.constant 13 : index
    %c6_396 = arith.constant 6 : index
    %c0_397 = arith.constant 0 : index
    %606 = vector.load %arg2[%c0_394, %c13_395, %c6_396, %c0_397] : memref<2x16x16x4xf32, #tpu.memory_space<vmem>>, vector<2x3x4x4xf32>
    %607 = vector.extract_strided_slice %606 {offsets = [0, 0, 0, 0], sizes = [2, 1, 4, 4], strides = [1, 1, 1, 1]} : vector<2x3x4x4xf32> to vector<2x1x4x4xf32>
    %608 = vector.shape_cast %607 : vector<2x1x4x4xf32> to vector<2x4x4xf32>
    %609 = vector.extract_strided_slice %606 {offsets = [0, 1, 0, 0], sizes = [2, 1, 4, 4], strides = [1, 1, 1, 1]} : vector<2x3x4x4xf32> to vector<2x1x4x4xf32>
    %610 = vector.shape_cast %609 : vector<2x1x4x4xf32> to vector<2x4x4xf32>
    %611 = arith.maximumf %608, %610 : vector<2x4x4xf32>
    %612 = vector.extract_strided_slice %606 {offsets = [0, 2, 0, 0], sizes = [2, 1, 4, 4], strides = [1, 1, 1, 1]} : vector<2x3x4x4xf32> to vector<2x1x4x4xf32>
    %613 = vector.shape_cast %612 : vector<2x1x4x4xf32> to vector<2x4x4xf32>
    %614 = arith.maximumf %611, %613 : vector<2x4x4xf32>
    %cst_398 = arith.constant dense<0xFF800000> : vector<2x4xf32>
    %615 = vector.multi_reduction <maximumf>, %614, %cst_398 [1] : vector<2x4x4xf32> to vector<2x4xf32>
    %c0_399 = arith.constant 0 : index
    %c6_400 = arith.constant 6 : index
    %c3_401 = arith.constant 3 : index
    %c0_402 = arith.constant 0 : index
    %616 = vector.load %arg3[%c0_399, %c6_400, %c3_401, %c0_402] : memref<2x7x7x4xf32, #tpu.memory_space<vmem>>, vector<2x1x1x4xf32>
    %617 = vector.shape_cast %616 : vector<2x1x1x4xf32> to vector<2x4xf32>
    %618 = vector.shape_cast %615 : vector<2x4xf32> to vector<2x1x1x4xf32>
    tpu.vector_store %arg3[%c0_399, %c6_400, %c3_401, %c0_402], %618 {strides = array<i32>} : memref<2x7x7x4xf32, #tpu.memory_space<vmem>>, vector<2x1x1x4xf32>,
    %c0_403 = arith.constant 0 : index
    %c13_404 = arith.constant 13 : index
    %c9_405 = arith.constant 9 : index
    %c0_406 = arith.constant 0 : index
    %619 = vector.load %arg2[%c0_403, %c13_404, %c9_405, %c0_406] : memref<2x16x16x4xf32, #tpu.memory_space<vmem>>, vector<2x3x3x4xf32>
    %620 = vector.extract_strided_slice %619 {offsets = [0, 0, 0, 0], sizes = [2, 1, 3, 4], strides = [1, 1, 1, 1]} : vector<2x3x3x4xf32> to vector<2x1x3x4xf32>
    %621 = vector.shape_cast %620 : vector<2x1x3x4xf32> to vector<2x3x4xf32>
    %622 = vector.extract_strided_slice %619 {offsets = [0, 1, 0, 0], sizes = [2, 1, 3, 4], strides = [1, 1, 1, 1]} : vector<2x3x3x4xf32> to vector<2x1x3x4xf32>
    %623 = vector.shape_cast %622 : vector<2x1x3x4xf32> to vector<2x3x4xf32>
    %624 = arith.maximumf %621, %623 : vector<2x3x4xf32>
    %625 = vector.extract_strided_slice %619 {offsets = [0, 2, 0, 0], sizes = [2, 1, 3, 4], strides = [1, 1, 1, 1]} : vector<2x3x3x4xf32> to vector<2x1x3x4xf32>
    %626 = vector.shape_cast %625 : vector<2x1x3x4xf32> to vector<2x3x4xf32>
    %627 = arith.maximumf %624, %626 : vector<2x3x4xf32>
    %cst_407 = arith.constant dense<0xFF800000> : vector<2x4xf32>
    %628 = vector.multi_reduction <maximumf>, %627, %cst_407 [1] : vector<2x3x4xf32> to vector<2x4xf32>
    %c0_408 = arith.constant 0 : index
    %c6_409 = arith.constant 6 : index
    %c4_410 = arith.constant 4 : index
    %c0_411 = arith.constant 0 : index
    %629 = vector.load %arg3[%c0_408, %c6_409, %c4_410, %c0_411] : memref<2x7x7x4xf32, #tpu.memory_space<vmem>>, vector<2x1x1x4xf32>
    %630 = vector.shape_cast %629 : vector<2x1x1x4xf32> to vector<2x4xf32>
    %631 = vector.shape_cast %628 : vector<2x4xf32> to vector<2x1x1x4xf32>
    tpu.vector_store %arg3[%c0_408, %c6_409, %c4_410, %c0_411], %631 {strides = array<i32>} : memref<2x7x7x4xf32, #tpu.memory_space<vmem>>, vector<2x1x1x4xf32>,
    %c0_412 = arith.constant 0 : index
    %c13_413 = arith.constant 13 : index
    %c11_414 = arith.constant 11 : index
    %c0_415 = arith.constant 0 : index
    %632 = vector.load %arg2[%c0_412, %c13_413, %c11_414, %c0_415] : memref<2x16x16x4xf32, #tpu.memory_space<vmem>>, vector<2x3x3x4xf32>
    %633 = vector.extract_strided_slice %632 {offsets = [0, 0, 0, 0], sizes = [2, 1, 3, 4], strides = [1, 1, 1, 1]} : vector<2x3x3x4xf32> to vector<2x1x3x4xf32>
    %634 = vector.shape_cast %633 : vector<2x1x3x4xf32> to vector<2x3x4xf32>
    %635 = vector.extract_strided_slice %632 {offsets = [0, 1, 0, 0], sizes = [2, 1, 3, 4], strides = [1, 1, 1, 1]} : vector<2x3x3x4xf32> to vector<2x1x3x4xf32>
    %636 = vector.shape_cast %635 : vector<2x1x3x4xf32> to vector<2x3x4xf32>
    %637 = arith.maximumf %634, %636 : vector<2x3x4xf32>
    %638 = vector.extract_strided_slice %632 {offsets = [0, 2, 0, 0], sizes = [2, 1, 3, 4], strides = [1, 1, 1, 1]} : vector<2x3x3x4xf32> to vector<2x1x3x4xf32>
    %639 = vector.shape_cast %638 : vector<2x1x3x4xf32> to vector<2x3x4xf32>
    %640 = arith.maximumf %637, %639 : vector<2x3x4xf32>
    %cst_416 = arith.constant dense<0xFF800000> : vector<2x4xf32>
    %641 = vector.multi_reduction <maximumf>, %640, %cst_416 [1] : vector<2x3x4xf32> to vector<2x4xf32>
    %c0_417 = arith.constant 0 : index
    %c6_418 = arith.constant 6 : index
    %c5_419 = arith.constant 5 : index
    %c0_420 = arith.constant 0 : index
    %642 = vector.load %arg3[%c0_417, %c6_418, %c5_419, %c0_420] : memref<2x7x7x4xf32, #tpu.memory_space<vmem>>, vector<2x1x1x4xf32>
    %643 = vector.shape_cast %642 : vector<2x1x1x4xf32> to vector<2x4xf32>
    %644 = vector.shape_cast %641 : vector<2x4xf32> to vector<2x1x1x4xf32>
    tpu.vector_store %arg3[%c0_417, %c6_418, %c5_419, %c0_420], %644 {strides = array<i32>} : memref<2x7x7x4xf32, #tpu.memory_space<vmem>>, vector<2x1x1x4xf32>,
    %c0_421 = arith.constant 0 : index
    %c13_422 = arith.constant 13 : index
    %c13_423 = arith.constant 13 : index
    %c0_424 = arith.constant 0 : index
    %645 = vector.load %arg2[%c0_421, %c13_422, %c13_423, %c0_424] : memref<2x16x16x4xf32, #tpu.memory_space<vmem>>, vector<2x3x3x4xf32>
    %646 = vector.extract_strided_slice %645 {offsets = [0, 0, 0, 0], sizes = [2, 1, 3, 4], strides = [1, 1, 1, 1]} : vector<2x3x3x4xf32> to vector<2x1x3x4xf32>
    %647 = vector.shape_cast %646 : vector<2x1x3x4xf32> to vector<2x3x4xf32>
    %648 = vector.extract_strided_slice %645 {offsets = [0, 1, 0, 0], sizes = [2, 1, 3, 4], strides = [1, 1, 1, 1]} : vector<2x3x3x4xf32> to vector<2x1x3x4xf32>
    %649 = vector.shape_cast %648 : vector<2x1x3x4xf32> to vector<2x3x4xf32>
    %650 = arith.maximumf %647, %649 : vector<2x3x4xf32>
    %651 = vector.extract_strided_slice %645 {offsets = [0, 2, 0, 0], sizes = [2, 1, 3, 4], strides = [1, 1, 1, 1]} : vector<2x3x3x4xf32> to vector<2x1x3x4xf32>
    %652 = vector.shape_cast %651 : vector<2x1x3x4xf32> to vector<2x3x4xf32>
    %653 = arith.maximumf %650, %652 : vector<2x3x4xf32>
    %cst_425 = arith.constant dense<0xFF800000> : vector<2x4xf32>
    %654 = vector.multi_reduction <maximumf>, %653, %cst_425 [1] : vector<2x3x4xf32> to vector<2x4xf32>
    %c0_426 = arith.constant 0 : index
    %c6_427 = arith.constant 6 : index
    %c6_428 = arith.constant 6 : index
    %c0_429 = arith.constant 0 : index
    %655 = vector.load %arg3[%c0_426, %c6_427, %c6_428, %c0_429] : memref<2x7x7x4xf32, #tpu.memory_space<vmem>>, vector<2x1x1x4xf32>
    %656 = vector.shape_cast %655 : vector<2x1x1x4xf32> to vector<2x4xf32>
    %657 = vector.shape_cast %654 : vector<2x4xf32> to vector<2x1x1x4xf32>
    tpu.vector_store %arg3[%c0_426, %c6_427, %c6_428, %c0_429], %657 {strides = array<i32>} : memref<2x7x7x4xf32, #tpu.memory_space<vmem>>, vector<2x1x1x4xf32>,
    return
  }
  func.func @transform_0(%arg0: i32, %arg1: i32) -> (i32, i32, i32, i32) {
    %c0_i32 = arith.constant 0 : i32
    %c0_i32_0 = arith.constant 0 : i32
    %c0_i32_1 = arith.constant 0 : i32
    return %arg0, %c0_i32, %c0_i32_0, %arg1 : i32, i32, i32, i32
  }
  func.func @transform_1(%arg0: i32, %arg1: i32) -> (i32, i32, i32, i32) {
    %c0_i32 = arith.constant 0 : i32
    %c0_i32_0 = arith.constant 0 : i32
    %c0_i32_1 = arith.constant 0 : i32
    return %arg0, %c0_i32, %c0_i32_0, %arg1 : i32, i32, i32, i32
  }
}

</mosaic_0001>

<bundles_post_ra>
// kernel: tpu_custom_call.1
= control target key start
LH: loop header
LB: loop body
LE: loop exit
PB: predicated region body
PF: predicated region fallthrough
CT: control target
= control target key end

     0   :  { %vm18_vm0 = vcmask 26624   ;;  %vm33_vm1 = vcmask 24576   ;;  %vm98_vm2 = vcmask 27648   ;;  %s3103_s0 = inlined_call_operand.vmem [shape: f32[2,16,16,4], index: 0, kind: input, shape index: {}]   ;;  %s3104_s1 = inlined_call_operand.vmem [shape: f32[2,7,7,4], index: 1, kind: output, shape index: {}]  }
   0x1   :  { %v8_v0 = vld [vmem:[%s3103_s0] sm:$0x7]  ;;  %v9_v1 = vld [vmem:[%s3103_s0 + $0x10] sm:$0x7]  ;;  %v62_v18 = vld [vmem:[%s3103_s0 + $0x4] sm:$0x7] }
   0x2   :  { %v10_v2 = vld [vmem:[%s3103_s0 + $0x20] sm:$0x7]  ;;  %v14_v3 = vmax.f32 %v8_v0, %v9_v1  ;;  %v12_v5 = vld [vmem:[%s3103_s0 + $0x110] sm:$0x7]  ;;  %v63_v19 = vld [vmem:[%s3103_s0 + $0x14] sm:$0x7] }
   0x3   :  { %v11_v4 = vld [vmem:[%s3103_s0 + $0x100] sm:$0x7]  ;;  %v37_v9 = vld [vmem:[%s3103_s0 + $0x12] sm:$0x7]  ;;  %v64_v20 = vld [vmem:[%s3103_s0 + $0x24] sm:$0x7]  ;;  %v68_v23 = vmax.f32 %v62_v18, %v63_v19 }
   0x4   :  { %v13_v6 = vld [vmem:[%s3103_s0 + $0x120] sm:$0x7]  ;;  %v15_v7 = vmax.f32 %v11_v4, %v12_v5  ;;  %v16_v11 = vmax.f32 %v14_v3, %v10_v2  ;;  %v40_v14 = vld [vmem:[%s3103_s0 + $0x112] sm:$0x7]  ;;  %v65_v24 = vld [vmem:[%s3103_s0 + $0x104] sm:$0x7] }
   0x5   :  { %v36_v8 = vld [vmem:[%s3103_s0 + $0x2] sm:$0x7]  ;;  %v66_v25 = vld [vmem:[%s3103_s0 + $0x114] sm:$0x7]  ;;  %v88_v31 = vld [vmem:[%s3103_s0 + $0x6] sm:$0xf]  ;;  %v70_v34 = vmax.f32 %v68_v23, %v64_v20 }
   0x6   :  { %v38_v10 = vld [vmem:[%s3103_s0 + $0x22] sm:$0x7]  ;;  %v42_v12 = vmax.f32 %v36_v8, %v37_v9  ;;  %v17_v16 = vmax.f32 %v15_v7, %v13_v6  ;;  %v19_v21 = vsel %vm18_vm0, %v16_v11, -inf  ;;  %v69_v30 = vmax.f32 %v65_v24, %v66_v25  ;;  %v89_v35 = vld [vmem:[%s3103_s0 + $0x16] sm:$0xf] }
   0x7   :  { %v39_v13 = vld [vmem:[%s3103_s0 + $0x102] sm:$0x7]  ;;  %v20_v26 = vrot.slane %v19_v21, 4  ;;  %v90_v40 = vld [vmem:[%s3103_s0 + $0x26] sm:$0xf]  ;;  %v72_v43 = vsel %vm18_vm0, %v70_v34, -inf  ;;  %v94_v44 = vmax.f32 %v88_v31, %v89_v35 }
   0x8   :  { %v41_v15 = vld [vmem:[%s3103_s0 + $0x122] sm:$0x7]  ;;  %v43_v17 = vmax.f32 %v39_v13, %v40_v14  ;;  %v44_v22 = vmax.f32 %v42_v12, %v38_v10  ;;  %v26_v27 = vsel %vm18_vm0, %v17_v16, -inf  ;;  %v91_v45 = vld [vmem:[%s3103_s0 + $0x106] sm:$0xf]  ;;  %v73_v49 = vrot.slane %v72_v43, 4 }
   0x9   :  { %v67_v29 = vld [vmem:[%s3103_s0 + $0x124] sm:$0x7]  ;;  %v27_v32 = vrot.slane %v26_v27, 4  ;;  %v21_v36 = vmax.f32 %v19_v21, %v20_v26  ;;  %v92_v46 = vld [vmem:[%s3103_s0 + $0x116] sm:$0xf]  ;;  %v96_v54 = vmax.f32 %v94_v44, %v90_v40 }
   0xa   :  { %v45_v28 = vmax.f32 %v43_v17, %v41_v15  ;;  %v46_v33 = vsel %vm18_vm0, %v44_v22, -inf  ;;  %v71_v39 = vmax.f32 %v69_v30, %v67_v29  ;;  %v74_v57 = vmax.f32 %v72_v43, %v73_v49  ;;  %v93_v58 = vld [vmem:[%s3103_s0 + $0x126] sm:$0xf]  ;;  %v116_v5 = vld [vmem:[%s3103_s0 + $0x19] sm:$0x7] }
   0xb   :  { %v47_v37 = vrot.slane %v46_v33, 4  ;;  %v28_v41 = vmax.f32 %v26_v27, %v27_v32  ;;  %v22_v47 = vrot.slane %v21_v36, 2  ;;  %v95_v59 = vmax.f32 %v91_v45, %v92_v46  ;;  %v115_v4 = vld [vmem:[%s3103_s0 + $0x9] sm:$0x7]  ;;  %v119_v11 = vld [vmem:[%s3103_s0 + $0x119] sm:$0x7] }
   0xc   :  { %v53_v38 = vsel %vm18_vm0, %v45_v28, -inf  ;;  %v79_v50 = vsel %vm18_vm0, %v71_v39, -inf  ;;  %v99_v63 = vsel %vm98_vm2, %v96_v54, -inf  ;;  %v75_v2 = vrot.slane %v74_v57, 2  ;;  %v118_v6 = vld [vmem:[%s3103_s0 + $0x109] sm:$0x7] }
   0xd   :  { %v54_v42 = vrot.slane %v53_v38, 4  ;;  %v48_v48 = vmax.f32 %v46_v33, %v47_v37  ;;  %v29_v51 = vrot.slane %v28_v41, 2  ;;  %v80_v53 = vrot.slane %v79_v50, 4  ;;  %v141_v12 = vld [vmem:[%s3103_s0 + $0xb] sm:$0x7] }
   0xe   :  { %v23_v55 = vmax.f32 %v21_v36, %v22_v47  ;;  %v100_v3 = vrot.slane %v99_v63, 4  ;;  %v97_v10 = vmax.f32 %v95_v59, %v93_v58  ;;  %v76_v15 = vmax.f32 %v74_v57, %v75_v2  ;;  %v117_v17 = vld [vmem:[%s3103_s0 + $0x29] sm:$0x7]  ;;  %v142_v19 = vld [vmem:[%s3103_s0 + $0x1b] sm:$0x7] }
   0xf   :  { %v55_v52 = vmax.f32 %v53_v38, %v54_v42  ;;  %v49_v56 = vrot.slane %v48_v48, 2  ;;  %v30_v60 = vmax.f32 %v28_v41, %v29_v51  ;;  %v81_v62 = vmax.f32 %v79_v50, %v80_v53  ;;  %v120_v18 = vld [vmem:[%s3103_s0 + $0x129] sm:$0x7]  ;;  %v145_v26 = vld [vmem:[%s3103_s0 + $0x11b] sm:$0x7] }
  0x10   :  { %v24_v0 = vrot.slane %v23_v55, 1  ;;  %v101_v16 = vmax.f32 %v99_v63, %v100_v3  ;;  %v144_v20 = vld [vmem:[%s3103_s0 + $0x10b] sm:$0x7]  ;;  %v106_v24 = vsel %vm98_vm2, %v97_v10, -inf  ;;  %v77_v29 = vrot.slane %v76_v15, 1 }
  0x11   :  { %v56_v61 = vrot.slane %v55_v52, 2  ;;  %v50_v1 = vmax.f32 %v48_v48, %v49_v56  ;;  %v31_v7 = vrot.slane %v30_v60, 1  ;;  %v82_v9 = vrot.slane %v81_v62, 2  ;;  %v143_v25 = vld [vmem:[%s3103_s0 + $0x2b] sm:$0x7] }
  0x12   :  { %v25_v13 = vmax.f32 %v23_v55, %v24_v0  ;;  %v167_v27 = vld [vmem:[%s3103_s0 + $0xd] sm:$0x7]  ;;  %v102_v30 = vrot.slane %v101_v16, 2  ;;  %v107_v31 = vrot.slane %v106_v24, 4  ;;  %v121_v35 = vmax.f32 %v115_v4, %v116_v5  ;;  %v168_v37 = vld [vmem:[%s3103_s0 + $0x1d] sm:$0x7] }
  0x13   :  { %v57_v8 = vmax.f32 %v55_v52, %v56_v61  ;;  %v51_v14 = vrot.slane %v50_v1, 1  ;;  %v32_v21 = vmax.f32 %v30_v60, %v31_v7  ;;  %v83_v23 = vmax.f32 %v81_v62, %v82_v9  ;;  %v146_v32 = vld [vmem:[%s3103_s0 + $0x12b] sm:$0x7]  ;;  %v171_v43 = vld [vmem:[%s3103_s0 + $0x11d] sm:$0x7] }
  0x14   :  { %34 = vst.msk [vmem:[%s3104_s1] sm:$0x1] %vm33_vm1, %v25_v13  ;;  %v122_v36 = vmax.f32 %v118_v6, %v119_v11  ;;  %v78_v38 = vmax.f32 %v76_v15, %v77_v29  ;;  %v103_v39 = vmax.f32 %v101_v16, %v102_v30  ;;  %v108_v40 = vmax.f32 %v106_v24, %v107_v31  ;;  %v170_v42 = vld [vmem:[%s3103_s0 + $0x10d] sm:$0x7]  ;;  %v1329_v62 = vld [vmem:[%s3103_s0 + $0x20] sm:$0x7] }
  0x15   :  { %v58_v22 = vrot.slane %v57_v8, 1  ;;  %v52_v28 = vmax.f32 %v50_v1, %v51_v14  ;;  %35 = vst.msk [vmem:[%s3104_s1 + $0x38] sm:$0x1] %vm33_vm1, %v32_v21  ;;  %v84_v34 = vrot.slane %v83_v23, 1  ;;  %v147_v41 = vmax.f32 %v141_v12, %v142_v19  ;;  %v169_v48 = vld [vmem:[%s3103_s0 + $0x2d] sm:$0x7] }
  0x16   :  { %v123_v45 = vmax.f32 %v121_v35, %v117_v17  ;;  %v124_v46 = vmax.f32 %v122_v36, %v120_v18  ;;  %v148_v47 = vmax.f32 %v144_v20, %v145_v26  ;;  %86 = vst.msk [vmem:[%s3104_s1 + $0x2] sm:$0x1] %vm33_vm1, %v78_v38  ;;  %v104_v49 = vrot.slane %v103_v39, 1  ;;  %v172_v53 = vld [vmem:[%s3103_s0 + $0x12d] sm:$0x7] }
  0x17   :  { %v59_v33 = vmax.f32 %v57_v8, %v58_v22  ;;  %60 = vst.msk [vmem:[%s3104_s1 + $0x1] sm:$0x1] %vm33_vm1, %v52_v28  ;;  %v85_v44 = vmax.f32 %v83_v23, %v84_v34  ;;  %v109_v50 = vrot.slane %v108_v40, 2  ;;  %v149_v51 = vmax.f32 %v147_v41, %v143_v25  ;;  %v1330_v63 = vld [vmem:[%s3103_s0 + $0x30] sm:$0x7] }
  0x18   :  { %v173_v52 = vmax.f32 %v167_v27, %v168_v37  ;;  %v125_v54 = vsel %vm18_vm0, %v123_v45, -inf  ;;  %v132_v55 = vsel %vm18_vm0, %v124_v46, -inf  ;;  %v150_v56 = vmax.f32 %v148_v47, %v146_v32  ;;  %v1331_v4 = vld [vmem:[%s3103_s0 + $0x40] sm:$0x7]  ;;  %v1333_v14 = vld [vmem:[%s3103_s0 + $0x130] sm:$0x7] }
  0x19   :  { %61 = vst.msk [vmem:[%s3104_s1 + $0x39] sm:$0x1] %vm33_vm1, %v59_v33  ;;  %v174_v57 = vmax.f32 %v170_v42, %v171_v43  ;;  %v105_v58 = vmax.f32 %v103_v39, %v104_v49  ;;  %v110_v59 = vmax.f32 %v108_v40, %v109_v50  ;;  %v126_v60 = vrot.slane %v125_v54, 4  ;;  %v1332_v9 = vld [vmem:[%s3103_s0 + $0x120] sm:$0x7] }
  0x1a   :  { %87 = vst.msk [vmem:[%s3104_s1 + $0x3a] sm:$0x1] %vm33_vm1, %v85_v44  ;;  %v133_v61 = vrot.slane %v132_v55, 4  ;;  %v151_v0 = vsel %vm18_vm0, %v149_v51, -inf  ;;  %v158_v1 = vsel %vm18_vm0, %v150_v56, -inf  ;;  %v175_v2 = vmax.f32 %v173_v52, %v169_v48 }
  0x1b   :  { %v176_v3 = vmax.f32 %v174_v57, %v172_v53  ;;  %113 = vst.msk [vmem:[%s3104_s1 + $0x3] sm:$0x1] %vm33_vm1, %v105_v58  ;;  %v111_v5 = vrot.slane %v110_v59, 1  ;;  %v127_v6 = vmax.f32 %v125_v54, %v126_v60  ;;  %v152_v8 = vrot.slane %v151_v0, 4  ;;  %v1334_v26 = vld [vmem:[%s3103_s0 + $0x140] sm:$0x7] }
  0x1c   :  { %v134_v7 = vmax.f32 %v132_v55, %v133_v61  ;;  %v159_v10 = vrot.slane %v158_v1, 4  ;;  %v177_v11 = vsel %vm18_vm0, %v175_v2, -inf  ;;  %v200_v13 = vmax.f32 %v1329_v62, %v1330_v63  ;;  %v1337_v32 = vld [vmem:[%s3103_s0 + $0x22] sm:$0x7]  ;;  %v1338_v37 = vld [vmem:[%s3103_s0 + $0x32] sm:$0x7] }
  0x1d   :  { %v184_v12 = vsel %vm18_vm0, %v176_v3, -inf  ;;  %v112_v15 = vmax.f32 %v110_v59, %v111_v5  ;;  %v128_v16 = vrot.slane %v127_v6, 2  ;;  %v153_v18 = vmax.f32 %v151_v0, %v152_v8  ;;  %v1339_v42 = vld [vmem:[%s3103_s0 + $0x42] sm:$0x7]  ;;  %v1341_v44 = vld [vmem:[%s3103_s0 + $0x132] sm:$0x7] }
  0x1e   :  { %v135_v17 = vrot.slane %v134_v7, 2  ;;  %v160_v19 = vmax.f32 %v158_v1, %v159_v10  ;;  %v178_v20 = vrot.slane %v177_v11, 4  ;;  %v185_v21 = vrot.slane %v184_v12, 4  ;;  %v1340_v43 = vld [vmem:[%s3103_s0 + $0x122] sm:$0x7] }
  0x1f   :  { %v202_v22 = vmax.f32 %v200_v13, %v1331_v4  ;;  %114 = vst.msk [vmem:[%s3104_s1 + $0x3b] sm:$0x1] %vm33_vm1, %v112_v15  ;;  %v129_v23 = vmax.f32 %v127_v6, %v128_v16  ;;  %v154_v25 = vrot.slane %v153_v18, 2  ;;  %v201_v27 = vmax.f32 %v1332_v9, %v1333_v14  ;;  %v1342_v49 = vld [vmem:[%s3103_s0 + $0x142] sm:$0x7] }
  0x20   :  { %v136_v24 = vmax.f32 %v134_v7, %v135_v17  ;;  %v161_v28 = vrot.slane %v160_v19, 2  ;;  %v179_v29 = vmax.f32 %v177_v11, %v178_v20  ;;  %v186_v30 = vmax.f32 %v184_v12, %v185_v21  ;;  %v1345_v50 = vld [vmem:[%s3103_s0 + $0x24] sm:$0x7]  ;;  %v1346_v51 = vld [vmem:[%s3103_s0 + $0x34] sm:$0x7] }
  0x21   :  { %v204_v31 = vsel %vm18_vm0, %v202_v22, -inf  ;;  %v130_v33 = vrot.slane %v129_v23, 1  ;;  %v155_v35 = vmax.f32 %v153_v18, %v154_v25  ;;  %v203_v41 = vmax.f32 %v201_v27, %v1334_v26  ;;  %v1347_v56 = vld [vmem:[%s3103_s0 + $0x44] sm:$0x7]  ;;  %v1349_v62 = vld [vmem:[%s3103_s0 + $0x134] sm:$0x7] }
  0x22   :  { %v137_v34 = vrot.slane %v136_v24, 1  ;;  %v205_v36 = vrot.slane %v204_v31, 4  ;;  %v162_v38 = vmax.f32 %v160_v19, %v161_v28  ;;  %v180_v39 = vrot.slane %v179_v29, 2  ;;  %v1348_v57 = vld [vmem:[%s3103_s0 + $0x124] sm:$0x7] }
  0x23   :  { %v187_v40 = vrot.slane %v186_v30, 2  ;;  %v131_v45 = vmax.f32 %v129_v23, %v130_v33  ;;  %v156_v47 = vrot.slane %v155_v35, 1  ;;  %v211_v55 = vsel %vm18_vm0, %v203_v41, -inf  ;;  %v1350_v3 = vld [vmem:[%s3103_s0 + $0x144] sm:$0x7] }
  0x24   :  { %v138_v46 = vmax.f32 %v136_v24, %v137_v34  ;;  %v206_v48 = vmax.f32 %v204_v31, %v205_v36  ;;  %v163_v52 = vrot.slane %v162_v38, 1  ;;  %v181_v53 = vmax.f32 %v179_v29, %v180_v39  ;;  %v1353_v8 = vld [vmem:[%s3103_s0 + $0x26] sm:$0xf]  ;;  %v1354_v9 = vld [vmem:[%s3103_s0 + $0x36] sm:$0xf] }
  0x25   :  { %v188_v54 = vmax.f32 %v186_v30, %v187_v40  ;;  %139 = vst.msk [vmem:[%s3104_s1 + $0x4] sm:$0x1] %vm33_vm1, %v131_v45  ;;  %v157_v58 = vmax.f32 %v155_v35, %v156_v47  ;;  %v212_v60 = vrot.slane %v211_v55, 4  ;;  %v227_v61 = vmax.f32 %v1337_v32, %v1338_v37  ;;  %v1355_v14 = vld [vmem:[%s3103_s0 + $0x46] sm:$0xf] }
  0x26   :  { %v207_v59 = vrot.slane %v206_v48, 2  ;;  %140 = vst.msk [vmem:[%s3104_s1 + $0x3c] sm:$0x1] %vm33_vm1, %v138_v46  ;;  %v164_v63 = vmax.f32 %v162_v38, %v163_v52  ;;  %v182_v0 = vrot.slane %v181_v53, 1  ;;  %v228_v2 = vmax.f32 %v1340_v43, %v1341_v44  ;;  %v1356_v15 = vld [vmem:[%s3103_s0 + $0x126] sm:$0xf] }
  0x27   :  { %v189_v1 = vrot.slane %v188_v54, 1  ;;  %165 = vst.msk [vmem:[%s3104_s1 + $0x5] sm:$0x1] %vm33_vm1, %v157_v58  ;;  %v213_v5 = vmax.f32 %v211_v55, %v212_v60  ;;  %v229_v6 = vmax.f32 %v227_v61, %v1339_v42  ;;  %v253_v7 = vmax.f32 %v1345_v50, %v1346_v51  ;;  %v1357_v20 = vld [vmem:[%s3103_s0 + $0x136] sm:$0xf] }
  0x28   :  { %v208_v4 = vmax.f32 %v206_v48, %v207_v59  ;;  %166 = vst.msk [vmem:[%s3104_s1 + $0x3d] sm:$0x1] %vm33_vm1, %v164_v63  ;;  %v183_v10 = vmax.f32 %v181_v53, %v182_v0  ;;  %v230_v12 = vmax.f32 %v228_v2, %v1342_v49  ;;  %v254_v13 = vmax.f32 %v1348_v57, %v1349_v62  ;;  %v1361_v25 = vld [vmem:[%s3103_s0 + $0x29] sm:$0x7]  ;;  %v1362_v30 = vld [vmem:[%s3103_s0 + $0x39] sm:$0x7] }
  0x29   :  { %v190_v11 = vmax.f32 %v188_v54, %v189_v1  ;;  %v214_v17 = vrot.slane %v213_v5, 2  ;;  %v231_v18 = vsel %vm18_vm0, %v229_v6, -inf  ;;  %v255_v19 = vmax.f32 %v253_v7, %v1347_v56  ;;  %v1358_v35 = vld [vmem:[%s3103_s0 + $0x146] sm:$0xf]  ;;  %v1365_v46 = vld [vmem:[%s3103_s0 + $0x139] sm:$0x7] }
  0x2a   :  { %v209_v16 = vrot.slane %v208_v4, 1  ;;  %191 = vst.msk [vmem:[%s3104_s1 + $0x6] sm:$0x1] %vm33_vm1, %v183_v10  ;;  %v232_v21 = vrot.slane %v231_v18, 4  ;;  %v238_v22 = vsel %vm18_vm0, %v230_v12, -inf  ;;  %v256_v23 = vmax.f32 %v254_v13, %v1350_v3 }
  0x2b   :  { %v279_v24 = vmax.f32 %v1353_v8, %v1354_v9  ;;  %192 = vst.msk [vmem:[%s3104_s1 + $0x3e] sm:$0x1] %vm33_vm1, %v190_v11  ;;  %v215_v27 = vmax.f32 %v213_v5, %v214_v17  ;;  %v239_v28 = vrot.slane %v238_v22, 4  ;;  %v257_v29 = vsel %vm18_vm0, %v255_v19, -inf  ;;  %v1363_v40 = vld [vmem:[%s3103_s0 + $0x49] sm:$0x7] }
  0x2c   :  { %v210_v26 = vmax.f32 %v208_v4, %v209_v16  ;;  %v233_v31 = vmax.f32 %v231_v18, %v232_v21  ;;  %v258_v32 = vrot.slane %v257_v29, 4  ;;  %v264_v33 = vsel %vm18_vm0, %v256_v23, -inf  ;;  %v1364_v45 = vld [vmem:[%s3103_s0 + $0x129] sm:$0x7]  ;;  %v1370_v1 = vld [vmem:[%s3103_s0 + $0x3b] sm:$0x7] }
  0x2d   :  { %v281_v34 = vmax.f32 %v279_v24, %v1355_v14  ;;  %v216_v36 = vrot.slane %v215_v27, 1  ;;  %v240_v37 = vmax.f32 %v238_v22, %v239_v28  ;;  %v265_v38 = vrot.slane %v264_v33, 4  ;;  %v1366_v55 = vld [vmem:[%s3103_s0 + $0x149] sm:$0x7]  ;;  %v1373_v8 = vld [vmem:[%s3103_s0 + $0x13b] sm:$0x7] }
  0x2e   :  { %1335 = vst.msk [vmem:[%s3104_s1 + $0x8] sm:$0x1] %vm33_vm1, %v210_v26  ;;  %v280_v39 = vmax.f32 %v1356_v15, %v1357_v20  ;;  %v234_v41 = vrot.slane %v233_v31, 2  ;;  %v259_v42 = vmax.f32 %v257_v29, %v258_v32  ;;  %v305_v44 = vmax.f32 %v1361_v25, %v1362_v30  ;;  %v1369_v60 = vld [vmem:[%s3103_s0 + $0x2b] sm:$0x7] }
  0x2f   :  { %v283_v43 = vsel %vm98_vm2, %v281_v34, -inf  ;;  %v217_v47 = vmax.f32 %v215_v27, %v216_v36  ;;  %v241_v48 = vrot.slane %v240_v37, 2  ;;  %v266_v49 = vmax.f32 %v264_v33, %v265_v38  ;;  %v1371_v6 = vld [vmem:[%s3103_s0 + $0x4b] sm:$0x7]  ;;  %v1378_v14 = vld [vmem:[%s3103_s0 + $0x3d] sm:$0x7] }
  0x30   :  { %v284_v50 = vrot.slane %v283_v43, 4  ;;  %v235_v51 = vmax.f32 %v233_v31, %v234_v41  ;;  %v260_v52 = vrot.slane %v259_v42, 2  ;;  %v282_v53 = vmax.f32 %v280_v39, %v1358_v35  ;;  %v1372_v7 = vld [vmem:[%s3103_s0 + $0x12b] sm:$0x7]  ;;  %v1381_v26 = vld [vmem:[%s3103_s0 + $0x13d] sm:$0x7] }
  0x31   :  { %v307_v54 = vmax.f32 %v305_v44, %v1363_v40  ;;  %1336 = vst.msk [vmem:[%s3104_s1 + $0x40] sm:$0x1] %vm33_vm1, %v217_v47  ;;  %v242_v56 = vmax.f32 %v240_v37, %v241_v48  ;;  %v267_v57 = vrot.slane %v266_v49, 2  ;;  %v306_v59 = vmax.f32 %v1364_v45, %v1365_v46  ;;  %v1377_v13 = vld [vmem:[%s3103_s0 + $0x2d] sm:$0x7] }
  0x32   :  { %v285_v58 = vmax.f32 %v283_v43, %v284_v50  ;;  %v236_v61 = vrot.slane %v235_v51, 1  ;;  %v261_v62 = vmax.f32 %v259_v42, %v260_v52  ;;  %v290_v63 = vsel %vm98_vm2, %v282_v53, -inf  ;;  %v1374_v19 = vld [vmem:[%s3103_s0 + $0x14b] sm:$0x7]  ;;  %v1385_v40 = vld [vmem:[%s3103_s0 + $0x40] sm:$0x7] }
  0x33   :  { %v309_v0 = vsel %vm18_vm0, %v307_v54, -inf  ;;  %v243_v2 = vrot.slane %v242_v56, 1  ;;  %v268_v3 = vmax.f32 %v266_v49, %v267_v57  ;;  %v291_v5 = vrot.slane %v290_v63, 4  ;;  %v1379_v20 = vld [vmem:[%s3103_s0 + $0x4d] sm:$0x7] }
  0x34   :  { %v286_v4 = vrot.slane %v285_v58, 2  ;;  %v237_v9 = vmax.f32 %v235_v51, %v236_v61  ;;  %v262_v10 = vrot.slane %v261_v62, 1  ;;  %v310_v11 = vrot.slane %v309_v0, 4  ;;  %v1380_v21 = vld [vmem:[%s3103_s0 + $0x12d] sm:$0x7] }
  0x35   :  { %v308_v12 = vmax.f32 %v306_v59, %v1366_v55  ;;  %v244_v15 = vmax.f32 %v242_v56, %v243_v2  ;;  %v269_v16 = vrot.slane %v268_v3, 1  ;;  %v292_v18 = vmax.f32 %v290_v63, %v291_v5  ;;  %v1382_v35 = vld [vmem:[%s3103_s0 + $0x14d] sm:$0x7]  ;;  %v1386_v41 = vld [vmem:[%s3103_s0 + $0x50] sm:$0x7] }
  0x36   :  { %v287_v17 = vmax.f32 %v285_v58, %v286_v4  ;;  %1343 = vst.msk [vmem:[%s3104_s1 + $0x9] sm:$0x1] %vm33_vm1, %v237_v9  ;;  %v263_v22 = vmax.f32 %v261_v62, %v262_v10  ;;  %v311_v23 = vmax.f32 %v309_v0, %v310_v11  ;;  %v331_v25 = vmax.f32 %v1369_v60, %v1370_v1  ;;  %v1387_v46 = vld [vmem:[%s3103_s0 + $0x60] sm:$0x7]  ;;  %v1389_v56 = vld [vmem:[%s3103_s0 + $0x150] sm:$0x7] }
  0x37   :  { %v316_v24 = vsel %vm18_vm0, %v308_v12, -inf  ;;  %1344 = vst.msk [vmem:[%s3104_s1 + $0x41] sm:$0x1] %vm33_vm1, %v244_v15  ;;  %v270_v27 = vmax.f32 %v268_v3, %v269_v16  ;;  %v293_v29 = vrot.slane %v292_v18, 2  ;;  %v332_v33 = vmax.f32 %v1372_v7, %v1373_v8  ;;  %v1388_v51 = vld [vmem:[%s3103_s0 + $0x140] sm:$0x7] }
  0x38   :  { %v288_v28 = vrot.slane %v287_v17, 1  ;;  %v317_v30 = vrot.slane %v316_v24, 4  ;;  %1351 = vst.msk [vmem:[%s3104_s1 + $0xa] sm:$0x1] %vm33_vm1, %v263_v22  ;;  %v312_v31 = vrot.slane %v311_v23, 2  ;;  %v333_v32 = vmax.f32 %v331_v25, %v1371_v6 }
  0x39   :  { %v357_v34 = vmax.f32 %v1377_v13, %v1378_v14  ;;  %1352 = vst.msk [vmem:[%s3104_s1 + $0x42] sm:$0x1] %vm33_vm1, %v270_v27  ;;  %v294_v37 = vmax.f32 %v292_v18, %v293_v29  ;;  %v358_v39 = vmax.f32 %v1380_v21, %v1381_v26  ;;  %v334_v44 = vmax.f32 %v332_v33, %v1374_v19  ;;  %v1390_v61 = vld [vmem:[%s3103_s0 + $0x160] sm:$0x7]  ;;  %v1394_v63 = vld [vmem:[%s3103_s0 + $0x52] sm:$0x7] }
  0x3a   :  { %v289_v36 = vmax.f32 %v287_v17, %v288_v28  ;;  %v318_v38 = vmax.f32 %v316_v24, %v317_v30  ;;  %v313_v42 = vmax.f32 %v311_v23, %v312_v31  ;;  %v335_v43 = vsel %vm18_vm0, %v333_v32, -inf  ;;  %v1393_v62 = vld [vmem:[%s3103_s0 + $0x42] sm:$0x7]  ;;  %v1397_v14 = vld [vmem:[%s3103_s0 + $0x152] sm:$0x7] }
  0x3b   :  { %v359_v45 = vmax.f32 %v357_v34, %v1379_v20  ;;  %v295_v47 = vrot.slane %v294_v37, 1  ;;  %v336_v49 = vrot.slane %v335_v43, 4  ;;  %v360_v50 = vmax.f32 %v358_v39, %v1382_v35  ;;  %v1395_v4 = vld [vmem:[%s3103_s0 + $0x62] sm:$0x7]  ;;  %v1402_v33 = vld [vmem:[%s3103_s0 + $0x54] sm:$0x7] }
  0x3c   :  { %1359 = vst.msk [vmem:[%s3104_s1 + $0xb] sm:$0x1] %vm33_vm1, %v289_v36  ;;  %v319_v48 = vrot.slane %v318_v38, 2  ;;  %v314_v52 = vrot.slane %v313_v42, 1  ;;  %v342_v53 = vsel %vm18_vm0, %v334_v44, -inf  ;;  %v384_v55 = vmax.f32 %v1385_v40, %v1386_v41 }
  0x3d   :  { %v361_v54 = vsel %vm18_vm0, %v359_v45, -inf  ;;  %v296_v57 = vmax.f32 %v294_v37, %v295_v47  ;;  %v337_v59 = vmax.f32 %v335_v43, %v336_v49  ;;  %v343_v60 = vrot.slane %v342_v53, 4  ;;  %v1396_v5 = vld [vmem:[%s3103_s0 + $0x142] sm:$0x7]  ;;  %v1405_v40 = vld [vmem:[%s3103_s0 + $0x154] sm:$0x7] }
  0x3e   :  { %v320_v58 = vmax.f32 %v318_v38, %v319_v48  ;;  %v315_v0 = vmax.f32 %v313_v42, %v314_v52  ;;  %v362_v1 = vrot.slane %v361_v54, 4  ;;  %v368_v2 = vsel %vm18_vm0, %v360_v50, -inf  ;;  %v1398_v23 = vld [vmem:[%s3103_s0 + $0x162] sm:$0x7]  ;;  %v1409_v45 = vld [vmem:[%s3103_s0 + $0x46] sm:$0xf] }
  0x3f   :  { %v386_v3 = vmax.f32 %v384_v55, %v1387_v46  ;;  %1360 = vst.msk [vmem:[%s3104_s1 + $0x43] sm:$0x1] %vm33_vm1, %v296_v57  ;;  %v338_v7 = vrot.slane %v337_v59, 2  ;;  %v344_v8 = vmax.f32 %v342_v53, %v343_v60  ;;  %v369_v9 = vrot.slane %v368_v2, 4  ;;  %v1401_v28 = vld [vmem:[%s3103_s0 + $0x44] sm:$0x7] }
  0x40   :  { %v321_v6 = vrot.slane %v320_v58, 1  ;;  %1367 = vst.msk [vmem:[%s3104_s1 + $0xc] sm:$0x1] %vm33_vm1, %v315_v0  ;;  %v363_v10 = vmax.f32 %v361_v54, %v362_v1  ;;  %v385_v12 = vmax.f32 %v1388_v51, %v1389_v56  ;;  %v411_v13 = vmax.f32 %v1393_v62, %v1394_v63  ;;  %v1403_v34 = vld [vmem:[%s3103_s0 + $0x64] sm:$0x7] }
  0x41   :  { %v388_v11 = vsel %vm18_vm0, %v386_v3, -inf  ;;  %v339_v16 = vmax.f32 %v337_v59, %v338_v7  ;;  %v345_v17 = vrot.slane %v344_v8, 2  ;;  %v370_v18 = vmax.f32 %v368_v2, %v369_v9  ;;  %v1404_v39 = vld [vmem:[%s3103_s0 + $0x144] sm:$0x7]  ;;  %v1410_v51 = vld [vmem:[%s3103_s0 + $0x56] sm:$0xf] }
  0x42   :  { %v322_v15 = vmax.f32 %v320_v58, %v321_v6  ;;  %v364_v19 = vrot.slane %v363_v10, 2  ;;  %v389_v20 = vrot.slane %v388_v11, 4  ;;  %v387_v21 = vmax.f32 %v385_v12, %v1390_v61  ;;  %v1406_v50 = vld [vmem:[%s3103_s0 + $0x164] sm:$0x7]  ;;  %v1413_v58 = vld [vmem:[%s3103_s0 + $0x156] sm:$0xf] }
  0x43   :  { %v413_v22 = vmax.f32 %v411_v13, %v1395_v4  ;;  %v340_v24 = vrot.slane %v339_v16, 1  ;;  %v346_v25 = vmax.f32 %v344_v8, %v345_v17  ;;  %v371_v26 = vrot.slane %v370_v18, 2  ;;  %v1411_v56 = vld [vmem:[%s3103_s0 + $0x66] sm:$0xf]  ;;  %v1418_v9 = vld [vmem:[%s3103_s0 + $0x59] sm:$0x7] }
  0x44   :  { %1368 = vst.msk [vmem:[%s3104_s1 + $0x44] sm:$0x1] %vm33_vm1, %v322_v15  ;;  %v412_v27 = vmax.f32 %v1396_v5, %v1397_v14  ;;  %v365_v29 = vmax.f32 %v363_v10, %v364_v19  ;;  %v390_v30 = vmax.f32 %v388_v11, %v389_v20  ;;  %v395_v31 = vsel %vm18_vm0, %v387_v21, -inf  ;;  %v1412_v57 = vld [vmem:[%s3103_s0 + $0x146] sm:$0xf] }
  0x45   :  { %v415_v32 = vsel %vm18_vm0, %v413_v22, -inf  ;;  %v341_v35 = vmax.f32 %v339_v16, %v340_v24  ;;  %v347_v36 = vrot.slane %v346_v25, 1  ;;  %v372_v37 = vmax.f32 %v370_v18, %v371_v26  ;;  %v1414_v63 = vld [vmem:[%s3103_s0 + $0x166] sm:$0xf]  ;;  %v1421_v24 = vld [vmem:[%s3103_s0 + $0x159] sm:$0x7] }
  0x46   :  { %v396_v38 = vrot.slane %v395_v31, 4  ;;  %v366_v41 = vrot.slane %v365_v29, 1  ;;  %v391_v42 = vrot.slane %v390_v30, 2  ;;  %v416_v43 = vrot.slane %v415_v32, 4  ;;  %v1417_v4 = vld [vmem:[%s3103_s0 + $0x49] sm:$0x7] }
  0x47   :  { %v414_v44 = vmax.f32 %v412_v27, %v1398_v23  ;;  %1375 = vst.msk [vmem:[%s3104_s1 + $0xd] sm:$0x1] %vm33_vm1, %v341_v35  ;;  %v348_v46 = vmax.f32 %v346_v25, %v347_v36  ;;  %v373_v47 = vrot.slane %v372_v37, 1  ;;  %v437_v49 = vmax.f32 %v1401_v28, %v1402_v33  ;;  %v1419_v18 = vld [vmem:[%s3103_s0 + $0x69] sm:$0x7] }
  0x48   :  { %v397_v48 = vmax.f32 %v395_v31, %v396_v38  ;;  %v367_v52 = vmax.f32 %v365_v29, %v366_v41  ;;  %v392_v53 = vmax.f32 %v390_v30, %v391_v42  ;;  %v417_v54 = vmax.f32 %v415_v32, %v416_v43  ;;  %v1420_v19 = vld [vmem:[%s3103_s0 + $0x149] sm:$0x7]  ;;  %v1426_v30 = vld [vmem:[%s3103_s0 + $0x5b] sm:$0x7] }
  0x49   :  { %v422_v55 = vsel %vm18_vm0, %v414_v44, -inf  ;;  %1376 = vst.msk [vmem:[%s3104_s1 + $0x45] sm:$0x1] %vm33_vm1, %v348_v46  ;;  %v374_v59 = vmax.f32 %v372_v37, %v373_v47  ;;  %v439_v62 = vmax.f32 %v437_v49, %v1403_v34  ;;  %v438_v2 = vmax.f32 %v1404_v39, %v1405_v40  ;;  %v1425_v29 = vld [vmem:[%s3103_s0 + $0x4b] sm:$0x7] }
  0x4a   :  { %v398_v60 = vrot.slane %v397_v48, 2  ;;  %v423_v61 = vrot.slane %v422_v55, 4  ;;  %1383 = vst.msk [vmem:[%s3104_s1 + $0xe] sm:$0x1] %vm33_vm1, %v367_v52  ;;  %v393_v0 = vrot.slane %v392_v53, 1  ;;  %v418_v1 = vrot.slane %v417_v54, 2 }
  0x4b   :  { %v463_v3 = vmax.f32 %v1409_v45, %v1410_v51  ;;  %1384 = vst.msk [vmem:[%s3104_s1 + $0x46] sm:$0x1] %vm33_vm1, %v374_v59  ;;  %v441_v7 = vsel %vm18_vm0, %v439_v62, -inf  ;;  %v464_v8 = vmax.f32 %v1412_v57, %v1413_v58  ;;  %v440_v13 = vmax.f32 %v438_v2, %v1406_v50  ;;  %v1422_v35 = vld [vmem:[%s3103_s0 + $0x169] sm:$0x7] }
  0x4c   :  { %v399_v5 = vmax.f32 %v397_v48, %v398_v60  ;;  %v424_v6 = vmax.f32 %v422_v55, %v423_v61  ;;  %v394_v10 = vmax.f32 %v392_v53, %v393_v0  ;;  %v419_v11 = vmax.f32 %v417_v54, %v418_v1  ;;  %v1427_v40 = vld [vmem:[%s3103_s0 + $0x6b] sm:$0x7]  ;;  %v1429_v46 = vld [vmem:[%s3103_s0 + $0x15b] sm:$0x7] }
  0x4d   :  { %v442_v12 = vrot.slane %v441_v7, 4  ;;  %v465_v16 = vmax.f32 %v463_v3, %v1411_v56  ;;  %v466_v17 = vmax.f32 %v464_v8, %v1414_v63  ;;  %v448_v22 = vsel %vm18_vm0, %v440_v13, -inf  ;;  %v1428_v45 = vld [vmem:[%s3103_s0 + $0x14b] sm:$0x7]  ;;  %v1434_v1 = vld [vmem:[%s3103_s0 + $0x5d] sm:$0x7] }
  0x4e   :  { %v400_v14 = vrot.slane %v399_v5, 1  ;;  %v425_v15 = vrot.slane %v424_v6, 2  ;;  %1391 = vst.msk [vmem:[%s3104_s1 + $0x10] sm:$0x1] %vm33_vm1, %v394_v10  ;;  %v420_v20 = vrot.slane %v419_v11, 1  ;;  %v489_v23 = vmax.f32 %v1417_v4, %v1418_v9 }
  0x4f   :  { %v443_v21 = vmax.f32 %v441_v7, %v442_v12  ;;  %v449_v27 = vrot.slane %v448_v22, 4  ;;  %v467_v28 = vsel %vm98_vm2, %v465_v16, -inf  ;;  %v474_v34 = vsel %vm98_vm2, %v466_v17, -inf  ;;  %v1430_v55 = vld [vmem:[%s3103_s0 + $0x16b] sm:$0x7] }
  0x50   :  { %v401_v25 = vmax.f32 %v399_v5, %v400_v14  ;;  %v426_v26 = vmax.f32 %v424_v6, %v425_v15  ;;  %v421_v31 = vmax.f32 %v419_v11, %v420_v20  ;;  %v468_v33 = vrot.slane %v467_v28, 4  ;;  %v1433_v60 = vld [vmem:[%s3103_s0 + $0x4d] sm:$0x7]  ;;  %v1437_v8 = vld [vmem:[%s3103_s0 + $0x15d] sm:$0x7] }
  0x51   :  { %v444_v32 = vrot.slane %v443_v21, 2  ;;  %v450_v37 = vmax.f32 %v448_v22, %v449_v27  ;;  %v475_v38 = vrot.slane %v474_v34, 4  ;;  %v491_v39 = vmax.f32 %v489_v23, %v1419_v18  ;;  %v1435_v2 = vld [vmem:[%s3103_s0 + $0x6d] sm:$0x7]  ;;  %v1441_v18 = vld [vmem:[%s3103_s0 + $0x60] sm:$0x7] }
  0x52   :  { %1392 = vst.msk [vmem:[%s3104_s1 + $0x48] sm:$0x1] %vm33_vm1, %v401_v25  ;;  %v427_v36 = vrot.slane %v426_v26, 1  ;;  %v469_v42 = vmax.f32 %v467_v28, %v468_v33  ;;  %v490_v43 = vmax.f32 %v1420_v19, %v1421_v24  ;;  %v515_v44 = vmax.f32 %v1425_v29, %v1426_v30  ;;  %v1436_v7 = vld [vmem:[%s3103_s0 + $0x14d] sm:$0x7] }
  0x53   :  { %1399 = vst.msk [vmem:[%s3104_s1 + $0x11] sm:$0x1] %vm33_vm1, %v421_v31  ;;  %v445_v41 = vmax.f32 %v443_v21, %v444_v32  ;;  %v451_v48 = vrot.slane %v450_v37, 2  ;;  %v476_v49 = vmax.f32 %v474_v34, %v475_v38  ;;  %v493_v50 = vsel %vm18_vm0, %v491_v39, -inf  ;;  %v1438_v17 = vld [vmem:[%s3103_s0 + $0x16d] sm:$0x7] }
  0x54   :  { %v428_v47 = vmax.f32 %v426_v26, %v427_v36  ;;  %v470_v52 = vrot.slane %v469_v42, 2  ;;  %v494_v53 = vrot.slane %v493_v50, 4  ;;  %v492_v54 = vmax.f32 %v490_v43, %v1422_v35  ;;  %v1442_v19 = vld [vmem:[%s3103_s0 + $0x70] sm:$0x7]  ;;  %v1443_v24 = vld [vmem:[%s3103_s0 + $0x80] sm:$0x7] }
  0x55   :  { %v446_v51 = vrot.slane %v445_v41, 1  ;;  %v452_v56 = vmax.f32 %v450_v37, %v451_v48  ;;  %v477_v57 = vrot.slane %v476_v49, 2  ;;  %v517_v58 = vmax.f32 %v515_v44, %v1427_v40  ;;  %v1445_v25 = vld [vmem:[%s3103_s0 + $0x160] sm:$0x7]  ;;  %v1446_v26 = vld [vmem:[%s3103_s0 + $0x170] sm:$0x7] }
  0x56   :  { %1400 = vst.msk [vmem:[%s3104_s1 + $0x49] sm:$0x1] %vm33_vm1, %v428_v47  ;;  %v516_v59 = vmax.f32 %v1428_v45, %v1429_v46  ;;  %v471_v62 = vmax.f32 %v469_v42, %v470_v52  ;;  %v495_v63 = vmax.f32 %v493_v50, %v494_v53  ;;  %v500_v0 = vsel %vm18_vm0, %v492_v54, -inf  ;;  %v1447_v31 = vld [vmem:[%s3103_s0 + $0x180] sm:$0x7] }
  0x57   :  { %v447_v61 = vmax.f32 %v445_v41, %v446_v51  ;;  %v453_v3 = vrot.slane %v452_v56, 1  ;;  %v478_v4 = vmax.f32 %v476_v49, %v477_v57  ;;  %v501_v5 = vrot.slane %v500_v0, 4  ;;  %v1451_v36 = vld [vmem:[%s3103_s0 + $0x62] sm:$0x7]  ;;  %v1452_v41 = vld [vmem:[%s3103_s0 + $0x72] sm:$0x7] }
  0x58   :  { %v519_v6 = vsel %vm18_vm0, %v517_v58, -inf  ;;  %v472_v9 = vrot.slane %v471_v62, 1  ;;  %v496_v10 = vrot.slane %v495_v63, 2  ;;  %v518_v12 = vmax.f32 %v516_v59, %v1430_v55  ;;  %v1444_v46 = vld [vmem:[%s3103_s0 + $0x90] sm:$0x7] }
  0x59   :  { %1407 = vst.msk [vmem:[%s3104_s1 + $0x12] sm:$0x1] %vm33_vm1, %v447_v61  ;;  %v520_v11 = vrot.slane %v519_v6, 4  ;;  %v454_v13 = vmax.f32 %v452_v56, %v453_v3  ;;  %v479_v14 = vrot.slane %v478_v4, 1  ;;  %v502_v15 = vmax.f32 %v500_v0, %v501_v5  ;;  %v1448_v47 = vld [vmem:[%s3103_s0 + $0x190] sm:$0x7] }
  0x5a   :  { %v541_v16 = vmax.f32 %v1433_v60, %v1434_v1  ;;  %v473_v20 = vmax.f32 %v471_v62, %v472_v9  ;;  %v497_v21 = vmax.f32 %v495_v63, %v496_v10  ;;  %v526_v23 = vsel %vm18_vm0, %v518_v12, -inf  ;;  %v1453_v52 = vld [vmem:[%s3103_s0 + $0x82] sm:$0x7]  ;;  %v1456_v58 = vld [vmem:[%s3103_s0 + $0x172] sm:$0x7] }
  0x5b   :  { %v521_v22 = vmax.f32 %v519_v6, %v520_v11  ;;  %1408 = vst.msk [vmem:[%s3104_s1 + $0x4a] sm:$0x1] %vm33_vm1, %v454_v13  ;;  %v480_v27 = vmax.f32 %v478_v4, %v479_v14  ;;  %v503_v28 = vrot.slane %v502_v15, 2  ;;  %v527_v29 = vrot.slane %v526_v23, 4  ;;  %v1455_v53 = vld [vmem:[%s3103_s0 + $0x162] sm:$0x7] }
  0x5c   :  { %v543_v30 = vmax.f32 %v541_v16, %v1435_v2  ;;  %1415 = vst.msk [vmem:[%s3104_s1 + $0x13] sm:$0x1] %vm33_vm1, %v473_v20  ;;  %v498_v32 = vrot.slane %v497_v21, 1  ;;  %v542_v34 = vmax.f32 %v1436_v7, %v1437_v8  ;;  %v570_v35 = vmax.f32 %v1441_v18, %v1442_v19  ;;  %v1454_v63 = vld [vmem:[%s3103_s0 + $0x92] sm:$0x7] }
  0x5d   :  { %v522_v33 = vrot.slane %v521_v22, 2  ;;  %1416 = vst.msk [vmem:[%s3104_s1 + $0x4b] sm:$0x1] %vm33_vm1, %v480_v27  ;;  %v504_v37 = vmax.f32 %v502_v15, %v503_v28  ;;  %v528_v38 = vmax.f32 %v526_v23, %v527_v29  ;;  %v571_v40 = vmax.f32 %v1445_v25, %v1446_v26  ;;  %v1457_v0 = vld [vmem:[%s3103_s0 + $0x182] sm:$0x7] }
  0x5e   :  { %v545_v39 = vsel %vm18_vm0, %v543_v30, -inf  ;;  %v499_v42 = vmax.f32 %v497_v21, %v498_v32  ;;  %v544_v45 = vmax.f32 %v542_v34, %v1438_v17  ;;  %v572_v50 = vmax.f32 %v570_v35, %v1443_v24  ;;  %v1458_v5 = vld [vmem:[%s3103_s0 + $0x192] sm:$0x7]  ;;  %v1461_v6 = vld [vmem:[%s3103_s0 + $0x64] sm:$0x7] }
  0x5f   :  { %v523_v43 = vmax.f32 %v521_v22, %v522_v33  ;;  %v546_v44 = vrot.slane %v545_v39, 4  ;;  %v505_v48 = vrot.slane %v504_v37, 1  ;;  %v529_v49 = vrot.slane %v528_v38, 2  ;;  %v1462_v11 = vld [vmem:[%s3103_s0 + $0x74] sm:$0x7] }
  0x60   :  { %v573_v51 = vmax.f32 %v571_v40, %v1447_v31  ;;  %1423 = vst.msk [vmem:[%s3104_s1 + $0x14] sm:$0x1] %vm33_vm1, %v499_v42  ;;  %v552_v56 = vsel %vm18_vm0, %v544_v45, -inf  ;;  %v601_v57 = vmax.f32 %v1451_v36, %v1452_v41  ;;  %v574_v62 = vmax.f32 %v572_v50, %v1444_v46  ;;  %v1463_v16 = vld [vmem:[%s3103_s0 + $0x84] sm:$0x7] }
  0x61   :  { %v524_v54 = vrot.slane %v523_v43, 1  ;;  %v547_v55 = vmax.f32 %v545_v39, %v546_v44  ;;  %v506_v59 = vmax.f32 %v504_v37, %v505_v48  ;;  %v530_v60 = vmax.f32 %v528_v38, %v529_v49  ;;  %v1465_v21 = vld [vmem:[%s3103_s0 + $0x164] sm:$0x7]  ;;  %v1466_v22 = vld [vmem:[%s3103_s0 + $0x174] sm:$0x7] }
  0x62   :  { %v553_v61 = vrot.slane %v552_v56, 4  ;;  %v575_v3 = vmax.f32 %v573_v51, %v1448_v47  ;;  %v603_v4 = vmax.f32 %v601_v57, %v1453_v52  ;;  %v576_v9 = vsel %vm18_vm0, %v574_v62, -inf  ;;  %v1464_v26 = vld [vmem:[%s3103_s0 + $0x94] sm:$0x7]  ;;  %v1467_v32 = vld [vmem:[%s3103_s0 + $0x184] sm:$0x7] }
  0x63   :  { %v525_v1 = vmax.f32 %v523_v43, %v524_v54  ;;  %v548_v2 = vrot.slane %v547_v55, 2  ;;  %1424 = vst.msk [vmem:[%s3104_s1 + $0x4c] sm:$0x1] %vm33_vm1, %v506_v59  ;;  %v531_v7 = vrot.slane %v530_v60, 1  ;;  %v602_v10 = vmax.f32 %v1455_v53, %v1456_v58  ;;  %v1471_v37 = vld [vmem:[%s3103_s0 + $0x66] sm:$0xf] }
  0x64   :  { %v554_v8 = vmax.f32 %v552_v56, %v553_v61  ;;  %v577_v13 = vrot.slane %v576_v9, 4  ;;  %v583_v14 = vsel %vm18_vm0, %v575_v3, -inf  ;;  %v605_v15 = vmax.f32 %v603_v4, %v1454_v63  ;;  %v1472_v38 = vld [vmem:[%s3103_s0 + $0x76] sm:$0xf]  ;;  %v1473_v48 = vld [vmem:[%s3103_s0 + $0x86] sm:$0xf] }
  0x65   :  { %1431 = vst.msk [vmem:[%s3104_s1 + $0x15] sm:$0x1] %vm33_vm1, %v525_v1  ;;  %v549_v12 = vmax.f32 %v547_v55, %v548_v2  ;;  %v532_v17 = vmax.f32 %v530_v60, %v531_v7  ;;  %v584_v19 = vrot.slane %v583_v14, 4  ;;  %v604_v20 = vmax.f32 %v602_v10, %v1457_v0  ;;  %v1468_v43 = vld [vmem:[%s3103_s0 + $0x194] sm:$0x7] }
  0x66   :  { %v555_v18 = vrot.slane %v554_v8, 2  ;;  %v578_v24 = vmax.f32 %v576_v9, %v577_v13  ;;  %v607_v25 = vsel %vm18_vm0, %v605_v15, -inf  ;;  %v631_v27 = vmax.f32 %v1461_v6, %v1462_v11  ;;  %v1474_v52 = vld [vmem:[%s3103_s0 + $0x96] sm:$0xf]  ;;  %v1475_v54 = vld [vmem:[%s3103_s0 + $0x166] sm:$0xf] }
  0x67   :  { %v550_v23 = vrot.slane %v549_v12, 1  ;;  %1432 = vst.msk [vmem:[%s3104_s1 + $0x4d] sm:$0x1] %vm33_vm1, %v532_v17  ;;  %v585_v29 = vmax.f32 %v583_v14, %v584_v19  ;;  %v608_v30 = vrot.slane %v607_v25, 4  ;;  %v606_v31 = vmax.f32 %v604_v20, %v1458_v5  ;;  %v1476_v55 = vld [vmem:[%s3103_s0 + $0x176] sm:$0xf] }
  0x68   :  { %v556_v28 = vmax.f32 %v554_v8, %v555_v18  ;;  %v579_v34 = vrot.slane %v578_v24, 2  ;;  %v633_v35 = vmax.f32 %v631_v27, %v1463_v16  ;;  %v632_v36 = vmax.f32 %v1465_v21, %v1466_v22  ;;  %v1477_v60 = vld [vmem:[%s3103_s0 + $0x186] sm:$0xf]  ;;  %v1478_v2 = vld [vmem:[%s3103_s0 + $0x196] sm:$0xf] }
  0x69   :  { %v551_v33 = vmax.f32 %v549_v12, %v550_v23  ;;  %v586_v40 = vrot.slane %v585_v29, 2  ;;  %v609_v41 = vmax.f32 %v607_v25, %v608_v30  ;;  %v614_v42 = vsel %vm18_vm0, %v606_v31, -inf  ;;  %v1481_v61 = vld [vmem:[%s3103_s0 + $0x69] sm:$0x7]  ;;  %v1482_v3 = vld [vmem:[%s3103_s0 + $0x79] sm:$0x7] }
  0x6a   :  { %v557_v39 = vrot.slane %v556_v28, 1  ;;  %v580_v44 = vmax.f32 %v578_v24, %v579_v34  ;;  %v615_v45 = vrot.slane %v614_v42, 4  ;;  %v635_v46 = vmax.f32 %v633_v35, %v1464_v26  ;;  %v1485_v8 = vld [vmem:[%s3103_s0 + $0x169] sm:$0x7]  ;;  %v1486_v9 = vld [vmem:[%s3103_s0 + $0x179] sm:$0x7] }
  0x6b   :  { %1439 = vst.msk [vmem:[%s3104_s1 + $0x16] sm:$0x1] %vm33_vm1, %v551_v33  ;;  %v634_v47 = vmax.f32 %v632_v36, %v1467_v32  ;;  %v587_v50 = vmax.f32 %v585_v29, %v586_v40  ;;  %v610_v51 = vrot.slane %v609_v41, 2  ;;  %v661_v53 = vmax.f32 %v1471_v37, %v1472_v38  ;;  %v1483_v14 = vld [vmem:[%s3103_s0 + $0x89] sm:$0x7] }
  0x6c   :  { %v558_v49 = vmax.f32 %v556_v28, %v557_v39  ;;  %v581_v56 = vrot.slane %v580_v44, 1  ;;  %v616_v57 = vmax.f32 %v614_v42, %v615_v45  ;;  %v637_v58 = vsel %vm18_vm0, %v635_v46, -inf  ;;  %v1484_v15 = vld [vmem:[%s3103_s0 + $0x99] sm:$0x7]  ;;  %v1487_v20 = vld [vmem:[%s3103_s0 + $0x189] sm:$0x7] }
  0x6d   :  { %v636_v59 = vmax.f32 %v634_v47, %v1468_v43  ;;  %v588_v62 = vrot.slane %v587_v50, 1  ;;  %v611_v63 = vmax.f32 %v609_v41, %v610_v51  ;;  %v638_v0 = vrot.slane %v637_v58, 4  ;;  %v1491_v21 = vld [vmem:[%s3103_s0 + $0x6b] sm:$0x7]  ;;  %v1488_v25 = vld [vmem:[%s3103_s0 + $0x199] sm:$0x7] }
  0x6e   :  { %1440 = vst.msk [vmem:[%s3104_s1 + $0x4e] sm:$0x1] %vm33_vm1, %v558_v49  ;;  %v663_v1 = vmax.f32 %v661_v53, %v1473_v48  ;;  %v582_v4 = vmax.f32 %v580_v44, %v581_v56  ;;  %v617_v5 = vrot.slane %v616_v57, 2  ;;  %v662_v7 = vmax.f32 %v1475_v54, %v1476_v55  ;;  %v1492_v27 = vld [vmem:[%s3103_s0 + $0x7b] sm:$0x7] }
  0x6f   :  { %v644_v6 = vsel %vm18_vm0, %v636_v59, -inf  ;;  %v589_v10 = vmax.f32 %v587_v50, %v588_v62  ;;  %v612_v11 = vrot.slane %v611_v63, 1  ;;  %v639_v12 = vmax.f32 %v637_v58, %v638_v0  ;;  %v1493_v32 = vld [vmem:[%s3103_s0 + $0x8b] sm:$0x7]  ;;  %v1496_v38 = vld [vmem:[%s3103_s0 + $0x17b] sm:$0x7] }
  0x70   :  { %v645_v13 = vrot.slane %v644_v6, 4  ;;  %1449 = vst.msk [vmem:[%s3104_s1 + $0x18] sm:$0x1] %vm33_vm1, %v582_v4  ;;  %v618_v16 = vmax.f32 %v616_v57, %v617_v5  ;;  %v665_v17 = vmax.f32 %v663_v1, %v1474_v52  ;;  %v664_v18 = vmax.f32 %v662_v7, %v1477_v60  ;;  %v1495_v33 = vld [vmem:[%s3103_s0 + $0x16b] sm:$0x7] }
  0x71   :  { %v691_v19 = vmax.f32 %v1481_v61, %v1482_v3  ;;  %1450 = vst.msk [vmem:[%s3104_s1 + $0x50] sm:$0x1] %vm33_vm1, %v589_v10  ;;  %v613_v22 = vmax.f32 %v611_v63, %v612_v11  ;;  %v640_v23 = vrot.slane %v639_v12, 2  ;;  %v692_v26 = vmax.f32 %v1485_v8, %v1486_v9  ;;  %v1494_v47 = vld [vmem:[%s3103_s0 + $0x9b] sm:$0x7] }
  0x72   :  { %v646_v24 = vmax.f32 %v644_v6, %v645_v13  ;;  %v619_v28 = vrot.slane %v618_v16, 1  ;;  %v667_v29 = vsel %vm98_vm2, %v665_v17, -inf  ;;  %v666_v30 = vmax.f32 %v664_v18, %v1478_v2  ;;  %v1497_v48 = vld [vmem:[%s3103_s0 + $0x18b] sm:$0x7]  ;;  %v1498_v52 = vld [vmem:[%s3103_s0 + $0x19b] sm:$0x7] }
  0x73   :  { %v693_v31 = vmax.f32 %v691_v19, %v1483_v14  ;;  %1459 = vst.msk [vmem:[%s3104_s1 + $0x19] sm:$0x1] %vm33_vm1, %v613_v22  ;;  %v641_v34 = vmax.f32 %v639_v12, %v640_v23  ;;  %v668_v36 = vrot.slane %v667_v29, 4  ;;  %v694_v37 = vmax.f32 %v692_v26, %v1487_v20  ;;  %v1501_v58 = vld [vmem:[%s3103_s0 + $0x6d] sm:$0x7] }
  0x74   :  { %v647_v35 = vrot.slane %v646_v24, 2  ;;  %v620_v39 = vmax.f32 %v618_v16, %v619_v28  ;;  %v674_v40 = vsel %vm98_vm2, %v666_v30, -inf  ;;  %v721_v42 = vmax.f32 %v1491_v21, %v1492_v27  ;;  %v1502_v59 = vld [vmem:[%s3103_s0 + $0x7d] sm:$0x7]  ;;  %v1503_v0 = vld [vmem:[%s3103_s0 + $0x8d] sm:$0x7] }
  0x75   :  { %v695_v41 = vmax.f32 %v693_v31, %v1484_v15  ;;  %v642_v43 = vrot.slane %v641_v34, 1  ;;  %v669_v45 = vmax.f32 %v667_v29, %v668_v36  ;;  %v675_v46 = vrot.slane %v674_v40, 4  ;;  %v1505_v1 = vld [vmem:[%s3103_s0 + $0x16d] sm:$0x7]  ;;  %v1506_v6 = vld [vmem:[%s3103_s0 + $0x17d] sm:$0x7] }
  0x76   :  { %v648_v44 = vmax.f32 %v646_v24, %v647_v35  ;;  %1460 = vst.msk [vmem:[%s3104_s1 + $0x51] sm:$0x1] %vm33_vm1, %v620_v39  ;;  %v696_v50 = vmax.f32 %v694_v37, %v1488_v25  ;;  %v723_v51 = vmax.f32 %v721_v42, %v1493_v32  ;;  %v722_v53 = vmax.f32 %v1495_v33, %v1496_v38  ;;  %v1504_v10 = vld [vmem:[%s3103_s0 + $0x9d] sm:$0x7]  ;;  %v1507_v16 = vld [vmem:[%s3103_s0 + $0x18d] sm:$0x7] }
  0x77   :  { %v697_v49 = vsel %vm18_vm0, %v695_v41, -inf  ;;  %v643_v54 = vmax.f32 %v641_v34, %v642_v43  ;;  %v670_v56 = vrot.slane %v669_v45, 2  ;;  %v676_v57 = vmax.f32 %v674_v40, %v675_v46  ;;  %v1511_v21 = vld [vmem:[%s3103_s0 + $0x90] sm:$0x7]  ;;  %v1512_v22 = vld [vmem:[%s3103_s0 + $0xa0] sm:$0x7] }
  0x78   :  { %v649_v55 = vrot.slane %v648_v44, 1  ;;  %v698_v60 = vrot.slane %v697_v49, 4  ;;  %v704_v61 = vsel %vm18_vm0, %v696_v50, -inf  ;;  %v725_v62 = vmax.f32 %v723_v51, %v1494_v47  ;;  %v1508_v27 = vld [vmem:[%s3103_s0 + $0x19d] sm:$0x7] }
  0x79   :  { %v724_v63 = vmax.f32 %v722_v53, %v1497_v48  ;;  %1469 = vst.msk [vmem:[%s3104_s1 + $0x1a] sm:$0x1] %vm33_vm1, %v643_v54  ;;  %v671_v3 = vmax.f32 %v669_v45, %v670_v56  ;;  %v677_v4 = vrot.slane %v676_v57, 2  ;;  %v705_v5 = vrot.slane %v704_v61, 4  ;;  %v1513_v32 = vld [vmem:[%s3103_s0 + $0xb0] sm:$0x7] }
  0x7a   :  { %v650_v2 = vmax.f32 %v648_v44, %v649_v55  ;;  %v699_v7 = vmax.f32 %v697_v49, %v698_v60  ;;  %v727_v8 = vsel %vm18_vm0, %v725_v62, -inf  ;;  %v751_v11 = vmax.f32 %v1501_v58, %v1502_v59  ;;  %v1514_v33 = vld [vmem:[%s3103_s0 + $0x190] sm:$0x7]  ;;  %v1515_v38 = vld [vmem:[%s3103_s0 + $0x1a0] sm:$0x7] }
  0x7b   :  { %v726_v9 = vmax.f32 %v724_v63, %v1498_v52  ;;  %v672_v12 = vrot.slane %v671_v3, 1  ;;  %v678_v13 = vmax.f32 %v676_v57, %v677_v4  ;;  %v706_v14 = vmax.f32 %v704_v61, %v705_v5  ;;  %v1516_v43 = vld [vmem:[%s3103_s0 + $0x1b0] sm:$0x7]  ;;  %v1520_v49 = vld [vmem:[%s3103_s0 + $0xa2] sm:$0x7] }
  0x7c   :  { %1470 = vst.msk [vmem:[%s3104_s1 + $0x52] sm:$0x1] %vm33_vm1, %v650_v2  ;;  %v728_v15 = vrot.slane %v727_v8, 4  ;;  %v700_v17 = vrot.slane %v699_v7, 2  ;;  %v753_v19 = vmax.f32 %v751_v11, %v1503_v0  ;;  %v752_v20 = vmax.f32 %v1505_v1, %v1506_v6  ;;  %v1519_v44 = vld [vmem:[%s3103_s0 + $0x92] sm:$0x7] }
  0x7d   :  { %v734_v18 = vsel %vm18_vm0, %v726_v9, -inf  ;;  %v673_v23 = vmax.f32 %v671_v3, %v672_v12  ;;  %v679_v24 = vrot.slane %v678_v13, 1  ;;  %v707_v25 = vrot.slane %v706_v14, 2  ;;  %v1521_v54 = vld [vmem:[%s3103_s0 + $0xb2] sm:$0x7] }
  0x7e   :  { %v729_v26 = vmax.f32 %v727_v8, %v728_v15  ;;  %v701_v28 = vmax.f32 %v699_v7, %v700_v17  ;;  %v735_v29 = vrot.slane %v734_v18, 4  ;;  %v755_v30 = vmax.f32 %v753_v19, %v1504_v10  ;;  %v1522_v55 = vld [vmem:[%s3103_s0 + $0x192] sm:$0x7]  ;;  %v1523_v60 = vld [vmem:[%s3103_s0 + $0x1a2] sm:$0x7] }
  0x7f   :  { %v754_v31 = vmax.f32 %v752_v20, %v1507_v16  ;;  %1479 = vst.msk [vmem:[%s3104_s1 + $0x1b] sm:$0x1] %vm33_vm1, %v673_v23  ;;  %v680_v34 = vmax.f32 %v678_v13, %v679_v24  ;;  %v708_v35 = vmax.f32 %v706_v14, %v707_v25  ;;  %v780_v37 = vmax.f32 %v1511_v21, %v1512_v22  ;;  %v1524_v61 = vld [vmem:[%s3103_s0 + $0x1b2] sm:$0x7]  ;;  %v1528_v7 = vld [vmem:[%s3103_s0 + $0xa4] sm:$0x7] }
  0x80   :  { %v730_v36 = vrot.slane %v729_v26, 2  ;;  %v702_v39 = vrot.slane %v701_v28, 1  ;;  %v736_v40 = vmax.f32 %v734_v18, %v735_v29  ;;  %v757_v41 = vsel %vm18_vm0, %v755_v30, -inf  ;;  %v1527_v2 = vld [vmem:[%s3103_s0 + $0x94] sm:$0x7] }
  0x81   :  { %v756_v42 = vmax.f32 %v754_v31, %v1508_v27  ;;  %1480 = vst.msk [vmem:[%s3104_s1 + $0x53] sm:$0x1] %vm33_vm1, %v680_v34  ;;  %v709_v45 = vrot.slane %v708_v35, 1  ;;  %v758_v47 = vrot.slane %v757_v41, 4  ;;  %v782_v48 = vmax.f32 %v780_v37, %v1513_v32  ;;  %v1529_v12 = vld [vmem:[%s3103_s0 + $0xb4] sm:$0x7] }
  0x82   :  { %v731_v46 = vmax.f32 %v729_v26, %v730_v36  ;;  %v703_v50 = vmax.f32 %v701_v28, %v702_v39  ;;  %v737_v51 = vrot.slane %v736_v40, 2  ;;  %v781_v53 = vmax.f32 %v1514_v33, %v1515_v38  ;;  %v1530_v13 = vld [vmem:[%s3103_s0 + $0x194] sm:$0x7]  ;;  %v1531_v18 = vld [vmem:[%s3103_s0 + $0x1a4] sm:$0x7] }
  0x83   :  { %v764_v52 = vsel %vm18_vm0, %v756_v42, -inf  ;;  %v710_v56 = vmax.f32 %v708_v35, %v709_v45  ;;  %v759_v58 = vmax.f32 %v757_v41, %v758_v47  ;;  %v784_v63 = vsel %vm18_vm0, %v782_v48, -inf  ;;  %v1532_v27 = vld [vmem:[%s3103_s0 + $0x1b4] sm:$0x7]  ;;  %v1536_v37 = vld [vmem:[%s3103_s0 + $0xa6] sm:$0xf] }
  0x84   :  { %v732_v57 = vrot.slane %v731_v46, 1  ;;  %v765_v59 = vrot.slane %v764_v52, 4  ;;  %1489 = vst.msk [vmem:[%s3104_s1 + $0x1c] sm:$0x1] %vm33_vm1, %v703_v50  ;;  %v738_v62 = vmax.f32 %v736_v40, %v737_v51  ;;  %v783_v0 = vmax.f32 %v781_v53, %v1516_v43  ;;  %v1535_v36 = vld [vmem:[%s3103_s0 + $0x96] sm:$0xf] }
  0x85   :  { %v807_v1 = vmax.f32 %v1519_v44, %v1520_v49  ;;  %1490 = vst.msk [vmem:[%s3104_s1 + $0x54] sm:$0x1] %vm33_vm1, %v710_v56  ;;  %v760_v4 = vrot.slane %v759_v58, 2  ;;  %v785_v6 = vrot.slane %v784_v63, 4  ;;  %v808_v11 = vmax.f32 %v1522_v55, %v1523_v60  ;;  %v1537_v42 = vld [vmem:[%s3103_s0 + $0xb6] sm:$0xf] }
  0x86   :  { %v733_v3 = vmax.f32 %v731_v46, %v732_v57  ;;  %v766_v5 = vmax.f32 %v764_v52, %v765_v59  ;;  %v739_v8 = vrot.slane %v738_v62, 1  ;;  %v791_v9 = vsel %vm18_vm0, %v783_v0, -inf  ;;  %v1538_v43 = vld [vmem:[%s3103_s0 + $0x196] sm:$0xf]  ;;  %v1539_v48 = vld [vmem:[%s3103_s0 + $0x1a6] sm:$0xf] }
  0x87   :  { %v809_v10 = vmax.f32 %v807_v1, %v1521_v54  ;;  %v761_v14 = vmax.f32 %v759_v58, %v760_v4  ;;  %v786_v16 = vmax.f32 %v784_v63, %v785_v6  ;;  %v792_v17 = vrot.slane %v791_v9, 4  ;;  %v1543_v53 = vld [vmem:[%s3103_s0 + $0x99] sm:$0x7]  ;;  %v1544_v54 = vld [vmem:[%s3103_s0 + $0xa9] sm:$0x7] }
  0x88   :  { %1499 = vst.msk [vmem:[%s3104_s1 + $0x1d] sm:$0x1] %vm33_vm1, %v733_v3  ;;  %v767_v15 = vrot.slane %v766_v5, 2  ;;  %v740_v19 = vmax.f32 %v738_v62, %v739_v8  ;;  %v810_v21 = vmax.f32 %v808_v11, %v1524_v61  ;;  %v833_v22 = vmax.f32 %v1527_v2, %v1528_v7  ;;  %v1540_v59 = vld [vmem:[%s3103_s0 + $0x1b6] sm:$0xf] }
  0x89   :  { %v811_v20 = vsel %vm18_vm0, %v809_v10, -inf  ;;  %v762_v23 = vrot.slane %v761_v14, 1  ;;  %v787_v25 = vrot.slane %v786_v16, 2  ;;  %v793_v26 = vmax.f32 %v791_v9, %v792_v17  ;;  %v1545_v0 = vld [vmem:[%s3103_s0 + $0xb9] sm:$0x7] }
  0x8a   :  { %v768_v24 = vmax.f32 %v766_v5, %v767_v15  ;;  %1500 = vst.msk [vmem:[%s3104_s1 + $0x55] sm:$0x1] %vm33_vm1, %v740_v19  ;;  %v812_v28 = vrot.slane %v811_v20, 4  ;;  %v818_v29 = vsel %vm18_vm0, %v810_v21, -inf  ;;  %v835_v30 = vmax.f32 %v833_v22, %v1529_v12  ;;  %v1546_v1 = vld [vmem:[%s3103_s0 + $0x199] sm:$0x7] }
  0x8b   :  { %v834_v31 = vmax.f32 %v1530_v13, %v1531_v18  ;;  %v763_v32 = vmax.f32 %v761_v14, %v762_v23  ;;  %v788_v34 = vmax.f32 %v786_v16, %v787_v25  ;;  %v794_v35 = vrot.slane %v793_v26, 2  ;;  %v1547_v6 = vld [vmem:[%s3103_s0 + $0x1a9] sm:$0x7]  ;;  %v1548_v11 = vld [vmem:[%s3103_s0 + $0x1b9] sm:$0x7] }
  0x8c   :  { %v769_v33 = vrot.slane %v768_v24, 1  ;;  %v813_v38 = vmax.f32 %v811_v20, %v812_v28  ;;  %v819_v39 = vrot.slane %v818_v29, 4  ;;  %v837_v40 = vsel %vm18_vm0, %v835_v30, -inf  ;;  %v1551_v12 = vld [vmem:[%s3103_s0 + $0x9b] sm:$0x7] }
  0x8d   :  { %v836_v41 = vmax.f32 %v834_v31, %v1532_v27  ;;  %1509 = vst.msk [vmem:[%s3104_s1 + $0x1e] sm:$0x1] %vm33_vm1, %v763_v32  ;;  %v789_v45 = vrot.slane %v788_v34, 1  ;;  %v795_v46 = vmax.f32 %v793_v26, %v794_v35  ;;  %v838_v47 = vrot.slane %v837_v40, 4  ;;  %v1552_v17 = vld [vmem:[%s3103_s0 + $0xab] sm:$0x7] }
  0x8e   :  { %v770_v44 = vmax.f32 %v768_v24, %v769_v33  ;;  %v814_v49 = vrot.slane %v813_v38, 2  ;;  %v820_v50 = vmax.f32 %v818_v29, %v819_v39  ;;  %v859_v52 = vmax.f32 %v1535_v36, %v1536_v37  ;;  %v1553_v22 = vld [vmem:[%s3103_s0 + $0xbb] sm:$0x7]  ;;  %v1555_v28 = vld [vmem:[%s3103_s0 + $0x1ab] sm:$0x7] }
  0x8f   :  { %v844_v51 = vsel %vm18_vm0, %v836_v41, -inf  ;;  %v790_v55 = vmax.f32 %v788_v34, %v789_v45  ;;  %v796_v56 = vrot.slane %v795_v46, 1  ;;  %v839_v57 = vmax.f32 %v837_v40, %v838_v47  ;;  %v1554_v23 = vld [vmem:[%s3103_s0 + $0x19b] sm:$0x7]  ;;  %v1560_v39 = vld [vmem:[%s3103_s0 + $0xad] sm:$0x7] }
  0x90   :  { %1510 = vst.msk [vmem:[%s3104_s1 + $0x56] sm:$0x1] %vm33_vm1, %v770_v44  ;;  %v845_v58 = vrot.slane %v844_v51, 4  ;;  %v815_v60 = vmax.f32 %v813_v38, %v814_v49  ;;  %v821_v61 = vrot.slane %v820_v50, 2  ;;  %v861_v62 = vmax.f32 %v859_v52, %v1537_v42  ;;  %v1556_v29 = vld [vmem:[%s3103_s0 + $0x1bb] sm:$0x7] }
  0x91   :  { %v860_v63 = vmax.f32 %v1538_v43, %v1539_v48  ;;  %1517 = vst.msk [vmem:[%s3104_s1 + $0x20] sm:$0x1] %vm33_vm1, %v790_v55  ;;  %v797_v2 = vmax.f32 %v795_v46, %v796_v56  ;;  %v840_v3 = vrot.slane %v839_v57, 2  ;;  %v885_v5 = vmax.f32 %v1543_v53, %v1544_v54  ;;  %v1559_v34 = vld [vmem:[%s3103_s0 + $0x9d] sm:$0x7] }
  0x92   :  { %v846_v4 = vmax.f32 %v844_v51, %v845_v58  ;;  %v816_v7 = vrot.slane %v815_v60, 1  ;;  %v822_v8 = vmax.f32 %v820_v50, %v821_v61  ;;  %v863_v9 = vsel %vm98_vm2, %v861_v62, -inf  ;;  %v1561_v40 = vld [vmem:[%s3103_s0 + $0xbd] sm:$0x7]  ;;  %v1563_v50 = vld [vmem:[%s3103_s0 + $0x1ad] sm:$0x7] }
  0x93   :  { %v862_v10 = vmax.f32 %v860_v63, %v1540_v59  ;;  %1518 = vst.msk [vmem:[%s3104_s1 + $0x58] sm:$0x1] %vm33_vm1, %v797_v2  ;;  %v841_v13 = vmax.f32 %v839_v57, %v840_v3  ;;  %v864_v15 = vrot.slane %v863_v9, 4  ;;  %v887_v16 = vmax.f32 %v885_v5, %v1545_v0  ;;  %v1562_v45 = vld [vmem:[%s3103_s0 + $0x19d] sm:$0x7] }
  0x94   :  { %v847_v14 = vrot.slane %v846_v4, 2  ;;  %v817_v18 = vmax.f32 %v815_v60, %v816_v7  ;;  %v823_v19 = vrot.slane %v822_v8, 1  ;;  %v886_v21 = vmax.f32 %v1546_v1, %v1547_v6  ;;  %v1564_v59 = vld [vmem:[%s3103_s0 + $0x1bd] sm:$0x7]  ;;  %v1568_v5 = vld [vmem:[%s3103_s0 + $0xc0] sm:$0x7] }
  0x95   :  { %v870_v20 = vsel %vm98_vm2, %v862_v10, -inf  ;;  %v842_v24 = vrot.slane %v841_v13, 1  ;;  %v865_v26 = vmax.f32 %v863_v9, %v864_v15  ;;  %v889_v31 = vsel %vm18_vm0, %v887_v16, -inf  ;;  %v1569_v10 = vld [vmem:[%s3103_s0 + $0xd0] sm:$0x7] }
  0x96   :  { %v848_v25 = vmax.f32 %v846_v4, %v847_v14  ;;  %v871_v27 = vrot.slane %v870_v20, 4  ;;  %1525 = vst.msk [vmem:[%s3104_s1 + $0x21] sm:$0x1] %vm33_vm1, %v817_v18  ;;  %v824_v30 = vmax.f32 %v822_v8, %v823_v19  ;;  %v888_v32 = vmax.f32 %v886_v21, %v1548_v11  ;;  %v1567_v4 = vld [vmem:[%s3103_s0 + $0xb0] sm:$0x7] }
  0x97   :  { %v911_v33 = vmax.f32 %v1551_v12, %v1552_v17  ;;  %v843_v35 = vmax.f32 %v841_v13, %v842_v24  ;;  %v866_v37 = vrot.slane %v865_v26, 2  ;;  %v890_v41 = vrot.slane %v889_v31, 4  ;;  %v1570_v11 = vld [vmem:[%s3103_s0 + $0x1b0] sm:$0x7]  ;;  %v1571_v16 = vld [vmem:[%s3103_s0 + $0x1c0] sm:$0x7] }
  0x98   :  { %v849_v36 = vrot.slane %v848_v25, 1  ;;  %v872_v38 = vmax.f32 %v870_v20, %v871_v27  ;;  %1526 = vst.msk [vmem:[%s3104_s1 + $0x59] sm:$0x1] %vm33_vm1, %v824_v30  ;;  %v896_v42 = vsel %vm18_vm0, %v888_v32, -inf  ;;  %v912_v44 = vmax.f32 %v1554_v23, %v1555_v28  ;;  %v1572_v21 = vld [vmem:[%s3103_s0 + $0x1d0] sm:$0x7] }
  0x99   :  { %v913_v43 = vmax.f32 %v911_v33, %v1553_v22  ;;  %1533 = vst.msk [vmem:[%s3104_s1 + $0x22] sm:$0x1] %vm33_vm1, %v843_v35  ;;  %v867_v47 = vmax.f32 %v865_v26, %v866_v37  ;;  %v897_v49 = vrot.slane %v896_v42, 4  ;;  %v891_v51 = vmax.f32 %v889_v31, %v890_v41  ;;  %v1575_v22 = vld [vmem:[%s3103_s0 + $0xb2] sm:$0x7] }
  0x9a   :  { %v850_v46 = vmax.f32 %v848_v25, %v849_v36  ;;  %v873_v48 = vrot.slane %v872_v38, 2  ;;  %v914_v53 = vmax.f32 %v912_v44, %v1556_v29  ;;  %v937_v54 = vmax.f32 %v1559_v34, %v1560_v39  ;;  %v1576_v27 = vld [vmem:[%s3103_s0 + $0xc2] sm:$0x7]  ;;  %v1577_v32 = vld [vmem:[%s3103_s0 + $0xd2] sm:$0x7] }
  0x9b   :  { %v915_v52 = vsel %vm18_vm0, %v913_v43, -inf  ;;  %v868_v55 = vrot.slane %v867_v47, 1  ;;  %v898_v57 = vmax.f32 %v896_v42, %v897_v49  ;;  %v892_v60 = vrot.slane %v891_v51, 2  ;;  %v1578_v33 = vld [vmem:[%s3103_s0 + $0x1b2] sm:$0x7] }
  0x9c   :  { %1534 = vst.msk [vmem:[%s3104_s1 + $0x5a] sm:$0x1] %vm33_vm1, %v850_v46  ;;  %v874_v56 = vmax.f32 %v872_v38, %v873_v48  ;;  %v916_v58 = vrot.slane %v915_v52, 4  ;;  %v922_v61 = vsel %vm18_vm0, %v914_v53, -inf  ;;  %v939_v62 = vmax.f32 %v937_v54, %v1561_v40  ;;  %v1579_v38 = vld [vmem:[%s3103_s0 + $0x1c2] sm:$0x7] }
  0x9d   :  { %v938_v63 = vmax.f32 %v1562_v45, %v1563_v50  ;;  %v869_v0 = vmax.f32 %v867_v47, %v868_v55  ;;  %v899_v2 = vrot.slane %v898_v57, 2  ;;  %v893_v6 = vmax.f32 %v891_v51, %v892_v60  ;;  %v1580_v39 = vld [vmem:[%s3103_s0 + $0x1d2] sm:$0x7]  ;;  %v1584_v49 = vld [vmem:[%s3103_s0 + $0xc4] sm:$0x7] }
  0x9e   :  { %v875_v1 = vrot.slane %v874_v56, 1  ;;  %v917_v3 = vmax.f32 %v915_v52, %v916_v58  ;;  %v923_v7 = vrot.slane %v922_v61, 4  ;;  %v941_v8 = vsel %vm18_vm0, %v939_v62, -inf  ;;  %v1583_v44 = vld [vmem:[%s3103_s0 + $0xb4] sm:$0x7] }
  0x9f   :  { %v940_v9 = vmax.f32 %v938_v63, %v1564_v59  ;;  %1541 = vst.msk [vmem:[%s3104_s1 + $0x23] sm:$0x1] %vm33_vm1, %v869_v0  ;;  %v900_v13 = vmax.f32 %v898_v57, %v899_v2  ;;  %v942_v15 = vrot.slane %v941_v8, 4  ;;  %v894_v17 = vrot.slane %v893_v6, 1  ;;  %v1585_v54 = vld [vmem:[%s3103_s0 + $0xd4] sm:$0x7] }
  0xa0   :  { %v876_v12 = vmax.f32 %v874_v56, %v875_v1  ;;  %v918_v14 = vrot.slane %v917_v3, 2  ;;  %v924_v18 = vmax.f32 %v922_v61, %v923_v7  ;;  %v964_v20 = vmax.f32 %v1567_v4, %v1568_v5  ;;  %v1586_v55 = vld [vmem:[%s3103_s0 + $0x1b4] sm:$0x7]  ;;  %v1587_v60 = vld [vmem:[%s3103_s0 + $0x1c4] sm:$0x7] }
  0xa1   :  { %v948_v19 = vsel %vm18_vm0, %v940_v9, -inf  ;;  %v901_v23 = vrot.slane %v900_v13, 1  ;;  %v943_v25 = vmax.f32 %v941_v8, %v942_v15  ;;  %v895_v28 = vmax.f32 %v893_v6, %v894_v17  ;;  %v1588_v1 = vld [vmem:[%s3103_s0 + $0x1d4] sm:$0x7]  ;;  %v1592_v7 = vld [vmem:[%s3103_s0 + $0xc6] sm:$0xf] }
  0xa2   :  { %1542 = vst.msk [vmem:[%s3104_s1 + $0x5b] sm:$0x1] %vm33_vm1, %v876_v12  ;;  %v919_v24 = vmax.f32 %v917_v3, %v918_v14  ;;  %v949_v26 = vrot.slane %v948_v19, 4  ;;  %v925_v29 = vrot.slane %v924_v18, 2  ;;  %v966_v30 = vmax.f32 %v964_v20, %v1569_v10  ;;  %v1591_v2 = vld [vmem:[%s3103_s0 + $0xb6] sm:$0xf] }
  0xa3   :  { %v965_v31 = vmax.f32 %v1570_v11, %v1571_v16  ;;  %v902_v34 = vmax.f32 %v900_v13, %v901_v23  ;;  %v944_v36 = vrot.slane %v943_v25, 2  ;;  %1549 = vst.msk [vmem:[%s3104_s1 + $0x24] sm:$0x1] %vm33_vm1, %v895_v28  ;;  %v991_v43 = vmax.f32 %v1575_v22, %v1576_v27  ;;  %v1593_v8 = vld [vmem:[%s3103_s0 + $0xd6] sm:$0xf] }
  0xa4   :  { %v920_v35 = vrot.slane %v919_v24, 1  ;;  %v950_v37 = vmax.f32 %v948_v19, %v949_v26  ;;  %v926_v40 = vmax.f32 %v924_v18, %v925_v29  ;;  %v968_v41 = vsel %vm18_vm0, %v966_v30, -inf  ;;  %v1594_v13 = vld [vmem:[%s3103_s0 + $0x1b6] sm:$0xf]  ;;  %v1595_v18 = vld [vmem:[%s3103_s0 + $0x1c6] sm:$0xf] }
  0xa5   :  { %v967_v42 = vmax.f32 %v965_v31, %v1572_v21  ;;  %1550 = vst.msk [vmem:[%s3104_s1 + $0x5c] sm:$0x1] %vm33_vm1, %v902_v34  ;;  %v945_v46 = vmax.f32 %v943_v25, %v944_v36  ;;  %v969_v48 = vrot.slane %v968_v41, 4  ;;  %v993_v52 = vmax.f32 %v991_v43, %v1577_v32  ;;  %v1596_v27 = vld [vmem:[%s3103_s0 + $0x1d6] sm:$0xf] }
  0xa6   :  { %v921_v45 = vmax.f32 %v919_v24, %v920_v35  ;;  %v951_v47 = vrot.slane %v950_v37, 2  ;;  %v927_v50 = vrot.slane %v926_v40, 1  ;;  %v992_v53 = vmax.f32 %v1578_v33, %v1579_v38  ;;  %v1599_v36 = vld [vmem:[%s3103_s0 + $0xb9] sm:$0x7] }
  0xa7   :  { %v975_v51 = vsel %vm18_vm0, %v967_v42, -inf  ;;  %v946_v56 = vrot.slane %v945_v46, 1  ;;  %v970_v58 = vmax.f32 %v968_v41, %v969_v48  ;;  %v995_v62 = vsel %vm18_vm0, %v993_v52, -inf  ;;  %v1601_v42 = vld [vmem:[%s3103_s0 + $0xd9] sm:$0x7] }
  0xa8   :  { %1557 = vst.msk [vmem:[%s3104_s1 + $0x25] sm:$0x1] %vm33_vm1, %v921_v45  ;;  %v952_v57 = vmax.f32 %v950_v37, %v951_v47  ;;  %v976_v59 = vrot.slane %v975_v51, 4  ;;  %v928_v61 = vmax.f32 %v926_v40, %v927_v50  ;;  %v994_v63 = vmax.f32 %v992_v53, %v1580_v39  ;;  %v1600_v37 = vld [vmem:[%s3103_s0 + $0xc9] sm:$0x7] }
  0xa9   :  { %v1017_v0 = vmax.f32 %v1583_v44, %v1584_v49  ;;  %v947_v3 = vmax.f32 %v945_v46, %v946_v56  ;;  %v971_v5 = vrot.slane %v970_v58, 2  ;;  %v996_v9 = vrot.slane %v995_v62, 4  ;;  %v1602_v43 = vld [vmem:[%s3103_s0 + $0x1b9] sm:$0x7]  ;;  %v1603_v48 = vld [vmem:[%s3103_s0 + $0x1c9] sm:$0x7] }
  0xaa   :  { %v953_v4 = vrot.slane %v952_v57, 1  ;;  %v977_v6 = vmax.f32 %v975_v51, %v976_v59  ;;  %1558 = vst.msk [vmem:[%s3104_s1 + $0x5d] sm:$0x1] %vm33_vm1, %v928_v61  ;;  %v1002_v10 = vsel %vm18_vm0, %v994_v63, -inf  ;;  %v1018_v12 = vmax.f32 %v1586_v55, %v1587_v60  ;;  %v1604_v53 = vld [vmem:[%s3103_s0 + $0x1d9] sm:$0x7] }
  0xab   :  { %v1019_v11 = vmax.f32 %v1017_v0, %v1585_v54  ;;  %1565 = vst.msk [vmem:[%s3104_s1 + $0x26] sm:$0x1] %vm33_vm1, %v947_v3  ;;  %v972_v15 = vmax.f32 %v970_v58, %v971_v5  ;;  %v1003_v17 = vrot.slane %v1002_v10, 4  ;;  %v997_v19 = vmax.f32 %v995_v62, %v996_v9  ;;  %v1607_v54 = vld [vmem:[%s3103_s0 + $0xbb] sm:$0x7] }
  0xac   :  { %v954_v14 = vmax.f32 %v952_v57, %v953_v4  ;;  %v978_v16 = vrot.slane %v977_v6, 2  ;;  %v1020_v21 = vmax.f32 %v1018_v12, %v1588_v1  ;;  %v1043_v22 = vmax.f32 %v1591_v2, %v1592_v7  ;;  %v1608_v59 = vld [vmem:[%s3103_s0 + $0xcb] sm:$0x7]  ;;  %v1609_v0 = vld [vmem:[%s3103_s0 + $0xdb] sm:$0x7] }
  0xad   :  { %v1021_v20 = vsel %vm18_vm0, %v1019_v11, -inf  ;;  %v973_v23 = vrot.slane %v972_v15, 1  ;;  %v1004_v25 = vmax.f32 %v1002_v10, %v1003_v17  ;;  %v998_v28 = vrot.slane %v997_v19, 2  ;;  %v1610_v1 = vld [vmem:[%s3103_s0 + $0x1bb] sm:$0x7] }
  0xae   :  { %1566 = vst.msk [vmem:[%s3104_s1 + $0x5e] sm:$0x1] %vm33_vm1, %v954_v14  ;;  %v979_v24 = vmax.f32 %v977_v6, %v978_v16  ;;  %v1022_v26 = vrot.slane %v1021_v20, 4  ;;  %v1028_v29 = vsel %vm18_vm0, %v1020_v21, -inf  ;;  %v1045_v30 = vmax.f32 %v1043_v22, %v1593_v8  ;;  %v1611_v6 = vld [vmem:[%s3103_s0 + $0x1cb] sm:$0x7] }
  0xaf   :  { %v1044_v31 = vmax.f32 %v1594_v13, %v1595_v18  ;;  %v974_v32 = vmax.f32 %v972_v15, %v973_v23  ;;  %v1005_v34 = vrot.slane %v1004_v25, 2  ;;  %v999_v38 = vmax.f32 %v997_v19, %v998_v28  ;;  %v1612_v7 = vld [vmem:[%s3103_s0 + $0x1db] sm:$0x7]  ;;  %v1616_v17 = vld [vmem:[%s3103_s0 + $0xcd] sm:$0x7] }
  0xb0   :  { %v980_v33 = vrot.slane %v979_v24, 1  ;;  %v1023_v35 = vmax.f32 %v1021_v20, %v1022_v26  ;;  %v1029_v39 = vrot.slane %v1028_v29, 4  ;;  %v1047_v40 = vsel %vm98_vm2, %v1045_v30, -inf  ;;  %v1615_v12 = vld [vmem:[%s3103_s0 + $0xbd] sm:$0x7] }
  0xb1   :  { %v1046_v41 = vmax.f32 %v1044_v31, %v1596_v27  ;;  %1573 = vst.msk [vmem:[%s3104_s1 + $0x28] sm:$0x1] %vm33_vm1, %v974_v32  ;;  %v1006_v45 = vmax.f32 %v1004_v25, %v1005_v34  ;;  %v1048_v47 = vrot.slane %v1047_v40, 4  ;;  %v1000_v49 = vrot.slane %v999_v38, 1  ;;  %v1617_v22 = vld [vmem:[%s3103_s0 + $0xdd] sm:$0x7] }
  0xb2   :  { %v981_v44 = vmax.f32 %v979_v24, %v980_v33  ;;  %v1024_v46 = vrot.slane %v1023_v35, 2  ;;  %v1030_v50 = vmax.f32 %v1028_v29, %v1029_v39  ;;  %v1069_v52 = vmax.f32 %v1599_v36, %v1600_v37  ;;  %v1618_v23 = vld [vmem:[%s3103_s0 + $0x1bd] sm:$0x7]  ;;  %v1619_v28 = vld [vmem:[%s3103_s0 + $0x1cd] sm:$0x7] }
  0xb3   :  { %v1054_v51 = vsel %vm98_vm2, %v1046_v41, -inf  ;;  %v1007_v55 = vrot.slane %v1006_v45, 1  ;;  %v1049_v57 = vmax.f32 %v1047_v40, %v1048_v47  ;;  %v1001_v60 = vmax.f32 %v999_v38, %v1000_v49  ;;  %v1620_v33 = vld [vmem:[%s3103_s0 + $0x1dd] sm:$0x7]  ;;  %v1623_v34 = vld [vmem:[%s3103_s0 + $0xd0] sm:$0x7] }
  0xb4   :  { %1574 = vst.msk [vmem:[%s3104_s1 + $0x60] sm:$0x1] %vm33_vm1, %v981_v44  ;;  %v1025_v56 = vmax.f32 %v1023_v35, %v1024_v46  ;;  %v1055_v58 = vrot.slane %v1054_v51, 4  ;;  %v1031_v61 = vrot.slane %v1030_v50, 2  ;;  %v1071_v62 = vmax.f32 %v1069_v52, %v1601_v42  ;;  %v1624_v39 = vld [vmem:[%s3103_s0 + $0xe0] sm:$0x7] }
  0xb5   :  { %v1070_v63 = vmax.f32 %v1602_v43, %v1603_v48  ;;  %v1008_v2 = vmax.f32 %v1006_v45, %v1007_v55  ;;  %v1050_v4 = vrot.slane %v1049_v57, 2  ;;  %1581 = vst.msk [vmem:[%s3104_s1 + $0x29] sm:$0x1] %vm33_vm1, %v1001_v60  ;;  %v1095_v11 = vmax.f32 %v1607_v54, %v1608_v59  ;;  %v1625_v40 = vld [vmem:[%s3103_s0 + $0xf0] sm:$0x7] }
  0xb6   :  { %v1026_v3 = vrot.slane %v1025_v56, 1  ;;  %v1056_v5 = vmax.f32 %v1054_v51, %v1055_v58  ;;  %v1032_v8 = vmax.f32 %v1030_v50, %v1031_v61  ;;  %v1073_v9 = vsel %vm18_vm0, %v1071_v62, -inf  ;;  %v1626_v45 = vld [vmem:[%s3103_s0 + $0x1d0] sm:$0x7]  ;;  %v1627_v50 = vld [vmem:[%s3103_s0 + $0x1e0] sm:$0x7] }
  0xb7   :  { %v1072_v10 = vmax.f32 %v1070_v63, %v1604_v53  ;;  %1582 = vst.msk [vmem:[%s3104_s1 + $0x61] sm:$0x1] %vm33_vm1, %v1008_v2  ;;  %v1051_v14 = vmax.f32 %v1049_v57, %v1050_v4  ;;  %v1074_v16 = vrot.slane %v1073_v9, 4  ;;  %v1097_v20 = vmax.f32 %v1095_v11, %v1609_v0  ;;  %v1628_v59 = vld [vmem:[%s3103_s0 + $0x1f0] sm:$0x7] }
  0xb8   :  { %v1027_v13 = vmax.f32 %v1025_v56, %v1026_v3  ;;  %v1057_v15 = vrot.slane %v1056_v5, 2  ;;  %v1033_v18 = vrot.slane %v1032_v8, 1  ;;  %v1096_v21 = vmax.f32 %v1610_v1, %v1611_v6  ;;  %v1631_v4 = vld [vmem:[%s3103_s0 + $0xd2] sm:$0x7] }
  0xb9   :  { %v1080_v19 = vsel %vm18_vm0, %v1072_v10, -inf  ;;  %v1052_v24 = vrot.slane %v1051_v14, 1  ;;  %v1075_v26 = vmax.f32 %v1073_v9, %v1074_v16  ;;  %v1099_v30 = vsel %vm18_vm0, %v1097_v20, -inf  ;;  %v1633_v10 = vld [vmem:[%s3103_s0 + $0xf2] sm:$0x7] }
  0xba   :  { %1589 = vst.msk [vmem:[%s3104_s1 + $0x2a] sm:$0x1] %vm33_vm1, %v1027_v13  ;;  %v1058_v25 = vmax.f32 %v1056_v5, %v1057_v15  ;;  %v1081_v27 = vrot.slane %v1080_v19, 4  ;;  %v1034_v29 = vmax.f32 %v1032_v8, %v1033_v18  ;;  %v1098_v31 = vmax.f32 %v1096_v21, %v1612_v7  ;;  %v1632_v5 = vld [vmem:[%s3103_s0 + $0xe2] sm:$0x7] }
  0xbb   :  { %v1121_v32 = vmax.f32 %v1615_v12, %v1616_v17  ;;  %v1053_v35 = vmax.f32 %v1051_v14, %v1052_v24  ;;  %v1076_v37 = vrot.slane %v1075_v26, 2  ;;  %v1100_v41 = vrot.slane %v1099_v30, 4  ;;  %v1634_v11 = vld [vmem:[%s3103_s0 + $0x1d2] sm:$0x7]  ;;  %v1635_v16 = vld [vmem:[%s3103_s0 + $0x1e2] sm:$0x7] }
  0xbc   :  { %v1059_v36 = vrot.slane %v1058_v25, 1  ;;  %v1082_v38 = vmax.f32 %v1080_v19, %v1081_v27  ;;  %1590 = vst.msk [vmem:[%s3104_s1 + $0x62] sm:$0x1] %vm33_vm1, %v1034_v29  ;;  %v1106_v42 = vsel %vm18_vm0, %v1098_v31, -inf  ;;  %v1122_v44 = vmax.f32 %v1618_v23, %v1619_v28  ;;  %v1636_v21 = vld [vmem:[%s3103_s0 + $0x1f2] sm:$0x7] }
  0xbd   :  { %v1123_v43 = vmax.f32 %v1121_v32, %v1617_v22  ;;  %1597 = vst.msk [vmem:[%s3104_s1 + $0x2b] sm:$0x1] %vm33_vm1, %v1053_v35  ;;  %v1077_v47 = vmax.f32 %v1075_v26, %v1076_v37  ;;  %v1107_v49 = vrot.slane %v1106_v42, 4  ;;  %v1101_v51 = vmax.f32 %v1099_v30, %v1100_v41  ;;  %v1639_v22 = vld [vmem:[%s3103_s0 + $0xd4] sm:$0x7] }
  0xbe   :  { %v1060_v46 = vmax.f32 %v1058_v25, %v1059_v36  ;;  %v1083_v48 = vrot.slane %v1082_v38, 2  ;;  %v1124_v53 = vmax.f32 %v1122_v44, %v1620_v33  ;;  %v1148_v54 = vmax.f32 %v1623_v34, %v1624_v39  ;;  %v1640_v27 = vld [vmem:[%s3103_s0 + $0xe4] sm:$0x7]  ;;  %v1641_v32 = vld [vmem:[%s3103_s0 + $0xf4] sm:$0x7] }
  0xbf   :  { %v1125_v52 = vsel %vm18_vm0, %v1123_v43, -inf  ;;  %v1078_v55 = vrot.slane %v1077_v47, 1  ;;  %v1108_v57 = vmax.f32 %v1106_v42, %v1107_v49  ;;  %v1102_v60 = vrot.slane %v1101_v51, 2  ;;  %v1642_v33 = vld [vmem:[%s3103_s0 + $0x1d4] sm:$0x7] }
  0xc0   :  { %1598 = vst.msk [vmem:[%s3104_s1 + $0x63] sm:$0x1] %vm33_vm1, %v1060_v46  ;;  %v1084_v56 = vmax.f32 %v1082_v38, %v1083_v48  ;;  %v1126_v58 = vrot.slane %v1125_v52, 4  ;;  %v1132_v61 = vsel %vm18_vm0, %v1124_v53, -inf  ;;  %v1150_v62 = vmax.f32 %v1148_v54, %v1625_v40  ;;  %v1643_v38 = vld [vmem:[%s3103_s0 + $0x1e4] sm:$0x7] }
  0xc1   :  { %v1149_v63 = vmax.f32 %v1626_v45, %v1627_v50  ;;  %v1079_v0 = vmax.f32 %v1077_v47, %v1078_v55  ;;  %v1109_v2 = vrot.slane %v1108_v57, 2  ;;  %v1103_v6 = vmax.f32 %v1101_v51, %v1102_v60  ;;  %v1644_v39 = vld [vmem:[%s3103_s0 + $0x1f4] sm:$0x7]  ;;  %v1648_v49 = vld [vmem:[%s3103_s0 + $0xe6] sm:$0xf] }
  0xc2   :  { %v1085_v1 = vrot.slane %v1084_v56, 1  ;;  %v1127_v3 = vmax.f32 %v1125_v52, %v1126_v58  ;;  %v1133_v7 = vrot.slane %v1132_v61, 4  ;;  %v1152_v8 = vsel %vm18_vm0, %v1150_v62, -inf  ;;  %v1647_v44 = vld [vmem:[%s3103_s0 + $0xd6] sm:$0xf] }
  0xc3   :  { %v1151_v9 = vmax.f32 %v1149_v63, %v1628_v59  ;;  %1605 = vst.msk [vmem:[%s3104_s1 + $0x2c] sm:$0x1] %vm33_vm1, %v1079_v0  ;;  %v1110_v13 = vmax.f32 %v1108_v57, %v1109_v2  ;;  %v1153_v15 = vrot.slane %v1152_v8, 4  ;;  %v1104_v17 = vrot.slane %v1103_v6, 1  ;;  %v1649_v54 = vld [vmem:[%s3103_s0 + $0xf6] sm:$0xf] }
  0xc4   :  { %v1086_v12 = vmax.f32 %v1084_v56, %v1085_v1  ;;  %v1128_v14 = vrot.slane %v1127_v3, 2  ;;  %v1134_v18 = vmax.f32 %v1132_v61, %v1133_v7  ;;  %v1175_v20 = vmax.f32 %v1631_v4, %v1632_v5  ;;  %v1650_v55 = vld [vmem:[%s3103_s0 + $0x1d6] sm:$0xf]  ;;  %v1651_v60 = vld [vmem:[%s3103_s0 + $0x1e6] sm:$0xf] }
  0xc5   :  { %v1159_v19 = vsel %vm18_vm0, %v1151_v9, -inf  ;;  %v1111_v23 = vrot.slane %v1110_v13, 1  ;;  %v1154_v25 = vmax.f32 %v1152_v8, %v1153_v15  ;;  %v1105_v28 = vmax.f32 %v1103_v6, %v1104_v17  ;;  %v1652_v1 = vld [vmem:[%s3103_s0 + $0x1f6] sm:$0xf]  ;;  %v1656_v7 = vld [vmem:[%s3103_s0 + $0xe9] sm:$0x7] }
  0xc6   :  { %1606 = vst.msk [vmem:[%s3104_s1 + $0x64] sm:$0x1] %vm33_vm1, %v1086_v12  ;;  %v1129_v24 = vmax.f32 %v1127_v3, %v1128_v14  ;;  %v1160_v26 = vrot.slane %v1159_v19, 4  ;;  %v1135_v29 = vrot.slane %v1134_v18, 2  ;;  %v1177_v30 = vmax.f32 %v1175_v20, %v1633_v10  ;;  %v1655_v2 = vld [vmem:[%s3103_s0 + $0xd9] sm:$0x7] }
  0xc7   :  { %v1176_v31 = vmax.f32 %v1634_v11, %v1635_v16  ;;  %v1112_v34 = vmax.f32 %v1110_v13, %v1111_v23  ;;  %v1155_v36 = vrot.slane %v1154_v25, 2  ;;  %1613 = vst.msk [vmem:[%s3104_s1 + $0x2d] sm:$0x1] %vm33_vm1, %v1105_v28  ;;  %v1201_v43 = vmax.f32 %v1639_v22, %v1640_v27  ;;  %v1657_v8 = vld [vmem:[%s3103_s0 + $0xf9] sm:$0x7] }
  0xc8   :  { %v1130_v35 = vrot.slane %v1129_v24, 1  ;;  %v1161_v37 = vmax.f32 %v1159_v19, %v1160_v26  ;;  %v1136_v40 = vmax.f32 %v1134_v18, %v1135_v29  ;;  %v1179_v41 = vsel %vm18_vm0, %v1177_v30, -inf  ;;  %v1658_v13 = vld [vmem:[%s3103_s0 + $0x1d9] sm:$0x7]  ;;  %v1659_v18 = vld [vmem:[%s3103_s0 + $0x1e9] sm:$0x7] }
  0xc9   :  { %v1178_v42 = vmax.f32 %v1176_v31, %v1636_v21  ;;  %1614 = vst.msk [vmem:[%s3104_s1 + $0x65] sm:$0x1] %vm33_vm1, %v1112_v34  ;;  %v1156_v46 = vmax.f32 %v1154_v25, %v1155_v36  ;;  %v1180_v48 = vrot.slane %v1179_v41, 4  ;;  %v1203_v52 = vmax.f32 %v1201_v43, %v1641_v32  ;;  %v1660_v27 = vld [vmem:[%s3103_s0 + $0x1f9] sm:$0x7] }
  0xca   :  { %v1131_v45 = vmax.f32 %v1129_v24, %v1130_v35  ;;  %v1162_v47 = vrot.slane %v1161_v37, 2  ;;  %v1137_v50 = vrot.slane %v1136_v40, 1  ;;  %v1202_v53 = vmax.f32 %v1642_v33, %v1643_v38  ;;  %v1663_v36 = vld [vmem:[%s3103_s0 + $0xdb] sm:$0x7] }
  0xcb   :  { %v1186_v51 = vsel %vm18_vm0, %v1178_v42, -inf  ;;  %v1157_v56 = vrot.slane %v1156_v46, 1  ;;  %v1181_v58 = vmax.f32 %v1179_v41, %v1180_v48  ;;  %v1205_v62 = vsel %vm18_vm0, %v1203_v52, -inf  ;;  %v1665_v42 = vld [vmem:[%s3103_s0 + $0xfb] sm:$0x7] }
  0xcc   :  { %1621 = vst.msk [vmem:[%s3104_s1 + $0x2e] sm:$0x1] %vm33_vm1, %v1131_v45  ;;  %v1163_v57 = vmax.f32 %v1161_v37, %v1162_v47  ;;  %v1187_v59 = vrot.slane %v1186_v51, 4  ;;  %v1138_v61 = vmax.f32 %v1136_v40, %v1137_v50  ;;  %v1204_v63 = vmax.f32 %v1202_v53, %v1644_v39  ;;  %v1664_v37 = vld [vmem:[%s3103_s0 + $0xeb] sm:$0x7] }
  0xcd   :  { %v1227_v0 = vmax.f32 %v1647_v44, %v1648_v49  ;;  %v1158_v3 = vmax.f32 %v1156_v46, %v1157_v56  ;;  %v1182_v5 = vrot.slane %v1181_v58, 2  ;;  %v1206_v9 = vrot.slane %v1205_v62, 4  ;;  %v1666_v43 = vld [vmem:[%s3103_s0 + $0x1db] sm:$0x7]  ;;  %v1667_v48 = vld [vmem:[%s3103_s0 + $0x1eb] sm:$0x7] }
  0xce   :  { %v1164_v4 = vrot.slane %v1163_v57, 1  ;;  %v1188_v6 = vmax.f32 %v1186_v51, %v1187_v59  ;;  %1622 = vst.msk [vmem:[%s3104_s1 + $0x66] sm:$0x1] %vm33_vm1, %v1138_v61  ;;  %v1212_v10 = vsel %vm18_vm0, %v1204_v63, -inf  ;;  %v1228_v12 = vmax.f32 %v1650_v55, %v1651_v60  ;;  %v1668_v53 = vld [vmem:[%s3103_s0 + $0x1fb] sm:$0x7] }
  0xcf   :  { %v1229_v11 = vmax.f32 %v1227_v0, %v1649_v54  ;;  %1629 = vst.msk [vmem:[%s3104_s1 + $0x30] sm:$0x1] %vm33_vm1, %v1158_v3  ;;  %v1183_v15 = vmax.f32 %v1181_v58, %v1182_v5  ;;  %v1213_v17 = vrot.slane %v1212_v10, 4  ;;  %v1207_v19 = vmax.f32 %v1205_v62, %v1206_v9  ;;  %v1671_v54 = vld [vmem:[%s3103_s0 + $0xdd] sm:$0x7] }
  0xd0   :  { %v1165_v14 = vmax.f32 %v1163_v57, %v1164_v4  ;;  %v1189_v16 = vrot.slane %v1188_v6, 2  ;;  %v1230_v21 = vmax.f32 %v1228_v12, %v1652_v1  ;;  %v1253_v22 = vmax.f32 %v1655_v2, %v1656_v7  ;;  %v1672_v59 = vld [vmem:[%s3103_s0 + $0xed] sm:$0x7]  ;;  %v1673_v0 = vld [vmem:[%s3103_s0 + $0xfd] sm:$0x7] }
  0xd1   :  { %v1231_v20 = vsel %vm98_vm2, %v1229_v11, -inf  ;;  %v1184_v23 = vrot.slane %v1183_v15, 1  ;;  %v1214_v25 = vmax.f32 %v1212_v10, %v1213_v17  ;;  %v1208_v28 = vrot.slane %v1207_v19, 2  ;;  %v1674_v5 = vld [vmem:[%s3103_s0 + $0x1dd] sm:$0x7] }
  0xd2   :  { %1630 = vst.msk [vmem:[%s3104_s1 + $0x68] sm:$0x1] %vm33_vm1, %v1165_v14  ;;  %v1190_v24 = vmax.f32 %v1188_v6, %v1189_v16  ;;  %v1232_v26 = vrot.slane %v1231_v20, 4  ;;  %v1238_v29 = vsel %vm98_vm2, %v1230_v21, -inf  ;;  %v1255_v30 = vmax.f32 %v1253_v22, %v1657_v8  ;;  %v1675_v6 = vld [vmem:[%s3103_s0 + $0x1ed] sm:$0x7] }
  0xd3   :  { %v1254_v31 = vmax.f32 %v1658_v13, %v1659_v18  ;;  %v1185_v32 = vmax.f32 %v1183_v15, %v1184_v23  ;;  %v1215_v34 = vrot.slane %v1214_v25, 2  ;;  %v1209_v38 = vmax.f32 %v1207_v19, %v1208_v28  ;;  %v1676_v15 = vld [vmem:[%s3103_s0 + $0x1fd] sm:$0x7] }
  0xd4   :  { %v1191_v33 = vrot.slane %v1190_v24, 1  ;;  %v1233_v35 = vmax.f32 %v1231_v20, %v1232_v26  ;;  %v1239_v39 = vrot.slane %v1238_v29, 4  ;;  %v1257_v40 = vsel %vm18_vm0, %v1255_v30, -inf }
  0xd5   :  { %v1256_v41 = vmax.f32 %v1254_v31, %v1660_v27  ;;  %1637 = vst.msk [vmem:[%s3104_s1 + $0x31] sm:$0x1] %vm33_vm1, %v1185_v32  ;;  %v1216_v45 = vmax.f32 %v1214_v25, %v1215_v34  ;;  %v1258_v47 = vrot.slane %v1257_v40, 4  ;;  %v1210_v49 = vrot.slane %v1209_v38, 1 }
  0xd6   :  { %v1192_v44 = vmax.f32 %v1190_v24, %v1191_v33  ;;  %v1234_v46 = vrot.slane %v1233_v35, 2  ;;  %v1240_v50 = vmax.f32 %v1238_v29, %v1239_v39  ;;  %v1279_v52 = vmax.f32 %v1663_v36, %v1664_v37 }
  0xd7   :  { %v1264_v51 = vsel %vm18_vm0, %v1256_v41, -inf  ;;  %v1217_v55 = vrot.slane %v1216_v45, 1  ;;  %v1259_v57 = vmax.f32 %v1257_v40, %v1258_v47  ;;  %v1211_v60 = vmax.f32 %v1209_v38, %v1210_v49 }
  0xd8   :  { %1638 = vst.msk [vmem:[%s3104_s1 + $0x69] sm:$0x1] %vm33_vm1, %v1192_v44  ;;  %v1235_v56 = vmax.f32 %v1233_v35, %v1234_v46  ;;  %v1265_v58 = vrot.slane %v1264_v51, 4  ;;  %v1241_v61 = vrot.slane %v1240_v50, 2  ;;  %v1281_v62 = vmax.f32 %v1279_v52, %v1665_v42 }
  0xd9   :  { %v1280_v63 = vmax.f32 %v1666_v43, %v1667_v48  ;;  %v1218_v1 = vmax.f32 %v1216_v45, %v1217_v55  ;;  %v1260_v3 = vrot.slane %v1259_v57, 2  ;;  %1645 = vst.msk [vmem:[%s3104_s1 + $0x32] sm:$0x1] %vm33_vm1, %v1211_v60  ;;  %v1305_v10 = vmax.f32 %v1671_v54, %v1672_v59 }
  0xda   :  { %v1236_v2 = vrot.slane %v1235_v56, 1  ;;  %v1266_v4 = vmax.f32 %v1264_v51, %v1265_v58  ;;  %v1242_v7 = vmax.f32 %v1240_v50, %v1241_v61  ;;  %v1283_v8 = vsel %vm18_vm0, %v1281_v62, -inf }
  0xdb   :  { %v1282_v9 = vmax.f32 %v1280_v63, %v1668_v53  ;;  %1646 = vst.msk [vmem:[%s3104_s1 + $0x6a] sm:$0x1] %vm33_vm1, %v1218_v1  ;;  %v1261_v12 = vmax.f32 %v1259_v57, %v1260_v3  ;;  %v1284_v14 = vrot.slane %v1283_v8, 4  ;;  %v1307_v18 = vmax.f32 %v1305_v10, %v1673_v0 }
  0xdc   :  { %v1237_v11 = vmax.f32 %v1235_v56, %v1236_v2  ;;  %v1267_v13 = vrot.slane %v1266_v4, 2  ;;  %v1243_v16 = vrot.slane %v1242_v7, 1  ;;  %v1306_v19 = vmax.f32 %v1674_v5, %v1675_v6 }
  0xdd   :  { %v1290_v17 = vsel %vm18_vm0, %v1282_v9, -inf  ;;  %v1262_v20 = vrot.slane %v1261_v12, 1  ;;  %v1285_v22 = vmax.f32 %v1283_v8, %v1284_v14  ;;  %v1309_v25 = vsel %vm18_vm0, %v1307_v18, -inf }
  0xde   :  { %1653 = vst.msk [vmem:[%s3104_s1 + $0x33] sm:$0x1] %vm33_vm1, %v1237_v11  ;;  %v1268_v21 = vmax.f32 %v1266_v4, %v1267_v13  ;;  %v1291_v23 = vrot.slane %v1290_v17, 4  ;;  %v1244_v24 = vmax.f32 %v1242_v7, %v1243_v16  ;;  %v1308_v26 = vmax.f32 %v1306_v19, %v1676_v15 }
  0xdf   :  { %v1263_v27 = vmax.f32 %v1261_v12, %v1262_v20  ;;  %v1286_v29 = vrot.slane %v1285_v22, 2  ;;  %v1310_v31 = vrot.slane %v1309_v25, 4 }
  0xe0   :  { %v1269_v28 = vrot.slane %v1268_v21, 1  ;;  %v1292_v30 = vmax.f32 %v1290_v17, %v1291_v23  ;;  %1654 = vst.msk [vmem:[%s3104_s1 + $0x6b] sm:$0x1] %vm33_vm1, %v1244_v24  ;;  %v1316_v32 = vsel %vm18_vm0, %v1308_v26, -inf }
  0xe1   :  { %1661 = vst.msk [vmem:[%s3104_s1 + $0x34] sm:$0x1] %vm33_vm1, %v1263_v27  ;;  %v1287_v34 = vmax.f32 %v1285_v22, %v1286_v29  ;;  %v1317_v36 = vrot.slane %v1316_v32, 4  ;;  %v1311_v37 = vmax.f32 %v1309_v25, %v1310_v31 }
  0xe2   :  { %v1270_v33 = vmax.f32 %v1268_v21, %v1269_v28  ;;  %v1293_v35 = vrot.slane %v1292_v30, 2 }
  0xe3   :  { %v1288_v38 = vrot.slane %v1287_v34, 1  ;;  %v1318_v40 = vmax.f32 %v1316_v32, %v1317_v36  ;;  %v1312_v41 = vrot.slane %v1311_v37, 2 }
  0xe4   :  { %1662 = vst.msk [vmem:[%s3104_s1 + $0x6c] sm:$0x1] %vm33_vm1, %v1270_v33  ;;  %v1294_v39 = vmax.f32 %v1292_v30, %v1293_v35 }
  0xe5   :  { %v1289_v42 = vmax.f32 %v1287_v34, %v1288_v38  ;;  %v1319_v44 = vrot.slane %v1318_v40, 2  ;;  %v1313_v45 = vmax.f32 %v1311_v37, %v1312_v41 }
  0xe6   :  { %v1295_v43 = vrot.slane %v1294_v39, 1 }
  0xe7   :  { %1669 = vst.msk [vmem:[%s3104_s1 + $0x35] sm:$0x1] %vm33_vm1, %v1289_v42  ;;  %v1320_v47 = vmax.f32 %v1318_v40, %v1319_v44  ;;  %v1314_v48 = vrot.slane %v1313_v45, 1 }
  0xe8   :  { %v1296_v46 = vmax.f32 %v1294_v39, %v1295_v43 }
  0xe9   :  { %v1321_v49 = vrot.slane %v1320_v47, 1  ;;  %v1315_v50 = vmax.f32 %v1313_v45, %v1314_v48 }
  0xea   :  { %1670 = vst.msk [vmem:[%s3104_s1 + $0x6d] sm:$0x1] %vm33_vm1, %v1296_v46 }
  0xeb   :  { %v1322_v51 = vmax.f32 %v1320_v47, %v1321_v49  ;;  %1677 = vst.msk [vmem:[%s3104_s1 + $0x36] sm:$0x1] %vm33_vm1, %v1315_v50 }
  0xed   :  { %1678 = vst.msk [vmem:[%s3104_s1 + $0x6e] sm:$0x1] %vm33_vm1, %v1322_v51 }

</bundles_post_ra>
